<compile_context>
chip_gen: v5e
topology: v5e:2x2
jax: 0.10.0
libtpu: 0.0.40
codegen_flags: <defaults>
</compile_context>

<pallas_src>
import functools
import inspect

import jax
import jax.numpy as jnp
from jax import lax
from jax.experimental import pallas as pl
from jax.experimental.pallas import tpu as pltpu


# Scoped-VMEM request: fits v7x's 64 MiB/core with headroom, well under v5e/v6e's
# 128 MiB physical (raise toward ~100 MiB on v5e/v6e for bigger tiles).
_VMEM_LIMIT_BYTES = 48 * 1024 * 1024


def _supports_pipeline_mode():
    try:
        return (hasattr(pl, "Buffered")
                and "pipeline_mode" in inspect.signature(pl.BlockSpec).parameters)
    except (TypeError, ValueError):
        return False


_HAS_BUFFERED = _supports_pipeline_mode()


def _const_spec(shape):
    """BlockSpec for a grid-constant (weight) block.

    Constant index_map => DMA'd once; single-buffer it when the installed JAX
    exposes pipeline_mode (halves resident weight VMEM, review item)."""
    index_map = lambda *_: (0,) * len(shape)
    if _HAS_BUFFERED:
        return pl.BlockSpec(shape, index_map, pipeline_mode=pl.Buffered(1))
    return pl.BlockSpec(shape, index_map)


def _layer_norm(y, gamma, beta, eps=1e-5):
    mu = jnp.mean(y, axis=-1, keepdims=True)
    var = jnp.mean((y - mu) ** 2, axis=-1, keepdims=True)
    return (y - mu) * lax.rsqrt(var + eps) * gamma + beta


# ----------------------------- kernel 1: fused QKV projection -----------------------

def _qkv_proj_kernel(x_ref, wqkv_ref, bqkv_ref, q_ref, k_ref, v_ref):
    x = x_ref[0]                                             # (ts, D) bf16
    D = x.shape[-1]
    qkv = jnp.dot(x, wqkv_ref[...],
                  preferred_element_type=jnp.float32) + bqkv_ref[...]    # (ts, 3D) f32
    q_ref[0] = qkv[:, 0 * D:1 * D].astype(q_ref.dtype)
    k_ref[0] = qkv[:, 1 * D:2 * D].astype(k_ref.dtype)
    v_ref[0] = qkv[:, 2 * D:3 * D].astype(v_ref.dtype)


def qkv_project(x, wqkv, bqkv, *, ts):
    B, S, D = x.shape
    assert S % ts == 0
    act_spec = pl.BlockSpec((1, ts, D), lambda b, s: (b, s, 0))
    return pl.pallas_call(
        _qkv_proj_kernel,
        out_shape=(jax.ShapeDtypeStruct((B, S, D), jnp.bfloat16),
                   jax.ShapeDtypeStruct((B, S, D), jnp.bfloat16),
                   jax.ShapeDtypeStruct((B, S, D), jnp.bfloat16)),
        grid=(B, S // ts),
        in_specs=[act_spec, _const_spec((D, 3 * D)), _const_spec((1, 3 * D))],
        out_specs=(act_spec, act_spec, act_spec),
        compiler_params=pltpu.CompilerParams(
            dimension_semantics=("parallel", "parallel"),
            vmem_limit_bytes=_VMEM_LIMIT_BYTES),
    )(x, wqkv, bqkv)


# ------------------- kernel 2: flash attention + FFN + ELMo epilogue ----------------

def _attn_ffn_kernel(w_ref, x_ref, q_ref, k_ref, v_ref, bias_ref,
                     wo_ref, bo_ref, g1_ref, be1_ref,
                     w1_ref, b1_ref, w2_ref, b2_ref, g2_ref, be2_ref,
                     acc_in_ref,
                     out_ref, acc_out_ref,
                     m_sc, l_sc, ctx_sc, ffn_sc,
                     *, num_heads, tk, tf):
    NEG = jnp.float32(-1e30)

    x = x_ref[0].astype(jnp.float32)                 # (tq, D) residual stream, f32
    q16 = q_ref[0]                                    # (tq, D) bf16 (bias already added)
    tq, D = x.shape
    H = num_heads
    dh = D // H
    scale = dh ** -0.5
    S = k_ref.shape[1]
    n_kt = S // tk

    # ---- flash attention over key tiles: online softmax, per-head lane slices ----
    m_sc[...] = jnp.full_like(m_sc, NEG)
    l_sc[...] = jnp.zeros_like(l_sc)
    ctx_sc[...] = jnp.zeros_like(ctx_sc)

    @pl.loop(0, n_kt)
    def _(kt):
        kstart = pl.multiple_of(kt * tk, tk)
        b_tile = bias_ref[kt][0]                      # (1, tk) additive key bias, f32

        # Skip fully padded key tiles (no MXU / EUP exp work for them).
        @pl.when(jnp.max(b_tile) > jnp.float32(-1e29))
        def _():
            k_tile = k_ref[0, pl.ds(kstart, tk), :]   # (tk, D) bf16
            v_tile = v_ref[0, pl.ds(kstart, tk), :]   # (tk, D) bf16
            # heads = lane-contiguous slices of D (no reshape/transpose relayouts)
            for h in range(H):
                lo, hi = h * dh, (h + 1) * dh
                s = lax.dot_general(
                    q16[:, lo:hi], k_tile[:, lo:hi],
                    (((1,), (1,)), ((), ())),
                    preferred_element_type=jnp.float32) * scale + b_tile   # (tq, tk)
                m_prev = m_sc[h]                                           # (tq, 1)
                m_new = jnp.maximum(m_prev, jnp.max(s, axis=-1, keepdims=True))
                alpha = jnp.exp(m_prev - m_new)
                p = jnp.exp(s - m_new)
                l_sc[h] = alpha * l_sc[h] + jnp.sum(p, axis=-1, keepdims=True)
                ctx_sc[:, lo:hi] = alpha * ctx_sc[:, lo:hi] + jnp.dot(
                    p.astype(v_tile.dtype), v_tile[:, lo:hi],
                    preferred_element_type=jnp.float32)
                m_sc[h] = m_new

    # normalize each head by its softmax denominator (EUP reciprocal slot)
    for h in range(H):
        lo, hi = h * dh, (h + 1) * dh
        l_safe = jnp.maximum(l_sc[h], jnp.float32(1e-30))
        ctx_sc[:, lo:hi] = ctx_sc[:, lo:hi] * pl.reciprocal(l_safe, approx=True)

    # ---- attention output projection + residual + LN ----
    attn_out = jnp.dot(ctx_sc[...].astype(wo_ref.dtype), wo_ref[...],
                       preferred_element_type=jnp.float32) + bo_ref[...]
    y1 = _layer_norm(x + attn_out, g1_ref[...], be1_ref[...])        # (tq, D) f32
    y1_16 = y1.astype(jnp.bfloat16)

    # ---- position-wise FFN, tiled over ffn_dim (live ranges bounded by pl.loop) ----
    F = w1_ref.shape[0]
    n_ft = F // tf
    ffn_sc[...] = jnp.zeros_like(ffn_sc)

    @pl.loop(0, n_ft)
    def _(ft):
        fstart = pl.multiple_of(ft * tf, tf)
        w1c = w1_ref[pl.ds(fstart, tf), :]                            # (tf, D) bf16
        h1 = jnp.maximum(
            lax.dot_general(y1_16, w1c, (((1,), (1,)), ((), ())),
                            preferred_element_type=jnp.float32) + b1_ref[ft],
            0.0)                                                      # (tq, tf) f32
        ffn_sc[...] += jnp.dot(h1.astype(w2_ref.dtype),
                               w2_ref[pl.ds(fstart, tf), :],
                               preferred_element_type=jnp.float32)    # (tq, D) f32

    y2 = _layer_norm(y1 + ffn_sc[...] + b2_ref[...], g2_ref[...], be2_ref[...])

    out_ref[0] = y2.astype(out_ref.dtype)
    # ELMo scalar-mix epilogue: running f32 accumulator (aliased input/output block).
    acc_out_ref[0] = acc_in_ref[0] + w_ref[0] * y2


def encoder_layer(x, acc, bias_tiles, p, elmo_w, *, num_heads, tq, tk, ts, tf):
    B, S, D = x.shape
    F = p["w1"].shape[0]
    assert D % num_heads == 0 and S % tq == 0 and S % tk == 0 and F % tf == 0

    q, k, v = qkv_project(x, p["wqkv"], p["bqkv"], ts=ts)

    n_kt = S // tk
    n_ft = F // tf
    b1_tiles = p["b1"].reshape(n_ft, 1, tf)

    kern = functools.partial(_attn_ffn_kernel, num_heads=num_heads, tk=tk, tf=tf)
    act_map = lambda b, qi: (b, qi, 0)
    row_map = lambda b, qi: (b, 0, 0)

    flops = int(B * (4 * S * S * D + 2 * S * D * D + 4 * S * D * F))
    bytes_accessed = int(18 * B * S * D + 2 * (D * D + 2 * F * D))
    cost = pl.CostEstimate(flops=flops,
                           transcendentals=int(B * num_heads * S * S),
                           bytes_accessed=bytes_accessed)

    out, acc_out = pl.pallas_call(
        kern,
        out_shape=(jax.ShapeDtypeStruct((B, S, D), jnp.bfloat16),
                   jax.ShapeDtypeStruct((B, S, D), jnp.float32)),
        grid=(B, S // tq),
        in_specs=[
            pl.BlockSpec(memory_space=pltpu.MemorySpace.SMEM),            # 0 elmo w_l
            pl.BlockSpec((1, tq, D), act_map),                            # 1 x (residual)
            pl.BlockSpec((1, tq, D), act_map),                            # 2 q tile
            pl.BlockSpec((1, S, D), row_map),                             # 3 k (full row)
            pl.BlockSpec((1, S, D), row_map),                             # 4 v (full row)
            pl.BlockSpec((n_kt, 1, 1, tk), lambda b, qi: (0, b, 0, 0)),   # 5 key-tile bias
            _const_spec((D, D)), _const_spec((1, D)),                     # 6,7 Wo, bo
            _const_spec((1, D)), _const_spec((1, D)),                     # 8,9 LN1
            _const_spec((F, D)), _const_spec((n_ft, 1, tf)),              # 10,11 W1, b1
            _const_spec((F, D)), _const_spec((1, D)),                     # 12,13 W2, b2
            _const_spec((1, D)), _const_spec((1, D)),                     # 14,15 LN2
            pl.BlockSpec((1, tq, D), act_map),                            # 16 ELMo acc in
        ],
        out_specs=(pl.BlockSpec((1, tq, D), act_map),
                   pl.BlockSpec((1, tq, D), act_map)),
        scratch_shapes=[pltpu.VMEM((num_heads, tq, 1), jnp.float32),      # running max
                        pltpu.VMEM((num_heads, tq, 1), jnp.float32),      # running sum
                        pltpu.VMEM((tq, D), jnp.float32),                 # ctx accum
                        pltpu.VMEM((tq, D), jnp.float32)],                # ffn accum
        input_output_aliases={16: 1},
        compiler_params=pltpu.CompilerParams(
            dimension_semantics=("parallel", "parallel"),
            vmem_limit_bytes=_VMEM_LIMIT_BYTES),
        cost_estimate=cost,
    )(elmo_w, x, q, k, v, bias_tiles, p["wo"], p["bo"], p["ln1_g"], p["ln1_b"],
      p["w1"], b1_tiles, p["w2"], p["b2"], p["ln2_g"], p["ln2_b"], acc)
    return out, acc_out


# ------------------------- kernel 3: final ELMo standardization ---------------------

def _standardize_kernel(acc_ref, o_ref):
    y = acc_ref[0]                                   # (tq, D) f32 ELMo mix
    D = y.shape[-1]
    mu = jnp.mean(y, axis=-1, keepdims=True)
    # torch.std default: unbiased (divide by D-1), no epsilon (documented match).
    var = jnp.sum((y - mu) ** 2, axis=-1, keepdims=True) * (1.0 / (D - 1))
    o_ref[0] = (y - mu) * lax.rsqrt(var)


def standardize(acc, *, tq):
    B, S, D = acc.shape
    spec = pl.BlockSpec((1, tq, D), lambda b, qi: (b, qi, 0))
    return pl.pallas_call(
        _standardize_kernel,
        out_shape=jax.ShapeDtypeStruct((B, S, D), jnp.float32),
        grid=(B, S // tq),
        in_specs=[spec],
        out_specs=spec,
        compiler_params=pltpu.CompilerParams(
            dimension_semantics=("parallel", "parallel"),
            vmem_limit_bytes=_VMEM_LIMIT_BYTES),
    )(acc)


# ----------------------------- glue: params, embeddings, forward --------------------

def sinusoidal_pos_encoding(max_len, d_model):
    pos = jnp.arange(max_len, dtype=jnp.float32)[:, None]
    idx = jnp.arange(d_model, dtype=jnp.float32)[None, :]
    rates = 1.0 / jnp.power(10000.0, (2.0 * jnp.floor(idx / 2.0)) / d_model)
    angles = pos * rates
    even = (jnp.arange(d_model) % 2) == 0
    return jnp.where(even[None, :], jnp.sin(angles), jnp.cos(angles)).astype(jnp.float32)


def init_params(key, vocab_size, max_seq_len, num_layers, d_model, ffn_dim):
    keys = jax.random.split(key, 1 + num_layers)
    embed = (jax.random.normal(keys[0], (vocab_size, d_model), jnp.float32)
             * 0.1).astype(jnp.bfloat16)

    def lin(k, r, c):
        return (jax.random.normal(k, (r, c), jnp.float32) * 0.05).astype(jnp.bfloat16)

    layers = []
    for i in range(num_layers):
        ks = jax.random.split(keys[1 + i], 4)
        layers.append(dict(
            wqkv=lin(ks[0], d_model, 3 * d_model),          # (in, 3*out)
            bqkv=jnp.zeros((1, 3 * d_model), jnp.float32),
            wo=lin(ks[1], d_model, d_model),                # (in, out)
            bo=jnp.zeros((1, d_model), jnp.float32),
            ln1_g=jnp.ones((1, d_model), jnp.float32),
            ln1_b=jnp.zeros((1, d_model), jnp.float32),
            w1=lin(ks[2], ffn_dim, d_model),                # (F, D): sublane-sliceable
            b1=jnp.zeros((1, ffn_dim), jnp.float32),
            w2=lin(ks[3], ffn_dim, d_model),                # (F, D): sublane-sliceable
            b2=jnp.zeros((1, d_model), jnp.float32),
            ln2_g=jnp.ones((1, d_model), jnp.float32),
            ln2_b=jnp.zeros((1, d_model), jnp.float32)))

    # ELMo scalar mix: softmax(s) * gamma (gamma=1), deterministic synthetic init.
    elmo_mix = jax.nn.softmax(jnp.arange(num_layers + 1, dtype=jnp.float32) * 0.1)

    return {"embed": embed,
            "pos_enc": sinusoidal_pos_encoding(max_seq_len, d_model),
            "layers": layers,
            "elmo_mix": elmo_mix}


def encoder_forward(x_ids, params, *, num_heads):
    # seq_embedding(x): gather + positional encoding (kept as thin JAX glue).
    emb = params["embed"][x_ids].astype(jnp.float32)                   # (B, S, D)
    B, S, D = emb.shape
    out_f32 = emb + params["pos_enc"][:S][None, :, :]
    out = out_f32.astype(jnp.bfloat16)

    # tile sizes: whole rows at demo shapes, 128-wide tiles at production shapes
    tq = tk = ts = min(S, 128)
    F = params["layers"][0]["w1"].shape[0]
    tf = min(F, 512)

    # ELMo running mix; state 0 = positional-encoded embedding.
    acc = params["elmo_mix"][0] * out_f32                              # (B, S, D) f32

    # padding_mask(x, x): additive key bias pre-tiled per key tile as
    # (n_kt, B, 1, tk) so the in-kernel key loop indexes it on a leading axis.
    n_kt = S // tk
    pad_bias = (x_ids == 0).astype(jnp.float32) * jnp.float32(-1e30)   # (B, S)
    bias_tiles = pad_bias.reshape(B, n_kt, tk).transpose(1, 0, 2).reshape(n_kt, B, 1, tk)

    # TODO(synk): dropout (p=0.0 in the reference default) is omitted.
    for i, lp in enumerate(params["layers"]):
        out, acc = encoder_layer(out, acc, bias_tiles, lp,
                                 params["elmo_mix"][i + 1:i + 2],
                                 num_heads=num_heads, tq=tq, tk=tk, ts=ts, tf=tf)

    # final (mix - mean) / std, per position over d_model
    return standardize(acc, tq=tq)


# ----------------------------- main --------------------------------------------------

if __name__ == "__main__":
    # Small, shape-consistent configuration (d_model=32 stands in for 512, etc.)
    VOCAB, MAX_LEN = 50, 8
    NUM_LAYERS, D_MODEL, NUM_HEADS, FFN_DIM = 2, 32, 4, 64
    B, S = 2, 8

    key = jax.random.PRNGKey(0)
    pkey, xkey = jax.random.split(key)
    params = init_params(pkey, VOCAB, MAX_LEN, NUM_LAYERS, D_MODEL, FFN_DIM)

    # token ids in [1, VOCAB) so no fully-padded rows (pad id = 0)
    x_ids = jax.random.randint(xkey, (B, S), 1, VOCAB, dtype=jnp.int32)

    fwd = jax.jit(functools.partial(encoder_forward, num_heads=NUM_HEADS))
    out = jax.block_until_ready(fwd(x_ids, params))

    assert out.shape == (B, S, D_MODEL), out.shape
    assert bool(jnp.all(jnp.isfinite(out)))
    print("KERNEL_OK")
</pallas_src>

<mosaic_0001>
module attributes {stable_mosaic.version = 11 : i64} {
  func.func @_standardize_kernel(%arg0: i32, %arg1: i32, %arg2: memref<1x8x32xf32, #tpu.memory_space<vmem>>, %arg3: memref<1x8x32xf32, #tpu.memory_space<vmem>>) attributes {dimension_semantics = [#tpu.dimension_semantics<parallel>, #tpu.dimension_semantics<parallel>], iteration_bounds = array<i64: 2, 1>, scalar_prefetch = 0 : i64, scratch_operands = 0 : i64, tpu.core_type = #tpu.core_type<tc>, window_params = [{transform_indices = @transform_0, window_bounds = array<i64: 1, 8, 32>}, {transform_indices = @transform_1, window_bounds = array<i64: 1, 8, 32>}]} {
    %c0 = arith.constant 0 : index
    %c0_0 = arith.constant 0 : index
    %c0_1 = arith.constant 0 : index
    %0 = vector.load %arg2[%c0, %c0_0, %c0_1] : memref<1x8x32xf32, #tpu.memory_space<vmem>>, vector<1x8x32xf32>
    %1 = vector.shape_cast %0 : vector<1x8x32xf32> to vector<8x32xf32>
    %cst = arith.constant dense<0.000000e+00> : vector<8xf32>
    %2 = vector.multi_reduction <add>, %1, %cst [1] : vector<8x32xf32> to vector<8xf32>
    %3 = vector.shape_cast %2 : vector<8xf32> to vector<8x1xf32>
    %cst_2 = arith.constant 3.200000e+01 : f32
    %4 = vector.broadcast %cst_2 : f32 to vector<8x1xf32>
    %5 = arith.divf %3, %4 : vector<8x1xf32>
    %6 = vector.broadcast %5 : vector<8x1xf32> to vector<8x32xf32>
    %7 = arith.subf %1, %6 : vector<8x32xf32>
    %8 = arith.mulf %7, %7 : vector<8x32xf32>
    %cst_3 = arith.constant dense<0.000000e+00> : vector<8xf32>
    %9 = vector.multi_reduction <add>, %8, %cst_3 [1] : vector<8x32xf32> to vector<8xf32>
    %10 = vector.shape_cast %9 : vector<8xf32> to vector<8x1xf32>
    %cst_4 = arith.constant 0.0322580636 : f32
    %11 = vector.broadcast %cst_4 : f32 to vector<8x1xf32>
    %12 = arith.mulf %10, %11 : vector<8x1xf32>
    %13 = vector.broadcast %5 : vector<8x1xf32> to vector<8x32xf32>
    %14 = arith.subf %1, %13 : vector<8x32xf32>
    %15 = math.rsqrt %12 : vector<8x1xf32>
    %16 = vector.broadcast %15 : vector<8x1xf32> to vector<8x32xf32>
    %17 = arith.mulf %14, %16 : vector<8x32xf32>
    %c0_5 = arith.constant 0 : index
    %c0_6 = arith.constant 0 : index
    %c0_7 = arith.constant 0 : index
    %18 = vector.load %arg3[%c0_5, %c0_6, %c0_7] : memref<1x8x32xf32, #tpu.memory_space<vmem>>, vector<1x8x32xf32>
    %19 = vector.shape_cast %18 : vector<1x8x32xf32> to vector<8x32xf32>
    %20 = vector.shape_cast %17 : vector<8x32xf32> to vector<1x8x32xf32>
    tpu.vector_store %arg3[%c0_5, %c0_6, %c0_7], %20 {strides = array<i32>} : memref<1x8x32xf32, #tpu.memory_space<vmem>>, vector<1x8x32xf32>,
    return
  }
  func.func @transform_0(%arg0: i32, %arg1: i32) -> (i32, i32, i32) {
    %c0_i32 = arith.constant 0 : i32
    %c0_i32_0 = arith.constant 0 : i32
    return %arg0, %arg1, %c0_i32 : i32, i32, i32
  }
  func.func @transform_1(%arg0: i32, %arg1: i32) -> (i32, i32, i32) {
    %c0_i32 = arith.constant 0 : i32
    %c0_i32_0 = arith.constant 0 : i32
    return %arg0, %arg1, %c0_i32 : i32, i32, i32
  }
}

module attributes {stable_mosaic.version = 11 : i64} {
  func.func @_qkv_proj_kernel(%arg0: i32, %arg1: i32, %arg2: memref<1x8x32xbf16, #tpu.memory_space<vmem>>, %arg3: memref<32x96xbf16, #tpu.memory_space<vmem>>, %arg4: memref<1x96xf32, #tpu.memory_space<vmem>>, %arg5: memref<1x8x32xbf16, #tpu.memory_space<vmem>>, %arg6: memref<1x8x32xbf16, #tpu.memory_space<vmem>>, %arg7: memref<1x8x32xbf16, #tpu.memory_space<vmem>>) attributes {dimension_semantics = [#tpu.dimension_semantics<parallel>, #tpu.dimension_semantics<parallel>], iteration_bounds = array<i64: 2, 1>, scalar_prefetch = 0 : i64, scratch_operands = 0 : i64, tpu.core_type = #tpu.core_type<tc>, window_params = [{transform_indices = @transform_0, window_bounds = array<i64: 1, 8, 32>}, {pipeline_mode = #tpu.pipeline_mode<synchronous>, transform_indices = @transform_1, window_bounds = array<i64: 32, 96>}, {pipeline_mode = #tpu.pipeline_mode<synchronous>, transform_indices = @transform_2, window_bounds = array<i64: 1, 96>}, {transform_indices = @transform_3, window_bounds = array<i64: 1, 8, 32>}, {transform_indices = @transform_4, window_bounds = array<i64: 1, 8, 32>}, {transform_indices = @transform_5, window_bounds = array<i64: 1, 8, 32>}]} {
    %c0 = arith.constant 0 : index
    %c0_0 = arith.constant 0 : index
    %c0_1 = arith.constant 0 : index
    %0 = vector.load %arg2[%c0, %c0_0, %c0_1] : memref<1x8x32xbf16, #tpu.memory_space<vmem>>, vector<1x8x32xbf16>
    %1 = vector.shape_cast %0 : vector<1x8x32xbf16> to vector<8x32xbf16>
    %c0_2 = arith.constant 0 : index
    %c0_3 = arith.constant 0 : index
    %2 = vector.load %arg3[%c0_2, %c0_3] : memref<32x96xbf16, #tpu.memory_space<vmem>>, vector<32x96xbf16>
    %cst = arith.constant dense<0.000000e+00> : vector<8x96xf32>
    %3 = tpu.matmul %1, %2, %cst {dimension_numbers = #tpu.dot_dimension_numbers<[1], [0], [0], [1], [0, 0, 1, 1], [], []>} : vector<8x32xbf16>, vector<32x96xbf16>, vector<8x96xf32> -> vector<8x96xf32>
    %c0_4 = arith.constant 0 : index
    %c0_5 = arith.constant 0 : index
    %4 = vector.load %arg4[%c0_4, %c0_5] : memref<1x96xf32, #tpu.memory_space<vmem>>, vector<1x96xf32>
    %5 = vector.broadcast %4 : vector<1x96xf32> to vector<8x96xf32>
    %6 = arith.addf %3, %5 : vector<8x96xf32>
    %7 = vector.extract_strided_slice %6 {offsets = [0, 0], sizes = [8, 32], strides = [1, 1]} : vector<8x96xf32> to vector<8x32xf32>
    %8 = arith.truncf %7 : vector<8x32xf32> to vector<8x32xbf16>
    %c0_6 = arith.constant 0 : index
    %c0_7 = arith.constant 0 : index
    %c0_8 = arith.constant 0 : index
    %9 = vector.load %arg5[%c0_6, %c0_7, %c0_8] : memref<1x8x32xbf16, #tpu.memory_space<vmem>>, vector<1x8x32xbf16>
    %10 = vector.shape_cast %9 : vector<1x8x32xbf16> to vector<8x32xbf16>
    %11 = vector.shape_cast %8 : vector<8x32xbf16> to vector<1x8x32xbf16>
    tpu.vector_store %arg5[%c0_6, %c0_7, %c0_8], %11 {strides = array<i32>} : memref<1x8x32xbf16, #tpu.memory_space<vmem>>, vector<1x8x32xbf16>,
    %12 = vector.extract_strided_slice %6 {offsets = [0, 32], sizes = [8, 32], strides = [1, 1]} : vector<8x96xf32> to vector<8x32xf32>
    %13 = arith.truncf %12 : vector<8x32xf32> to vector<8x32xbf16>
    %c0_9 = arith.constant 0 : index
    %c0_10 = arith.constant 0 : index
    %c0_11 = arith.constant 0 : index
    %14 = vector.load %arg6[%c0_9, %c0_10, %c0_11] : memref<1x8x32xbf16, #tpu.memory_space<vmem>>, vector<1x8x32xbf16>
    %15 = vector.shape_cast %14 : vector<1x8x32xbf16> to vector<8x32xbf16>
    %16 = vector.shape_cast %13 : vector<8x32xbf16> to vector<1x8x32xbf16>
    tpu.vector_store %arg6[%c0_9, %c0_10, %c0_11], %16 {strides = array<i32>} : memref<1x8x32xbf16, #tpu.memory_space<vmem>>, vector<1x8x32xbf16>,
    %17 = vector.extract_strided_slice %6 {offsets = [0, 64], sizes = [8, 32], strides = [1, 1]} : vector<8x96xf32> to vector<8x32xf32>
    %18 = arith.truncf %17 : vector<8x32xf32> to vector<8x32xbf16>
    %c0_12 = arith.constant 0 : index
    %c0_13 = arith.constant 0 : index
    %c0_14 = arith.constant 0 : index
    %19 = vector.load %arg7[%c0_12, %c0_13, %c0_14] : memref<1x8x32xbf16, #tpu.memory_space<vmem>>, vector<1x8x32xbf16>
    %20 = vector.shape_cast %19 : vector<1x8x32xbf16> to vector<8x32xbf16>
    %21 = vector.shape_cast %18 : vector<8x32xbf16> to vector<1x8x32xbf16>
    tpu.vector_store %arg7[%c0_12, %c0_13, %c0_14], %21 {strides = array<i32>} : memref<1x8x32xbf16, #tpu.memory_space<vmem>>, vector<1x8x32xbf16>,
    return
  }
  func.func @transform_0(%arg0: i32, %arg1: i32) -> (i32, i32, i32) {
    %c0_i32 = arith.constant 0 : i32
    %c0_i32_0 = arith.constant 0 : i32
    return %arg0, %arg1, %c0_i32 : i32, i32, i32
  }
  func.func @transform_1(%arg0: i32, %arg1: i32) -> (i32, i32) {
    %c0_i32 = arith.constant 0 : i32
    %c0_i32_0 = arith.constant 0 : i32
    %c0_i32_1 = arith.constant 0 : i32
    return %c0_i32, %c0_i32_0 : i32, i32
  }
  func.func @transform_2(%arg0: i32, %arg1: i32) -> (i32, i32) {
    %c0_i32 = arith.constant 0 : i32
    %c0_i32_0 = arith.constant 0 : i32
    %c0_i32_1 = arith.constant 0 : i32
    return %c0_i32, %c0_i32_0 : i32, i32
  }
  func.func @transform_3(%arg0: i32, %arg1: i32) -> (i32, i32, i32) {
    %c0_i32 = arith.constant 0 : i32
    %c0_i32_0 = arith.constant 0 : i32
    return %arg0, %arg1, %c0_i32 : i32, i32, i32
  }
  func.func @transform_4(%arg0: i32, %arg1: i32) -> (i32, i32, i32) {
    %c0_i32 = arith.constant 0 : i32
    %c0_i32_0 = arith.constant 0 : i32
    return %arg0, %arg1, %c0_i32 : i32, i32, i32
  }
  func.func @transform_5(%arg0: i32, %arg1: i32) -> (i32, i32, i32) {
    %c0_i32 = arith.constant 0 : i32
    %c0_i32_0 = arith.constant 0 : i32
    return %arg0, %arg1, %c0_i32 : i32, i32, i32
  }
}

module attributes {stable_mosaic.version = 11 : i64} {
  func.func @_attn_ffn_kernel(%arg0: i32, %arg1: i32, %arg2: memref<1xf32, #tpu.memory_space<smem>>, %arg3: memref<1x8x32xbf16, #tpu.memory_space<vmem>>, %arg4: memref<1x8x32xbf16, #tpu.memory_space<vmem>>, %arg5: memref<1x8x32xbf16, #tpu.memory_space<vmem>>, %arg6: memref<1x8x32xbf16, #tpu.memory_space<vmem>>, %arg7: memref<1x1x1x8xf32, #tpu.memory_space<vmem>>, %arg8: memref<32x32xbf16, #tpu.memory_space<vmem>>, %arg9: memref<1x32xf32, #tpu.memory_space<vmem>>, %arg10: memref<1x32xf32, #tpu.memory_space<vmem>>, %arg11: memref<1x32xf32, #tpu.memory_space<vmem>>, %arg12: memref<64x32xbf16, #tpu.memory_space<vmem>>, %arg13: memref<1x1x64xf32, #tpu.memory_space<vmem>>, %arg14: memref<64x32xbf16, #tpu.memory_space<vmem>>, %arg15: memref<1x32xf32, #tpu.memory_space<vmem>>, %arg16: memref<1x32xf32, #tpu.memory_space<vmem>>, %arg17: memref<1x32xf32, #tpu.memory_space<vmem>>, %arg18: memref<1x8x32xf32, #tpu.memory_space<vmem>>, %arg19: memref<1x8x32xbf16, #tpu.memory_space<vmem>>, %arg20: memref<1x8x32xf32, #tpu.memory_space<vmem>>, %arg21: memref<4x8x1xf32, #tpu.memory_space<vmem>>, %arg22: memref<4x8x1xf32, #tpu.memory_space<vmem>>, %arg23: memref<8x32xf32, #tpu.memory_space<vmem>>, %arg24: memref<8x32xf32, #tpu.memory_space<vmem>>) attributes {dimension_semantics = [#tpu.dimension_semantics<parallel>, #tpu.dimension_semantics<parallel>], iteration_bounds = array<i64: 2, 1>, scalar_prefetch = 0 : i64, scratch_operands = 4 : i64, tpu.core_type = #tpu.core_type<tc>, window_params = [{transform_indices = @transform_0, window_bounds = array<i64: 1>}, {transform_indices = @transform_1, window_bounds = array<i64: 1, 8, 32>}, {transform_indices = @transform_2, window_bounds = array<i64: 1, 8, 32>}, {transform_indices = @transform_3, window_bounds = array<i64: 1, 8, 32>}, {transform_indices = @transform_4, window_bounds = array<i64: 1, 8, 32>}, {transform_indices = @transform_5, window_bounds = array<i64: 1, 1, 1, 8>}, {pipeline_mode = #tpu.pipeline_mode<synchronous>, transform_indices = @transform_6, window_bounds = array<i64: 32, 32>}, {pipeline_mode = #tpu.pipeline_mode<synchronous>, transform_indices = @transform_7, window_bounds = array<i64: 1, 32>}, {pipeline_mode = #tpu.pipeline_mode<synchronous>, transform_indices = @transform_8, window_bounds = array<i64: 1, 32>}, {pipeline_mode = #tpu.pipeline_mode<synchronous>, transform_indices = @transform_9, window_bounds = array<i64: 1, 32>}, {pipeline_mode = #tpu.pipeline_mode<synchronous>, transform_indices = @transform_10, window_bounds = array<i64: 64, 32>}, {pipeline_mode = #tpu.pipeline_mode<synchronous>, transform_indices = @transform_11, window_bounds = array<i64: 1, 1, 64>}, {pipeline_mode = #tpu.pipeline_mode<synchronous>, transform_indices = @transform_12, window_bounds = array<i64: 64, 32>}, {pipeline_mode = #tpu.pipeline_mode<synchronous>, transform_indices = @transform_13, window_bounds = array<i64: 1, 32>}, {pipeline_mode = #tpu.pipeline_mode<synchronous>, transform_indices = @transform_14, window_bounds = array<i64: 1, 32>}, {pipeline_mode = #tpu.pipeline_mode<synchronous>, transform_indices = @transform_15, window_bounds = array<i64: 1, 32>}, {transform_indices = @transform_16, window_bounds = array<i64: 1, 8, 32>}, {transform_indices = @transform_17, window_bounds = array<i64: 1, 8, 32>}, {transform_indices = @transform_18, window_bounds = array<i64: 1, 8, 32>}]} {
    %c0 = arith.constant 0 : index
    %c0_0 = arith.constant 0 : index
    %c0_1 = arith.constant 0 : index
    %0 = vector.load %arg3[%c0, %c0_0, %c0_1] : memref<1x8x32xbf16, #tpu.memory_space<vmem>>, vector<1x8x32xbf16>
    %1 = vector.shape_cast %0 : vector<1x8x32xbf16> to vector<8x32xbf16>
    %2 = arith.extf %1 : vector<8x32xbf16> to vector<8x32xf32>
    %c0_2 = arith.constant 0 : index
    %c0_3 = arith.constant 0 : index
    %c0_4 = arith.constant 0 : index
    %3 = vector.load %arg4[%c0_2, %c0_3, %c0_4] : memref<1x8x32xbf16, #tpu.memory_space<vmem>>, vector<1x8x32xbf16>
    %4 = vector.shape_cast %3 : vector<1x8x32xbf16> to vector<8x32xbf16>
    %cst = arith.constant -1.000000e+30 : f32
    %5 = vector.broadcast %cst : f32 to vector<4x8x1xf32>
    %c0_5 = arith.constant 0 : index
    %c0_6 = arith.constant 0 : index
    %c0_7 = arith.constant 0 : index
    %6 = vector.load %arg21[%c0_5, %c0_6, %c0_7] : memref<4x8x1xf32, #tpu.memory_space<vmem>>, vector<4x8x1xf32>
    tpu.vector_store %arg21[%c0_5, %c0_6, %c0_7], %5 {strides = array<i32>} : memref<4x8x1xf32, #tpu.memory_space<vmem>>, vector<4x8x1xf32>,
    %cst_8 = arith.constant 0.000000e+00 : f32
    %7 = vector.broadcast %cst_8 : f32 to vector<4x8x1xf32>
    %c0_9 = arith.constant 0 : index
    %c0_10 = arith.constant 0 : index
    %c0_11 = arith.constant 0 : index
    %8 = vector.load %arg22[%c0_9, %c0_10, %c0_11] : memref<4x8x1xf32, #tpu.memory_space<vmem>>, vector<4x8x1xf32>
    tpu.vector_store %arg22[%c0_9, %c0_10, %c0_11], %7 {strides = array<i32>} : memref<4x8x1xf32, #tpu.memory_space<vmem>>, vector<4x8x1xf32>,
    %cst_12 = arith.constant 0.000000e+00 : f32
    %9 = vector.broadcast %cst_12 : f32 to vector<8x32xf32>
    %c0_13 = arith.constant 0 : index
    %c0_14 = arith.constant 0 : index
    %10 = vector.load %arg23[%c0_13, %c0_14] : memref<8x32xf32, #tpu.memory_space<vmem>>, vector<8x32xf32>
    tpu.vector_store %arg23[%c0_13, %c0_14], %9 {strides = array<i32>} : memref<8x32xf32, #tpu.memory_space<vmem>>, vector<8x32xf32>,
    %c0_i32 = arith.constant 0 : i32
    %c1_i32 = arith.constant 1 : i32
    %11 = arith.muli %c0_i32, %c1_i32 : i32
    %c0_i32_15 = arith.constant 0 : i32
    %12 = arith.addi %c0_i32_15, %11 : i32
    %c8_i32 = arith.constant 8 : i32
    %13 = arith.muli %12, %c8_i32 : i32
    %14 = tpu.assume_multiple %13, 8 : i32
    %15 = arith.index_cast %12 : i32 to index
    %c0_16 = arith.constant 0 : index
    %c0_17 = arith.constant 0 : index
    %c0_18 = arith.constant 0 : index
    %16 = vector.load %arg7[%15, %c0_16, %c0_17, %c0_18] : memref<1x1x1x8xf32, #tpu.memory_space<vmem>>, vector<1x1x1x8xf32>
    %17 = vector.shape_cast %16 : vector<1x1x1x8xf32> to vector<1x1x8xf32>
    %18 = vector.shape_cast %17 : vector<1x1x8xf32> to vector<1x8xf32>
    %19 = vector.shape_cast %18 : vector<1x8xf32> to vector<1x1x8xf32>
    %cst_19 = arith.constant dense<0xFF800000> : vector<1xf32>
    %20 = vector.multi_reduction <maximumf>, %19, %cst_19 [1, 2] : vector<1x1x8xf32> to vector<1xf32>
    %21 = vector.shape_cast %20 : vector<1xf32> to vector<1x1x1xf32>
    %22 = vector.extract %21[0, 0, 0] : f32 from vector<1x1x1xf32>
    %cst_20 = arith.constant -1.000000e+29 : f32
    %23 = arith.cmpf ogt, %22, %cst_20 : f32
    %24 = arith.extui %23 : i1 to i32
    %c0_i32_21 = arith.constant 0 : i32
    %25 = arith.cmpi ne, %24, %c0_i32_21 : i32
    scf.if %25 {
      %c0_106 = arith.constant 0 : index
      %160 = arith.index_cast %14 : i32 to index
      %c0_107 = arith.constant 0 : index
      %161 = vector.load %arg5[%c0_106, %160, %c0_107] : memref<1x8x32xbf16, #tpu.memory_space<vmem>>, vector<1x8x32xbf16>
      %162 = vector.shape_cast %161 : vector<1x8x32xbf16> to vector<8x32xbf16>
      %c0_108 = arith.constant 0 : index
      %163 = arith.index_cast %14 : i32 to index
      %c0_109 = arith.constant 0 : index
      %164 = vector.load %arg6[%c0_108, %163, %c0_109] : memref<1x8x32xbf16, #tpu.memory_space<vmem>>, vector<1x8x32xbf16>
      %165 = vector.shape_cast %164 : vector<1x8x32xbf16> to vector<8x32xbf16>
      %166 = vector.extract_strided_slice %4 {offsets = [0, 0], sizes = [8, 8], strides = [1, 1]} : vector<8x32xbf16> to vector<8x8xbf16>
      %167 = vector.extract_strided_slice %162 {offsets = [0, 0], sizes = [8, 8], strides = [1, 1]} : vector<8x32xbf16> to vector<8x8xbf16>
      %cst_110 = arith.constant dense<0.000000e+00> : vector<8x8xf32>
      %168 = tpu.matmul %166, %167, %cst_110 {dimension_numbers = #tpu.dot_dimension_numbers<[1], [1], [0], [0], [0, 0, 1, 0], [], []>} : vector<8x8xbf16>, vector<8x8xbf16>, vector<8x8xf32> -> vector<8x8xf32>
      %cst_111 = arith.constant 0.353553385 : f32
      %169 = vector.broadcast %cst_111 : f32 to vector<8x8xf32>
      %170 = arith.mulf %168, %169 : vector<8x8xf32>
      %171 = vector.broadcast %18 : vector<1x8xf32> to vector<8x8xf32>
      %172 = arith.addf %170, %171 : vector<8x8xf32>
      %c0_112 = arith.constant 0 : index
      %c0_113 = arith.constant 0 : index
      %c0_114 = arith.constant 0 : index
      %173 = vector.load %arg21[%c0_112, %c0_113, %c0_114] : memref<4x8x1xf32, #tpu.memory_space<vmem>>, vector<1x8x1xf32>
      %174 = vector.shape_cast %173 : vector<1x8x1xf32> to vector<8x1xf32>
      %cst_115 = arith.constant dense<0xFF800000> : vector<8xf32>
      %175 = vector.multi_reduction <maximumf>, %172, %cst_115 [1] : vector<8x8xf32> to vector<8xf32>
      %176 = vector.shape_cast %175 : vector<8xf32> to vector<8x1xf32>
      %177 = arith.maximumf %174, %176 : vector<8x1xf32>
      %178 = arith.subf %174, %177 : vector<8x1xf32>
      %179 = math.exp %178 : vector<8x1xf32>
      %180 = vector.broadcast %177 : vector<8x1xf32> to vector<8x8xf32>
      %181 = arith.subf %172, %180 : vector<8x8xf32>
      %182 = math.exp %181 : vector<8x8xf32>
      %c0_116 = arith.constant 0 : index
      %c0_117 = arith.constant 0 : index
      %c0_118 = arith.constant 0 : index
      %183 = vector.load %arg22[%c0_116, %c0_117, %c0_118] : memref<4x8x1xf32, #tpu.memory_space<vmem>>, vector<1x8x1xf32>
      %184 = vector.shape_cast %183 : vector<1x8x1xf32> to vector<8x1xf32>
      %185 = arith.mulf %179, %184 : vector<8x1xf32>
      %cst_119 = arith.constant dense<0.000000e+00> : vector<8xf32>
      %186 = vector.multi_reduction <add>, %182, %cst_119 [1] : vector<8x8xf32> to vector<8xf32>
      %187 = vector.shape_cast %186 : vector<8xf32> to vector<8x1xf32>
      %188 = arith.addf %185, %187 : vector<8x1xf32>
      %c0_120 = arith.constant 0 : index
      %c0_121 = arith.constant 0 : index
      %c0_122 = arith.constant 0 : index
      %189 = vector.load %arg22[%c0_120, %c0_121, %c0_122] : memref<4x8x1xf32, #tpu.memory_space<vmem>>, vector<1x8x1xf32>
      %190 = vector.shape_cast %189 : vector<1x8x1xf32> to vector<8x1xf32>
      %191 = vector.shape_cast %188 : vector<8x1xf32> to vector<1x8x1xf32>
      tpu.vector_store %arg22[%c0_120, %c0_121, %c0_122], %191 {strides = array<i32>} : memref<4x8x1xf32, #tpu.memory_space<vmem>>, vector<1x8x1xf32>,
      %c0_123 = arith.constant 0 : index
      %c0_124 = arith.constant 0 : index
      %192 = vector.load %arg23[%c0_123, %c0_124] : memref<8x32xf32, #tpu.memory_space<vmem>>, vector<8x8xf32>
      %193 = vector.broadcast %179 : vector<8x1xf32> to vector<8x8xf32>
      %194 = arith.mulf %193, %192 : vector<8x8xf32>
      %195 = arith.truncf %182 : vector<8x8xf32> to vector<8x8xbf16>
      %196 = vector.extract_strided_slice %165 {offsets = [0, 0], sizes = [8, 8], strides = [1, 1]} : vector<8x32xbf16> to vector<8x8xbf16>
      %cst_125 = arith.constant dense<0.000000e+00> : vector<8x8xf32>
      %197 = tpu.matmul %195, %196, %cst_125 {dimension_numbers = #tpu.dot_dimension_numbers<[1], [0], [0], [1], [0, 0, 1, 1], [], []>} : vector<8x8xbf16>, vector<8x8xbf16>, vector<8x8xf32> -> vector<8x8xf32>
      %198 = arith.addf %194, %197 : vector<8x8xf32>
      %c0_126 = arith.constant 0 : index
      %c0_127 = arith.constant 0 : index
      %199 = vector.load %arg23[%c0_126, %c0_127] : memref<8x32xf32, #tpu.memory_space<vmem>>, vector<8x8xf32>
      tpu.vector_store %arg23[%c0_126, %c0_127], %198 {strides = array<i32>} : memref<8x32xf32, #tpu.memory_space<vmem>>, vector<8x8xf32>,
      %c0_128 = arith.constant 0 : index
      %c0_129 = arith.constant 0 : index
      %c0_130 = arith.constant 0 : index
      %200 = vector.load %arg21[%c0_128, %c0_129, %c0_130] : memref<4x8x1xf32, #tpu.memory_space<vmem>>, vector<1x8x1xf32>
      %201 = vector.shape_cast %200 : vector<1x8x1xf32> to vector<8x1xf32>
      %202 = vector.shape_cast %177 : vector<8x1xf32> to vector<1x8x1xf32>
      tpu.vector_store %arg21[%c0_128, %c0_129, %c0_130], %202 {strides = array<i32>} : memref<4x8x1xf32, #tpu.memory_space<vmem>>, vector<1x8x1xf32>,
      %203 = vector.extract_strided_slice %4 {offsets = [0, 8], sizes = [8, 8], strides = [1, 1]} : vector<8x32xbf16> to vector<8x8xbf16>
      %204 = vector.extract_strided_slice %162 {offsets = [0, 8], sizes = [8, 8], strides = [1, 1]} : vector<8x32xbf16> to vector<8x8xbf16>
      %cst_131 = arith.constant dense<0.000000e+00> : vector<8x8xf32>
      %205 = tpu.matmul %203, %204, %cst_131 {dimension_numbers = #tpu.dot_dimension_numbers<[1], [1], [0], [0], [0, 0, 1, 0], [], []>} : vector<8x8xbf16>, vector<8x8xbf16>, vector<8x8xf32> -> vector<8x8xf32>
      %cst_132 = arith.constant 0.353553385 : f32
      %206 = vector.broadcast %cst_132 : f32 to vector<8x8xf32>
      %207 = arith.mulf %205, %206 : vector<8x8xf32>
      %208 = vector.broadcast %18 : vector<1x8xf32> to vector<8x8xf32>
      %209 = arith.addf %207, %208 : vector<8x8xf32>
      %c1_133 = arith.constant 1 : index
      %c0_134 = arith.constant 0 : index
      %c0_135 = arith.constant 0 : index
      %210 = vector.load %arg21[%c1_133, %c0_134, %c0_135] : memref<4x8x1xf32, #tpu.memory_space<vmem>>, vector<1x8x1xf32>
      %211 = vector.shape_cast %210 : vector<1x8x1xf32> to vector<8x1xf32>
      %cst_136 = arith.constant dense<0xFF800000> : vector<8xf32>
      %212 = vector.multi_reduction <maximumf>, %209, %cst_136 [1] : vector<8x8xf32> to vector<8xf32>
      %213 = vector.shape_cast %212 : vector<8xf32> to vector<8x1xf32>
      %214 = arith.maximumf %211, %213 : vector<8x1xf32>
      %215 = arith.subf %211, %214 : vector<8x1xf32>
      %216 = math.exp %215 : vector<8x1xf32>
      %217 = vector.broadcast %214 : vector<8x1xf32> to vector<8x8xf32>
      %218 = arith.subf %209, %217 : vector<8x8xf32>
      %219 = math.exp %218 : vector<8x8xf32>
      %c1_137 = arith.constant 1 : index
      %c0_138 = arith.constant 0 : index
      %c0_139 = arith.constant 0 : index
      %220 = vector.load %arg22[%c1_137, %c0_138, %c0_139] : memref<4x8x1xf32, #tpu.memory_space<vmem>>, vector<1x8x1xf32>
      %221 = vector.shape_cast %220 : vector<1x8x1xf32> to vector<8x1xf32>
      %222 = arith.mulf %216, %221 : vector<8x1xf32>
      %cst_140 = arith.constant dense<0.000000e+00> : vector<8xf32>
      %223 = vector.multi_reduction <add>, %219, %cst_140 [1] : vector<8x8xf32> to vector<8xf32>
      %224 = vector.shape_cast %223 : vector<8xf32> to vector<8x1xf32>
      %225 = arith.addf %222, %224 : vector<8x1xf32>
      %c1_141 = arith.constant 1 : index
      %c0_142 = arith.constant 0 : index
      %c0_143 = arith.constant 0 : index
      %226 = vector.load %arg22[%c1_141, %c0_142, %c0_143] : memref<4x8x1xf32, #tpu.memory_space<vmem>>, vector<1x8x1xf32>
      %227 = vector.shape_cast %226 : vector<1x8x1xf32> to vector<8x1xf32>
      %228 = vector.shape_cast %225 : vector<8x1xf32> to vector<1x8x1xf32>
      tpu.vector_store %arg22[%c1_141, %c0_142, %c0_143], %228 {strides = array<i32>} : memref<4x8x1xf32, #tpu.memory_space<vmem>>, vector<1x8x1xf32>,
      %c0_144 = arith.constant 0 : index
      %c8_145 = arith.constant 8 : index
      %229 = vector.load %arg23[%c0_144, %c8_145] : memref<8x32xf32, #tpu.memory_space<vmem>>, vector<8x8xf32>
      %230 = vector.broadcast %216 : vector<8x1xf32> to vector<8x8xf32>
      %231 = arith.mulf %230, %229 : vector<8x8xf32>
      %232 = arith.truncf %219 : vector<8x8xf32> to vector<8x8xbf16>
      %233 = vector.extract_strided_slice %165 {offsets = [0, 8], sizes = [8, 8], strides = [1, 1]} : vector<8x32xbf16> to vector<8x8xbf16>
      %cst_146 = arith.constant dense<0.000000e+00> : vector<8x8xf32>
      %234 = tpu.matmul %232, %233, %cst_146 {dimension_numbers = #tpu.dot_dimension_numbers<[1], [0], [0], [1], [0, 0, 1, 1], [], []>} : vector<8x8xbf16>, vector<8x8xbf16>, vector<8x8xf32> -> vector<8x8xf32>
      %235 = arith.addf %231, %234 : vector<8x8xf32>
      %c0_147 = arith.constant 0 : index
      %c8_148 = arith.constant 8 : index
      %236 = vector.load %arg23[%c0_147, %c8_148] : memref<8x32xf32, #tpu.memory_space<vmem>>, vector<8x8xf32>
      tpu.vector_store %arg23[%c0_147, %c8_148], %235 {strides = array<i32>} : memref<8x32xf32, #tpu.memory_space<vmem>>, vector<8x8xf32>,
      %c1_149 = arith.constant 1 : index
      %c0_150 = arith.constant 0 : index
      %c0_151 = arith.constant 0 : index
      %237 = vector.load %arg21[%c1_149, %c0_150, %c0_151] : memref<4x8x1xf32, #tpu.memory_space<vmem>>, vector<1x8x1xf32>
      %238 = vector.shape_cast %237 : vector<1x8x1xf32> to vector<8x1xf32>
      %239 = vector.shape_cast %214 : vector<8x1xf32> to vector<1x8x1xf32>
      tpu.vector_store %arg21[%c1_149, %c0_150, %c0_151], %239 {strides = array<i32>} : memref<4x8x1xf32, #tpu.memory_space<vmem>>, vector<1x8x1xf32>,
      %240 = vector.extract_strided_slice %4 {offsets = [0, 16], sizes = [8, 8], strides = [1, 1]} : vector<8x32xbf16> to vector<8x8xbf16>
      %241 = vector.extract_strided_slice %162 {offsets = [0, 16], sizes = [8, 8], strides = [1, 1]} : vector<8x32xbf16> to vector<8x8xbf16>
      %cst_152 = arith.constant dense<0.000000e+00> : vector<8x8xf32>
      %242 = tpu.matmul %240, %241, %cst_152 {dimension_numbers = #tpu.dot_dimension_numbers<[1], [1], [0], [0], [0, 0, 1, 0], [], []>} : vector<8x8xbf16>, vector<8x8xbf16>, vector<8x8xf32> -> vector<8x8xf32>
      %cst_153 = arith.constant 0.353553385 : f32
      %243 = vector.broadcast %cst_153 : f32 to vector<8x8xf32>
      %244 = arith.mulf %242, %243 : vector<8x8xf32>
      %245 = vector.broadcast %18 : vector<1x8xf32> to vector<8x8xf32>
      %246 = arith.addf %244, %245 : vector<8x8xf32>
      %c2_154 = arith.constant 2 : index
      %c0_155 = arith.constant 0 : index
      %c0_156 = arith.constant 0 : index
      %247 = vector.load %arg21[%c2_154, %c0_155, %c0_156] : memref<4x8x1xf32, #tpu.memory_space<vmem>>, vector<1x8x1xf32>
      %248 = vector.shape_cast %247 : vector<1x8x1xf32> to vector<8x1xf32>
      %cst_157 = arith.constant dense<0xFF800000> : vector<8xf32>
      %249 = vector.multi_reduction <maximumf>, %246, %cst_157 [1] : vector<8x8xf32> to vector<8xf32>
      %250 = vector.shape_cast %249 : vector<8xf32> to vector<8x1xf32>
      %251 = arith.maximumf %248, %250 : vector<8x1xf32>
      %252 = arith.subf %248, %251 : vector<8x1xf32>
      %253 = math.exp %252 : vector<8x1xf32>
      %254 = vector.broadcast %251 : vector<8x1xf32> to vector<8x8xf32>
      %255 = arith.subf %246, %254 : vector<8x8xf32>
      %256 = math.exp %255 : vector<8x8xf32>
      %c2_158 = arith.constant 2 : index
      %c0_159 = arith.constant 0 : index
      %c0_160 = arith.constant 0 : index
      %257 = vector.load %arg22[%c2_158, %c0_159, %c0_160] : memref<4x8x1xf32, #tpu.memory_space<vmem>>, vector<1x8x1xf32>
      %258 = vector.shape_cast %257 : vector<1x8x1xf32> to vector<8x1xf32>
      %259 = arith.mulf %253, %258 : vector<8x1xf32>
      %cst_161 = arith.constant dense<0.000000e+00> : vector<8xf32>
      %260 = vector.multi_reduction <add>, %256, %cst_161 [1] : vector<8x8xf32> to vector<8xf32>
      %261 = vector.shape_cast %260 : vector<8xf32> to vector<8x1xf32>
      %262 = arith.addf %259, %261 : vector<8x1xf32>
      %c2_162 = arith.constant 2 : index
      %c0_163 = arith.constant 0 : index
      %c0_164 = arith.constant 0 : index
      %263 = vector.load %arg22[%c2_162, %c0_163, %c0_164] : memref<4x8x1xf32, #tpu.memory_space<vmem>>, vector<1x8x1xf32>
      %264 = vector.shape_cast %263 : vector<1x8x1xf32> to vector<8x1xf32>
      %265 = vector.shape_cast %262 : vector<8x1xf32> to vector<1x8x1xf32>
      tpu.vector_store %arg22[%c2_162, %c0_163, %c0_164], %265 {strides = array<i32>} : memref<4x8x1xf32, #tpu.memory_space<vmem>>, vector<1x8x1xf32>,
      %c0_165 = arith.constant 0 : index
      %c16_166 = arith.constant 16 : index
      %266 = vector.load %arg23[%c0_165, %c16_166] : memref<8x32xf32, #tpu.memory_space<vmem>>, vector<8x8xf32>
      %267 = vector.broadcast %253 : vector<8x1xf32> to vector<8x8xf32>
      %268 = arith.mulf %267, %266 : vector<8x8xf32>
      %269 = arith.truncf %256 : vector<8x8xf32> to vector<8x8xbf16>
      %270 = vector.extract_strided_slice %165 {offsets = [0, 16], sizes = [8, 8], strides = [1, 1]} : vector<8x32xbf16> to vector<8x8xbf16>
      %cst_167 = arith.constant dense<0.000000e+00> : vector<8x8xf32>
      %271 = tpu.matmul %269, %270, %cst_167 {dimension_numbers = #tpu.dot_dimension_numbers<[1], [0], [0], [1], [0, 0, 1, 1], [], []>} : vector<8x8xbf16>, vector<8x8xbf16>, vector<8x8xf32> -> vector<8x8xf32>
      %272 = arith.addf %268, %271 : vector<8x8xf32>
      %c0_168 = arith.constant 0 : index
      %c16_169 = arith.constant 16 : index
      %273 = vector.load %arg23[%c0_168, %c16_169] : memref<8x32xf32, #tpu.memory_space<vmem>>, vector<8x8xf32>
      tpu.vector_store %arg23[%c0_168, %c16_169], %272 {strides = array<i32>} : memref<8x32xf32, #tpu.memory_space<vmem>>, vector<8x8xf32>,
      %c2_170 = arith.constant 2 : index
      %c0_171 = arith.constant 0 : index
      %c0_172 = arith.constant 0 : index
      %274 = vector.load %arg21[%c2_170, %c0_171, %c0_172] : memref<4x8x1xf32, #tpu.memory_space<vmem>>, vector<1x8x1xf32>
      %275 = vector.shape_cast %274 : vector<1x8x1xf32> to vector<8x1xf32>
      %276 = vector.shape_cast %251 : vector<8x1xf32> to vector<1x8x1xf32>
      tpu.vector_store %arg21[%c2_170, %c0_171, %c0_172], %276 {strides = array<i32>} : memref<4x8x1xf32, #tpu.memory_space<vmem>>, vector<1x8x1xf32>,
      %277 = vector.extract_strided_slice %4 {offsets = [0, 24], sizes = [8, 8], strides = [1, 1]} : vector<8x32xbf16> to vector<8x8xbf16>
      %278 = vector.extract_strided_slice %162 {offsets = [0, 24], sizes = [8, 8], strides = [1, 1]} : vector<8x32xbf16> to vector<8x8xbf16>
      %cst_173 = arith.constant dense<0.000000e+00> : vector<8x8xf32>
      %279 = tpu.matmul %277, %278, %cst_173 {dimension_numbers = #tpu.dot_dimension_numbers<[1], [1], [0], [0], [0, 0, 1, 0], [], []>} : vector<8x8xbf16>, vector<8x8xbf16>, vector<8x8xf32> -> vector<8x8xf32>
      %cst_174 = arith.constant 0.353553385 : f32
      %280 = vector.broadcast %cst_174 : f32 to vector<8x8xf32>
      %281 = arith.mulf %279, %280 : vector<8x8xf32>
      %282 = vector.broadcast %18 : vector<1x8xf32> to vector<8x8xf32>
      %283 = arith.addf %281, %282 : vector<8x8xf32>
      %c3_175 = arith.constant 3 : index
      %c0_176 = arith.constant 0 : index
      %c0_177 = arith.constant 0 : index
      %284 = vector.load %arg21[%c3_175, %c0_176, %c0_177] : memref<4x8x1xf32, #tpu.memory_space<vmem>>, vector<1x8x1xf32>
      %285 = vector.shape_cast %284 : vector<1x8x1xf32> to vector<8x1xf32>
      %cst_178 = arith.constant dense<0xFF800000> : vector<8xf32>
      %286 = vector.multi_reduction <maximumf>, %283, %cst_178 [1] : vector<8x8xf32> to vector<8xf32>
      %287 = vector.shape_cast %286 : vector<8xf32> to vector<8x1xf32>
      %288 = arith.maximumf %285, %287 : vector<8x1xf32>
      %289 = arith.subf %285, %288 : vector<8x1xf32>
      %290 = math.exp %289 : vector<8x1xf32>
      %291 = vector.broadcast %288 : vector<8x1xf32> to vector<8x8xf32>
      %292 = arith.subf %283, %291 : vector<8x8xf32>
      %293 = math.exp %292 : vector<8x8xf32>
      %c3_179 = arith.constant 3 : index
      %c0_180 = arith.constant 0 : index
      %c0_181 = arith.constant 0 : index
      %294 = vector.load %arg22[%c3_179, %c0_180, %c0_181] : memref<4x8x1xf32, #tpu.memory_space<vmem>>, vector<1x8x1xf32>
      %295 = vector.shape_cast %294 : vector<1x8x1xf32> to vector<8x1xf32>
      %296 = arith.mulf %290, %295 : vector<8x1xf32>
      %cst_182 = arith.constant dense<0.000000e+00> : vector<8xf32>
      %297 = vector.multi_reduction <add>, %293, %cst_182 [1] : vector<8x8xf32> to vector<8xf32>
      %298 = vector.shape_cast %297 : vector<8xf32> to vector<8x1xf32>
      %299 = arith.addf %296, %298 : vector<8x1xf32>
      %c3_183 = arith.constant 3 : index
      %c0_184 = arith.constant 0 : index
      %c0_185 = arith.constant 0 : index
      %300 = vector.load %arg22[%c3_183, %c0_184, %c0_185] : memref<4x8x1xf32, #tpu.memory_space<vmem>>, vector<1x8x1xf32>
      %301 = vector.shape_cast %300 : vector<1x8x1xf32> to vector<8x1xf32>
      %302 = vector.shape_cast %299 : vector<8x1xf32> to vector<1x8x1xf32>
      tpu.vector_store %arg22[%c3_183, %c0_184, %c0_185], %302 {strides = array<i32>} : memref<4x8x1xf32, #tpu.memory_space<vmem>>, vector<1x8x1xf32>,
      %c0_186 = arith.constant 0 : index
      %c24_187 = arith.constant 24 : index
      %303 = vector.load %arg23[%c0_186, %c24_187] : memref<8x32xf32, #tpu.memory_space<vmem>>, vector<8x8xf32>
      %304 = vector.broadcast %290 : vector<8x1xf32> to vector<8x8xf32>
      %305 = arith.mulf %304, %303 : vector<8x8xf32>
      %306 = arith.truncf %293 : vector<8x8xf32> to vector<8x8xbf16>
      %307 = vector.extract_strided_slice %165 {offsets = [0, 24], sizes = [8, 8], strides = [1, 1]} : vector<8x32xbf16> to vector<8x8xbf16>
      %cst_188 = arith.constant dense<0.000000e+00> : vector<8x8xf32>
      %308 = tpu.matmul %306, %307, %cst_188 {dimension_numbers = #tpu.dot_dimension_numbers<[1], [0], [0], [1], [0, 0, 1, 1], [], []>} : vector<8x8xbf16>, vector<8x8xbf16>, vector<8x8xf32> -> vector<8x8xf32>
      %309 = arith.addf %305, %308 : vector<8x8xf32>
      %c0_189 = arith.constant 0 : index
      %c24_190 = arith.constant 24 : index
      %310 = vector.load %arg23[%c0_189, %c24_190] : memref<8x32xf32, #tpu.memory_space<vmem>>, vector<8x8xf32>
      tpu.vector_store %arg23[%c0_189, %c24_190], %309 {strides = array<i32>} : memref<8x32xf32, #tpu.memory_space<vmem>>, vector<8x8xf32>,
      %c3_191 = arith.constant 3 : index
      %c0_192 = arith.constant 0 : index
      %c0_193 = arith.constant 0 : index
      %311 = vector.load %arg21[%c3_191, %c0_192, %c0_193] : memref<4x8x1xf32, #tpu.memory_space<vmem>>, vector<1x8x1xf32>
      %312 = vector.shape_cast %311 : vector<1x8x1xf32> to vector<8x1xf32>
      %313 = vector.shape_cast %288 : vector<8x1xf32> to vector<1x8x1xf32>
      tpu.vector_store %arg21[%c3_191, %c0_192, %c0_193], %313 {strides = array<i32>} : memref<4x8x1xf32, #tpu.memory_space<vmem>>, vector<1x8x1xf32>,
    } else {
    }
    %c1_i32_22 = arith.constant 1 : i32
    %c0_23 = arith.constant 0 : index
    %c0_24 = arith.constant 0 : index
    %c0_25 = arith.constant 0 : index
    %26 = vector.load %arg22[%c0_23, %c0_24, %c0_25] : memref<4x8x1xf32, #tpu.memory_space<vmem>>, vector<1x8x1xf32>
    %27 = vector.shape_cast %26 : vector<1x8x1xf32> to vector<8x1xf32>
    %cst_26 = arith.constant 1.000000e-30 : f32
    %28 = vector.broadcast %cst_26 : f32 to vector<8x1xf32>
    %29 = arith.maximumf %27, %28 : vector<8x1xf32>
    %c0_27 = arith.constant 0 : index
    %c0_28 = arith.constant 0 : index
    %30 = vector.load %arg23[%c0_27, %c0_28] : memref<8x32xf32, #tpu.memory_space<vmem>>, vector<8x8xf32>
    %31 = tpu.reciprocal %29 {approx = true} : vector<8x1xf32> -> vector<8x1xf32>
    %32 = vector.broadcast %31 : vector<8x1xf32> to vector<8x8xf32>
    %33 = arith.mulf %30, %32 : vector<8x8xf32>
    %c0_29 = arith.constant 0 : index
    %c0_30 = arith.constant 0 : index
    %34 = vector.load %arg23[%c0_29, %c0_30] : memref<8x32xf32, #tpu.memory_space<vmem>>, vector<8x8xf32>
    tpu.vector_store %arg23[%c0_29, %c0_30], %33 {strides = array<i32>} : memref<8x32xf32, #tpu.memory_space<vmem>>, vector<8x8xf32>,
    %c1 = arith.constant 1 : index
    %c0_31 = arith.constant 0 : index
    %c0_32 = arith.constant 0 : index
    %35 = vector.load %arg22[%c1, %c0_31, %c0_32] : memref<4x8x1xf32, #tpu.memory_space<vmem>>, vector<1x8x1xf32>
    %36 = vector.shape_cast %35 : vector<1x8x1xf32> to vector<8x1xf32>
    %cst_33 = arith.constant 1.000000e-30 : f32
    %37 = vector.broadcast %cst_33 : f32 to vector<8x1xf32>
    %38 = arith.maximumf %36, %37 : vector<8x1xf32>
    %c0_34 = arith.constant 0 : index
    %c8 = arith.constant 8 : index
    %39 = vector.load %arg23[%c0_34, %c8] : memref<8x32xf32, #tpu.memory_space<vmem>>, vector<8x8xf32>
    %40 = tpu.reciprocal %38 {approx = true} : vector<8x1xf32> -> vector<8x1xf32>
    %41 = vector.broadcast %40 : vector<8x1xf32> to vector<8x8xf32>
    %42 = arith.mulf %39, %41 : vector<8x8xf32>
    %c0_35 = arith.constant 0 : index
    %c8_36 = arith.constant 8 : index
    %43 = vector.load %arg23[%c0_35, %c8_36] : memref<8x32xf32, #tpu.memory_space<vmem>>, vector<8x8xf32>
    tpu.vector_store %arg23[%c0_35, %c8_36], %42 {strides = array<i32>} : memref<8x32xf32, #tpu.memory_space<vmem>>, vector<8x8xf32>,
    %c2 = arith.constant 2 : index
    %c0_37 = arith.constant 0 : index
    %c0_38 = arith.constant 0 : index
    %44 = vector.load %arg22[%c2, %c0_37, %c0_38] : memref<4x8x1xf32, #tpu.memory_space<vmem>>, vector<1x8x1xf32>
    %45 = vector.shape_cast %44 : vector<1x8x1xf32> to vector<8x1xf32>
    %cst_39 = arith.constant 1.000000e-30 : f32
    %46 = vector.broadcast %cst_39 : f32 to vector<8x1xf32>
    %47 = arith.maximumf %45, %46 : vector<8x1xf32>
    %c0_40 = arith.constant 0 : index
    %c16 = arith.constant 16 : index
    %48 = vector.load %arg23[%c0_40, %c16] : memref<8x32xf32, #tpu.memory_space<vmem>>, vector<8x8xf32>
    %49 = tpu.reciprocal %47 {approx = true} : vector<8x1xf32> -> vector<8x1xf32>
    %50 = vector.broadcast %49 : vector<8x1xf32> to vector<8x8xf32>
    %51 = arith.mulf %48, %50 : vector<8x8xf32>
    %c0_41 = arith.constant 0 : index
    %c16_42 = arith.constant 16 : index
    %52 = vector.load %arg23[%c0_41, %c16_42] : memref<8x32xf32, #tpu.memory_space<vmem>>, vector<8x8xf32>
    tpu.vector_store %arg23[%c0_41, %c16_42], %51 {strides = array<i32>} : memref<8x32xf32, #tpu.memory_space<vmem>>, vector<8x8xf32>,
    %c3 = arith.constant 3 : index
    %c0_43 = arith.constant 0 : index
    %c0_44 = arith.constant 0 : index
    %53 = vector.load %arg22[%c3, %c0_43, %c0_44] : memref<4x8x1xf32, #tpu.memory_space<vmem>>, vector<1x8x1xf32>
    %54 = vector.shape_cast %53 : vector<1x8x1xf32> to vector<8x1xf32>
    %cst_45 = arith.constant 1.000000e-30 : f32
    %55 = vector.broadcast %cst_45 : f32 to vector<8x1xf32>
    %56 = arith.maximumf %54, %55 : vector<8x1xf32>
    %c0_46 = arith.constant 0 : index
    %c24 = arith.constant 24 : index
    %57 = vector.load %arg23[%c0_46, %c24] : memref<8x32xf32, #tpu.memory_space<vmem>>, vector<8x8xf32>
    %58 = tpu.reciprocal %56 {approx = true} : vector<8x1xf32> -> vector<8x1xf32>
    %59 = vector.broadcast %58 : vector<8x1xf32> to vector<8x8xf32>
    %60 = arith.mulf %57, %59 : vector<8x8xf32>
    %c0_47 = arith.constant 0 : index
    %c24_48 = arith.constant 24 : index
    %61 = vector.load %arg23[%c0_47, %c24_48] : memref<8x32xf32, #tpu.memory_space<vmem>>, vector<8x8xf32>
    tpu.vector_store %arg23[%c0_47, %c24_48], %60 {strides = array<i32>} : memref<8x32xf32, #tpu.memory_space<vmem>>, vector<8x8xf32>,
    %c0_49 = arith.constant 0 : index
    %c0_50 = arith.constant 0 : index
    %62 = vector.load %arg23[%c0_49, %c0_50] : memref<8x32xf32, #tpu.memory_space<vmem>>, vector<8x32xf32>
    %63 = arith.truncf %62 : vector<8x32xf32> to vector<8x32xbf16>
    %c0_51 = arith.constant 0 : index
    %c0_52 = arith.constant 0 : index
    %64 = vector.load %arg8[%c0_51, %c0_52] : memref<32x32xbf16, #tpu.memory_space<vmem>>, vector<32x32xbf16>
    %cst_53 = arith.constant dense<0.000000e+00> : vector<8x32xf32>
    %65 = tpu.matmul %63, %64, %cst_53 {dimension_numbers = #tpu.dot_dimension_numbers<[1], [0], [0], [1], [0, 0, 1, 1], [], []>} : vector<8x32xbf16>, vector<32x32xbf16>, vector<8x32xf32> -> vector<8x32xf32>
    %c0_54 = arith.constant 0 : index
    %c0_55 = arith.constant 0 : index
    %66 = vector.load %arg9[%c0_54, %c0_55] : memref<1x32xf32, #tpu.memory_space<vmem>>, vector<1x32xf32>
    %67 = vector.broadcast %66 : vector<1x32xf32> to vector<8x32xf32>
    %68 = arith.addf %65, %67 : vector<8x32xf32>
    %69 = arith.addf %2, %68 : vector<8x32xf32>
    %c0_56 = arith.constant 0 : index
    %c0_57 = arith.constant 0 : index
    %70 = vector.load %arg10[%c0_56, %c0_57] : memref<1x32xf32, #tpu.memory_space<vmem>>, vector<1x32xf32>
    %c0_58 = arith.constant 0 : index
    %c0_59 = arith.constant 0 : index
    %71 = vector.load %arg11[%c0_58, %c0_59] : memref<1x32xf32, #tpu.memory_space<vmem>>, vector<1x32xf32>
    %cst_60 = arith.constant dense<0.000000e+00> : vector<8xf32>
    %72 = vector.multi_reduction <add>, %69, %cst_60 [1] : vector<8x32xf32> to vector<8xf32>
    %73 = vector.shape_cast %72 : vector<8xf32> to vector<8x1xf32>
    %cst_61 = arith.constant 3.200000e+01 : f32
    %74 = vector.broadcast %cst_61 : f32 to vector<8x1xf32>
    %75 = arith.divf %73, %74 : vector<8x1xf32>
    %76 = vector.broadcast %75 : vector<8x1xf32> to vector<8x32xf32>
    %77 = arith.subf %69, %76 : vector<8x32xf32>
    %78 = arith.mulf %77, %77 : vector<8x32xf32>
    %cst_62 = arith.constant dense<0.000000e+00> : vector<8xf32>
    %79 = vector.multi_reduction <add>, %78, %cst_62 [1] : vector<8x32xf32> to vector<8xf32>
    %80 = vector.shape_cast %79 : vector<8xf32> to vector<8x1xf32>
    %cst_63 = arith.constant 3.200000e+01 : f32
    %81 = vector.broadcast %cst_63 : f32 to vector<8x1xf32>
    %82 = arith.divf %80, %81 : vector<8x1xf32>
    %83 = vector.broadcast %75 : vector<8x1xf32> to vector<8x32xf32>
    %84 = arith.subf %69, %83 : vector<8x32xf32>
    %cst_64 = arith.constant 9.99999974E-6 : f32
    %85 = vector.broadcast %cst_64 : f32 to vector<8x1xf32>
    %86 = arith.addf %82, %85 : vector<8x1xf32>
    %87 = math.rsqrt %86 : vector<8x1xf32>
    %88 = vector.broadcast %87 : vector<8x1xf32> to vector<8x32xf32>
    %89 = arith.mulf %84, %88 : vector<8x32xf32>
    %90 = vector.broadcast %70 : vector<1x32xf32> to vector<8x32xf32>
    %91 = arith.mulf %89, %90 : vector<8x32xf32>
    %92 = vector.broadcast %71 : vector<1x32xf32> to vector<8x32xf32>
    %93 = arith.addf %91, %92 : vector<8x32xf32>
    %94 = arith.truncf %93 : vector<8x32xf32> to vector<8x32xbf16>
    %cst_65 = arith.constant 0.000000e+00 : f32
    %95 = vector.broadcast %cst_65 : f32 to vector<8x32xf32>
    %c0_66 = arith.constant 0 : index
    %c0_67 = arith.constant 0 : index
    %96 = vector.load %arg24[%c0_66, %c0_67] : memref<8x32xf32, #tpu.memory_space<vmem>>, vector<8x32xf32>
    tpu.vector_store %arg24[%c0_66, %c0_67], %95 {strides = array<i32>} : memref<8x32xf32, #tpu.memory_space<vmem>>, vector<8x32xf32>,
    %c0_i32_68 = arith.constant 0 : i32
    %c1_i32_69 = arith.constant 1 : i32
    %97 = arith.muli %c0_i32_68, %c1_i32_69 : i32
    %c0_i32_70 = arith.constant 0 : i32
    %98 = arith.addi %c0_i32_70, %97 : i32
    %c64_i32 = arith.constant 64 : i32
    %99 = arith.muli %98, %c64_i32 : i32
    %100 = tpu.assume_multiple %99, 64 : i32
    %101 = arith.index_cast %100 : i32 to index
    %c0_71 = arith.constant 0 : index
    %102 = vector.load %arg12[%101, %c0_71] : memref<64x32xbf16, #tpu.memory_space<vmem>>, vector<64x32xbf16>
    %cst_72 = arith.constant dense<0.000000e+00> : vector<8x64xf32>
    %103 = tpu.matmul %94, %102, %cst_72 {dimension_numbers = #tpu.dot_dimension_numbers<[1], [1], [0], [0], [0, 0, 1, 0], [], []>} : vector<8x32xbf16>, vector<64x32xbf16>, vector<8x64xf32> -> vector<8x64xf32>
    %104 = arith.index_cast %98 : i32 to index
    %c0_73 = arith.constant 0 : index
    %c0_74 = arith.constant 0 : index
    %105 = vector.load %arg13[%104, %c0_73, %c0_74] : memref<1x1x64xf32, #tpu.memory_space<vmem>>, vector<1x1x64xf32>
    %106 = vector.shape_cast %105 : vector<1x1x64xf32> to vector<1x64xf32>
    %107 = vector.broadcast %106 : vector<1x64xf32> to vector<8x64xf32>
    %108 = arith.addf %103, %107 : vector<8x64xf32>
    %cst_75 = arith.constant 0.000000e+00 : f32
    %109 = vector.broadcast %cst_75 : f32 to vector<8x64xf32>
    %110 = arith.maximumf %108, %109 : vector<8x64xf32>
    %c0_76 = arith.constant 0 : index
    %c0_77 = arith.constant 0 : index
    %111 = vector.load %arg24[%c0_76, %c0_77] : memref<8x32xf32, #tpu.memory_space<vmem>>, vector<8x32xf32>
    %112 = arith.truncf %110 : vector<8x64xf32> to vector<8x64xbf16>
    %113 = arith.index_cast %100 : i32 to index
    %c0_78 = arith.constant 0 : index
    %114 = vector.load %arg14[%113, %c0_78] : memref<64x32xbf16, #tpu.memory_space<vmem>>, vector<64x32xbf16>
    %cst_79 = arith.constant dense<0.000000e+00> : vector<8x32xf32>
    %115 = tpu.matmul %112, %114, %cst_79 {dimension_numbers = #tpu.dot_dimension_numbers<[1], [0], [0], [1], [0, 0, 1, 1], [], []>} : vector<8x64xbf16>, vector<64x32xbf16>, vector<8x32xf32> -> vector<8x32xf32>
    %116 = arith.addf %111, %115 : vector<8x32xf32>
    %c0_80 = arith.constant 0 : index
    %c0_81 = arith.constant 0 : index
    %117 = vector.load %arg24[%c0_80, %c0_81] : memref<8x32xf32, #tpu.memory_space<vmem>>, vector<8x32xf32>
    tpu.vector_store %arg24[%c0_80, %c0_81], %116 {strides = array<i32>} : memref<8x32xf32, #tpu.memory_space<vmem>>, vector<8x32xf32>,
    %c1_i32_82 = arith.constant 1 : i32
    %c0_83 = arith.constant 0 : index
    %c0_84 = arith.constant 0 : index
    %118 = vector.load %arg24[%c0_83, %c0_84] : memref<8x32xf32, #tpu.memory_space<vmem>>, vector<8x32xf32>
    %119 = arith.addf %93, %118 : vector<8x32xf32>
    %c0_85 = arith.constant 0 : index
    %c0_86 = arith.constant 0 : index
    %120 = vector.load %arg15[%c0_85, %c0_86] : memref<1x32xf32, #tpu.memory_space<vmem>>, vector<1x32xf32>
    %121 = vector.broadcast %120 : vector<1x32xf32> to vector<8x32xf32>
    %122 = arith.addf %119, %121 : vector<8x32xf32>
    %c0_87 = arith.constant 0 : index
    %c0_88 = arith.constant 0 : index
    %123 = vector.load %arg16[%c0_87, %c0_88] : memref<1x32xf32, #tpu.memory_space<vmem>>, vector<1x32xf32>
    %c0_89 = arith.constant 0 : index
    %c0_90 = arith.constant 0 : index
    %124 = vector.load %arg17[%c0_89, %c0_90] : memref<1x32xf32, #tpu.memory_space<vmem>>, vector<1x32xf32>
    %cst_91 = arith.constant dense<0.000000e+00> : vector<8xf32>
    %125 = vector.multi_reduction <add>, %122, %cst_91 [1] : vector<8x32xf32> to vector<8xf32>
    %126 = vector.shape_cast %125 : vector<8xf32> to vector<8x1xf32>
    %cst_92 = arith.constant 3.200000e+01 : f32
    %127 = vector.broadcast %cst_92 : f32 to vector<8x1xf32>
    %128 = arith.divf %126, %127 : vector<8x1xf32>
    %129 = vector.broadcast %128 : vector<8x1xf32> to vector<8x32xf32>
    %130 = arith.subf %122, %129 : vector<8x32xf32>
    %131 = arith.mulf %130, %130 : vector<8x32xf32>
    %cst_93 = arith.constant dense<0.000000e+00> : vector<8xf32>
    %132 = vector.multi_reduction <add>, %131, %cst_93 [1] : vector<8x32xf32> to vector<8xf32>
    %133 = vector.shape_cast %132 : vector<8xf32> to vector<8x1xf32>
    %cst_94 = arith.constant 3.200000e+01 : f32
    %134 = vector.broadcast %cst_94 : f32 to vector<8x1xf32>
    %135 = arith.divf %133, %134 : vector<8x1xf32>
    %136 = vector.broadcast %128 : vector<8x1xf32> to vector<8x32xf32>
    %137 = arith.subf %122, %136 : vector<8x32xf32>
    %cst_95 = arith.constant 9.99999974E-6 : f32
    %138 = vector.broadcast %cst_95 : f32 to vector<8x1xf32>
    %139 = arith.addf %135, %138 : vector<8x1xf32>
    %140 = math.rsqrt %139 : vector<8x1xf32>
    %141 = vector.broadcast %140 : vector<8x1xf32> to vector<8x32xf32>
    %142 = arith.mulf %137, %141 : vector<8x32xf32>
    %143 = vector.broadcast %123 : vector<1x32xf32> to vector<8x32xf32>
    %144 = arith.mulf %142, %143 : vector<8x32xf32>
    %145 = vector.broadcast %124 : vector<1x32xf32> to vector<8x32xf32>
    %146 = arith.addf %144, %145 : vector<8x32xf32>
    %147 = arith.truncf %146 : vector<8x32xf32> to vector<8x32xbf16>
    %c0_96 = arith.constant 0 : index
    %c0_97 = arith.constant 0 : index
    %c0_98 = arith.constant 0 : index
    %148 = vector.load %arg19[%c0_96, %c0_97, %c0_98] : memref<1x8x32xbf16, #tpu.memory_space<vmem>>, vector<1x8x32xbf16>
    %149 = vector.shape_cast %148 : vector<1x8x32xbf16> to vector<8x32xbf16>
    %150 = vector.shape_cast %147 : vector<8x32xbf16> to vector<1x8x32xbf16>
    tpu.vector_store %arg19[%c0_96, %c0_97, %c0_98], %150 {strides = array<i32>} : memref<1x8x32xbf16, #tpu.memory_space<vmem>>, vector<1x8x32xbf16>,
    %c0_99 = arith.constant 0 : index
    %c0_100 = arith.constant 0 : index
    %c0_101 = arith.constant 0 : index
    %151 = vector.load %arg18[%c0_99, %c0_100, %c0_101] : memref<1x8x32xf32, #tpu.memory_space<vmem>>, vector<1x8x32xf32>
    %152 = vector.shape_cast %151 : vector<1x8x32xf32> to vector<8x32xf32>
    %c0_102 = arith.constant 0 : index
    %153 = memref.load %arg2[%c0_102] : memref<1xf32, #tpu.memory_space<smem>>
    %154 = vector.broadcast %153 : f32 to vector<8x32xf32>
    %155 = arith.mulf %154, %146 : vector<8x32xf32>
    %156 = arith.addf %152, %155 : vector<8x32xf32>
    %c0_103 = arith.constant 0 : index
    %c0_104 = arith.constant 0 : index
    %c0_105 = arith.constant 0 : index
    %157 = vector.load %arg20[%c0_103, %c0_104, %c0_105] : memref<1x8x32xf32, #tpu.memory_space<vmem>>, vector<1x8x32xf32>
    %158 = vector.shape_cast %157 : vector<1x8x32xf32> to vector<8x32xf32>
    %159 = vector.shape_cast %156 : vector<8x32xf32> to vector<1x8x32xf32>
    tpu.vector_store %arg20[%c0_103, %c0_104, %c0_105], %159 {strides = array<i32>} : memref<1x8x32xf32, #tpu.memory_space<vmem>>, vector<1x8x32xf32>,
    return
  }
  func.func @transform_0(%arg0: i32, %arg1: i32) -> i32 {
    %c0_i32 = arith.constant 0 : i32
    %c0_i32_0 = arith.constant 0 : i32
    return %c0_i32 : i32
  }
  func.func @transform_1(%arg0: i32, %arg1: i32) -> (i32, i32, i32) {
    %c0_i32 = arith.constant 0 : i32
    %c0_i32_0 = arith.constant 0 : i32
    return %arg0, %arg1, %c0_i32 : i32, i32, i32
  }
  func.func @transform_2(%arg0: i32, %arg1: i32) -> (i32, i32, i32) {
    %c0_i32 = arith.constant 0 : i32
    %c0_i32_0 = arith.constant 0 : i32
    return %arg0, %arg1, %c0_i32 : i32, i32, i32
  }
  func.func @transform_3(%arg0: i32, %arg1: i32) -> (i32, i32, i32) {
    %c0_i32 = arith.constant 0 : i32
    %c0_i32_0 = arith.constant 0 : i32
    %c0_i32_1 = arith.constant 0 : i32
    return %arg0, %c0_i32, %c0_i32_0 : i32, i32, i32
  }
  func.func @transform_4(%arg0: i32, %arg1: i32) -> (i32, i32, i32) {
    %c0_i32 = arith.constant 0 : i32
    %c0_i32_0 = arith.constant 0 : i32
    %c0_i32_1 = arith.constant 0 : i32
    return %arg0, %c0_i32, %c0_i32_0 : i32, i32, i32
  }
  func.func @transform_5(%arg0: i32, %arg1: i32) -> (i32, i32, i32, i32) {
    %c0_i32 = arith.constant 0 : i32
    %c0_i32_0 = arith.constant 0 : i32
    %c0_i32_1 = arith.constant 0 : i32
    %c0_i32_2 = arith.constant 0 : i32
    return %c0_i32, %arg0, %c0_i32_0, %c0_i32_1 : i32, i32, i32, i32
  }
  func.func @transform_6(%arg0: i32, %arg1: i32) -> (i32, i32) {
    %c0_i32 = arith.constant 0 : i32
    %c0_i32_0 = arith.constant 0 : i32
    %c0_i32_1 = arith.constant 0 : i32
    return %c0_i32, %c0_i32_0 : i32, i32
  }
  func.func @transform_7(%arg0: i32, %arg1: i32) -> (i32, i32) {
    %c0_i32 = arith.constant 0 : i32
    %c0_i32_0 = arith.constant 0 : i32
    %c0_i32_1 = arith.constant 0 : i32
    return %c0_i32, %c0_i32_0 : i32, i32
  }
  func.func @transform_8(%arg0: i32, %arg1: i32) -> (i32, i32) {
    %c0_i32 = arith.constant 0 : i32
    %c0_i32_0 = arith.constant 0 : i32
    %c0_i32_1 = arith.constant 0 : i32
    return %c0_i32, %c0_i32_0 : i32, i32
  }
  func.func @transform_9(%arg0: i32, %arg1: i32) -> (i32, i32) {
    %c0_i32 = arith.constant 0 : i32
    %c0_i32_0 = arith.constant 0 : i32
    %c0_i32_1 = arith.constant 0 : i32
    return %c0_i32, %c0_i32_0 : i32, i32
  }
  func.func @transform_10(%arg0: i32, %arg1: i32) -> (i32, i32) {
    %c0_i32 = arith.constant 0 : i32
    %c0_i32_0 = arith.constant 0 : i32
    %c0_i32_1 = arith.constant 0 : i32
    return %c0_i32, %c0_i32_0 : i32, i32
  }
  func.func @transform_11(%arg0: i32, %arg1: i32) -> (i32, i32, i32) {
    %c0_i32 = arith.constant 0 : i32
    %c0_i32_0 = arith.constant 0 : i32
    %c0_i32_1 = arith.constant 0 : i32
    %c0_i32_2 = arith.constant 0 : i32
    return %c0_i32, %c0_i32_0, %c0_i32_1 : i32, i32, i32
  }
  func.func @transform_12(%arg0: i32, %arg1: i32) -> (i32, i32) {
    %c0_i32 = arith.constant 0 : i32
    %c0_i32_0 = arith.constant 0 : i32
    %c0_i32_1 = arith.constant 0 : i32
    return %c0_i32, %c0_i32_0 : i32, i32
  }
  func.func @transform_13(%arg0: i32, %arg1: i32) -> (i32, i32) {
    %c0_i32 = arith.constant 0 : i32
    %c0_i32_0 = arith.constant 0 : i32
    %c0_i32_1 = arith.constant 0 : i32
    return %c0_i32, %c0_i32_0 : i32, i32
  }
  func.func @transform_14(%arg0: i32, %arg1: i32) -> (i32, i32) {
    %c0_i32 = arith.constant 0 : i32
    %c0_i32_0 = arith.constant 0 : i32
    %c0_i32_1 = arith.constant 0 : i32
    return %c0_i32, %c0_i32_0 : i32, i32
  }
  func.func @transform_15(%arg0: i32, %arg1: i32) -> (i32, i32) {
    %c0_i32 = arith.constant 0 : i32
    %c0_i32_0 = arith.constant 0 : i32
    %c0_i32_1 = arith.constant 0 : i32
    return %c0_i32, %c0_i32_0 : i32, i32
  }
  func.func @transform_16(%arg0: i32, %arg1: i32) -> (i32, i32, i32) {
    %c0_i32 = arith.constant 0 : i32
    %c0_i32_0 = arith.constant 0 : i32
    return %arg0, %arg1, %c0_i32 : i32, i32, i32
  }
  func.func @transform_17(%arg0: i32, %arg1: i32) -> (i32, i32, i32) {
    %c0_i32 = arith.constant 0 : i32
    %c0_i32_0 = arith.constant 0 : i32
    return %arg0, %arg1, %c0_i32 : i32, i32, i32
  }
  func.func @transform_18(%arg0: i32, %arg1: i32) -> (i32, i32, i32) {
    %c0_i32 = arith.constant 0 : i32
    %c0_i32_0 = arith.constant 0 : i32
    return %arg0, %arg1, %c0_i32 : i32, i32, i32
  }
}

module attributes {stable_mosaic.version = 11 : i64} {
  func.func @_attn_ffn_kernel(%arg0: i32, %arg1: i32, %arg2: memref<1xf32, #tpu.memory_space<smem>>, %arg3: memref<1x8x32xbf16, #tpu.memory_space<vmem>>, %arg4: memref<1x8x32xbf16, #tpu.memory_space<vmem>>, %arg5: memref<1x8x32xbf16, #tpu.memory_space<vmem>>, %arg6: memref<1x8x32xbf16, #tpu.memory_space<vmem>>, %arg7: memref<1x1x1x8xf32, #tpu.memory_space<vmem>>, %arg8: memref<32x32xbf16, #tpu.memory_space<vmem>>, %arg9: memref<1x32xf32, #tpu.memory_space<vmem>>, %arg10: memref<1x32xf32, #tpu.memory_space<vmem>>, %arg11: memref<1x32xf32, #tpu.memory_space<vmem>>, %arg12: memref<64x32xbf16, #tpu.memory_space<vmem>>, %arg13: memref<1x1x64xf32, #tpu.memory_space<vmem>>, %arg14: memref<64x32xbf16, #tpu.memory_space<vmem>>, %arg15: memref<1x32xf32, #tpu.memory_space<vmem>>, %arg16: memref<1x32xf32, #tpu.memory_space<vmem>>, %arg17: memref<1x32xf32, #tpu.memory_space<vmem>>, %arg18: memref<1x8x32xf32, #tpu.memory_space<vmem>>, %arg19: memref<1x8x32xbf16, #tpu.memory_space<vmem>>, %arg20: memref<1x8x32xf32, #tpu.memory_space<vmem>>, %arg21: memref<4x8x1xf32, #tpu.memory_space<vmem>>, %arg22: memref<4x8x1xf32, #tpu.memory_space<vmem>>, %arg23: memref<8x32xf32, #tpu.memory_space<vmem>>, %arg24: memref<8x32xf32, #tpu.memory_space<vmem>>) attributes {dimension_semantics = [#tpu.dimension_semantics<parallel>, #tpu.dimension_semantics<parallel>], iteration_bounds = array<i64: 2, 1>, scalar_prefetch = 0 : i64, scratch_operands = 4 : i64, tpu.core_type = #tpu.core_type<tc>, window_params = [{transform_indices = @transform_0, window_bounds = array<i64: 1>}, {transform_indices = @transform_1, window_bounds = array<i64: 1, 8, 32>}, {transform_indices = @transform_2, window_bounds = array<i64: 1, 8, 32>}, {transform_indices = @transform_3, window_bounds = array<i64: 1, 8, 32>}, {transform_indices = @transform_4, window_bounds = array<i64: 1, 8, 32>}, {transform_indices = @transform_5, window_bounds = array<i64: 1, 1, 1, 8>}, {pipeline_mode = #tpu.pipeline_mode<synchronous>, transform_indices = @transform_6, window_bounds = array<i64: 32, 32>}, {pipeline_mode = #tpu.pipeline_mode<synchronous>, transform_indices = @transform_7, window_bounds = array<i64: 1, 32>}, {pipeline_mode = #tpu.pipeline_mode<synchronous>, transform_indices = @transform_8, window_bounds = array<i64: 1, 32>}, {pipeline_mode = #tpu.pipeline_mode<synchronous>, transform_indices = @transform_9, window_bounds = array<i64: 1, 32>}, {pipeline_mode = #tpu.pipeline_mode<synchronous>, transform_indices = @transform_10, window_bounds = array<i64: 64, 32>}, {pipeline_mode = #tpu.pipeline_mode<synchronous>, transform_indices = @transform_11, window_bounds = array<i64: 1, 1, 64>}, {pipeline_mode = #tpu.pipeline_mode<synchronous>, transform_indices = @transform_12, window_bounds = array<i64: 64, 32>}, {pipeline_mode = #tpu.pipeline_mode<synchronous>, transform_indices = @transform_13, window_bounds = array<i64: 1, 32>}, {pipeline_mode = #tpu.pipeline_mode<synchronous>, transform_indices = @transform_14, window_bounds = array<i64: 1, 32>}, {pipeline_mode = #tpu.pipeline_mode<synchronous>, transform_indices = @transform_15, window_bounds = array<i64: 1, 32>}, {transform_indices = @transform_16, window_bounds = array<i64: 1, 8, 32>}, {transform_indices = @transform_17, window_bounds = array<i64: 1, 8, 32>}, {transform_indices = @transform_18, window_bounds = array<i64: 1, 8, 32>}]} {
    %c0 = arith.constant 0 : index
    %c0_0 = arith.constant 0 : index
    %c0_1 = arith.constant 0 : index
    %0 = vector.load %arg3[%c0, %c0_0, %c0_1] : memref<1x8x32xbf16, #tpu.memory_space<vmem>>, vector<1x8x32xbf16>
    %1 = vector.shape_cast %0 : vector<1x8x32xbf16> to vector<8x32xbf16>
    %2 = arith.extf %1 : vector<8x32xbf16> to vector<8x32xf32>
    %c0_2 = arith.constant 0 : index
    %c0_3 = arith.constant 0 : index
    %c0_4 = arith.constant 0 : index
    %3 = vector.load %arg4[%c0_2, %c0_3, %c0_4] : memref<1x8x32xbf16, #tpu.memory_space<vmem>>, vector<1x8x32xbf16>
    %4 = vector.shape_cast %3 : vector<1x8x32xbf16> to vector<8x32xbf16>
    %cst = arith.constant -1.000000e+30 : f32
    %5 = vector.broadcast %cst : f32 to vector<4x8x1xf32>
    %c0_5 = arith.constant 0 : index
    %c0_6 = arith.constant 0 : index
    %c0_7 = arith.constant 0 : index
    %6 = vector.load %arg21[%c0_5, %c0_6, %c0_7] : memref<4x8x1xf32, #tpu.memory_space<vmem>>, vector<4x8x1xf32>
    tpu.vector_store %arg21[%c0_5, %c0_6, %c0_7], %5 {strides = array<i32>} : memref<4x8x1xf32, #tpu.memory_space<vmem>>, vector<4x8x1xf32>,
    %cst_8 = arith.constant 0.000000e+00 : f32
    %7 = vector.broadcast %cst_8 : f32 to vector<4x8x1xf32>
    %c0_9 = arith.constant 0 : index
    %c0_10 = arith.constant 0 : index
    %c0_11 = arith.constant 0 : index
    %8 = vector.load %arg22[%c0_9, %c0_10, %c0_11] : memref<4x8x1xf32, #tpu.memory_space<vmem>>, vector<4x8x1xf32>
    tpu.vector_store %arg22[%c0_9, %c0_10, %c0_11], %7 {strides = array<i32>} : memref<4x8x1xf32, #tpu.memory_space<vmem>>, vector<4x8x1xf32>,
    %cst_12 = arith.constant 0.000000e+00 : f32
    %9 = vector.broadcast %cst_12 : f32 to vector<8x32xf32>
    %c0_13 = arith.constant 0 : index
    %c0_14 = arith.constant 0 : index
    %10 = vector.load %arg23[%c0_13, %c0_14] : memref<8x32xf32, #tpu.memory_space<vmem>>, vector<8x32xf32>
    tpu.vector_store %arg23[%c0_13, %c0_14], %9 {strides = array<i32>} : memref<8x32xf32, #tpu.memory_space<vmem>>, vector<8x32xf32>,
    %c0_i32 = arith.constant 0 : i32
    %c1_i32 = arith.constant 1 : i32
    %11 = arith.muli %c0_i32, %c1_i32 : i32
    %c0_i32_15 = arith.constant 0 : i32
    %12 = arith.addi %c0_i32_15, %11 : i32
    %c8_i32 = arith.constant 8 : i32
    %13 = arith.muli %12, %c8_i32 : i32
    %14 = tpu.assume_multiple %13, 8 : i32
    %15 = arith.index_cast %12 : i32 to index
    %c0_16 = arith.constant 0 : index
    %c0_17 = arith.constant 0 : index
    %c0_18 = arith.constant 0 : index
    %16 = vector.load %arg7[%15, %c0_16, %c0_17, %c0_18] : memref<1x1x1x8xf32, #tpu.memory_space<vmem>>, vector<1x1x1x8xf32>
    %17 = vector.shape_cast %16 : vector<1x1x1x8xf32> to vector<1x1x8xf32>
    %18 = vector.shape_cast %17 : vector<1x1x8xf32> to vector<1x8xf32>
    %19 = vector.shape_cast %18 : vector<1x8xf32> to vector<1x1x8xf32>
    %cst_19 = arith.constant dense<0xFF800000> : vector<1xf32>
    %20 = vector.multi_reduction <maximumf>, %19, %cst_19 [1, 2] : vector<1x1x8xf32> to vector<1xf32>
    %21 = vector.shape_cast %20 : vector<1xf32> to vector<1x1x1xf32>
    %22 = vector.extract %21[0, 0, 0] : f32 from vector<1x1x1xf32>
    %cst_20 = arith.constant -1.000000e+29 : f32
    %23 = arith.cmpf ogt, %22, %cst_20 : f32
    %24 = arith.extui %23 : i1 to i32
    %c0_i32_21 = arith.constant 0 : i32
    %25 = arith.cmpi ne, %24, %c0_i32_21 : i32
    scf.if %25 {
      %c0_106 = arith.constant 0 : index
      %160 = arith.index_cast %14 : i32 to index
      %c0_107 = arith.constant 0 : index
      %161 = vector.load %arg5[%c0_106, %160, %c0_107] : memref<1x8x32xbf16, #tpu.memory_space<vmem>>, vector<1x8x32xbf16>
      %162 = vector.shape_cast %161 : vector<1x8x32xbf16> to vector<8x32xbf16>
      %c0_108 = arith.constant 0 : index
      %163 = arith.index_cast %14 : i32 to index
      %c0_109 = arith.constant 0 : index
      %164 = vector.load %arg6[%c0_108, %163, %c0_109] : memref<1x8x32xbf16, #tpu.memory_space<vmem>>, vector<1x8x32xbf16>
      %165 = vector.shape_cast %164 : vector<1x8x32xbf16> to vector<8x32xbf16>
      %166 = vector.extract_strided_slice %4 {offsets = [0, 0], sizes = [8, 8], strides = [1, 1]} : vector<8x32xbf16> to vector<8x8xbf16>
      %167 = vector.extract_strided_slice %162 {offsets = [0, 0], sizes = [8, 8], strides = [1, 1]} : vector<8x32xbf16> to vector<8x8xbf16>
      %cst_110 = arith.constant dense<0.000000e+00> : vector<8x8xf32>
      %168 = tpu.matmul %166, %167, %cst_110 {dimension_numbers = #tpu.dot_dimension_numbers<[1], [1], [0], [0], [0, 0, 1, 0], [], []>} : vector<8x8xbf16>, vector<8x8xbf16>, vector<8x8xf32> -> vector<8x8xf32>
      %cst_111 = arith.constant 0.353553385 : f32
      %169 = vector.broadcast %cst_111 : f32 to vector<8x8xf32>
      %170 = arith.mulf %168, %169 : vector<8x8xf32>
      %171 = vector.broadcast %18 : vector<1x8xf32> to vector<8x8xf32>
      %172 = arith.addf %170, %171 : vector<8x8xf32>
      %c0_112 = arith.constant 0 : index
      %c0_113 = arith.constant 0 : index
      %c0_114 = arith.constant 0 : index
      %173 = vector.load %arg21[%c0_112, %c0_113, %c0_114] : memref<4x8x1xf32, #tpu.memory_space<vmem>>, vector<1x8x1xf32>
      %174 = vector.shape_cast %173 : vector<1x8x1xf32> to vector<8x1xf32>
      %cst_115 = arith.constant dense<0xFF800000> : vector<8xf32>
      %175 = vector.multi_reduction <maximumf>, %172, %cst_115 [1] : vector<8x8xf32> to vector<8xf32>
      %176 = vector.shape_cast %175 : vector<8xf32> to vector<8x1xf32>
      %177 = arith.maximumf %174, %176 : vector<8x1xf32>
      %178 = arith.subf %174, %177 : vector<8x1xf32>
      %179 = math.exp %178 : vector<8x1xf32>
      %180 = vector.broadcast %177 : vector<8x1xf32> to vector<8x8xf32>
      %181 = arith.subf %172, %180 : vector<8x8xf32>
      %182 = math.exp %181 : vector<8x8xf32>
      %c0_116 = arith.constant 0 : index
      %c0_117 = arith.constant 0 : index
      %c0_118 = arith.constant 0 : index
      %183 = vector.load %arg22[%c0_116, %c0_117, %c0_118] : memref<4x8x1xf32, #tpu.memory_space<vmem>>, vector<1x8x1xf32>
      %184 = vector.shape_cast %183 : vector<1x8x1xf32> to vector<8x1xf32>
      %185 = arith.mulf %179, %184 : vector<8x1xf32>
      %cst_119 = arith.constant dense<0.000000e+00> : vector<8xf32>
      %186 = vector.multi_reduction <add>, %182, %cst_119 [1] : vector<8x8xf32> to vector<8xf32>
      %187 = vector.shape_cast %186 : vector<8xf32> to vector<8x1xf32>
      %188 = arith.addf %185, %187 : vector<8x1xf32>
      %c0_120 = arith.constant 0 : index
      %c0_121 = arith.constant 0 : index
      %c0_122 = arith.constant 0 : index
      %189 = vector.load %arg22[%c0_120, %c0_121, %c0_122] : memref<4x8x1xf32, #tpu.memory_space<vmem>>, vector<1x8x1xf32>
      %190 = vector.shape_cast %189 : vector<1x8x1xf32> to vector<8x1xf32>
      %191 = vector.shape_cast %188 : vector<8x1xf32> to vector<1x8x1xf32>
      tpu.vector_store %arg22[%c0_120, %c0_121, %c0_122], %191 {strides = array<i32>} : memref<4x8x1xf32, #tpu.memory_space<vmem>>, vector<1x8x1xf32>,
      %c0_123 = arith.constant 0 : index
      %c0_124 = arith.constant 0 : index
      %192 = vector.load %arg23[%c0_123, %c0_124] : memref<8x32xf32, #tpu.memory_space<vmem>>, vector<8x8xf32>
      %193 = vector.broadcast %179 : vector<8x1xf32> to vector<8x8xf32>
      %194 = arith.mulf %193, %192 : vector<8x8xf32>
      %195 = arith.truncf %182 : vector<8x8xf32> to vector<8x8xbf16>
      %196 = vector.extract_strided_slice %165 {offsets = [0, 0], sizes = [8, 8], strides = [1, 1]} : vector<8x32xbf16> to vector<8x8xbf16>
      %cst_125 = arith.constant dense<0.000000e+00> : vector<8x8xf32>
      %197 = tpu.matmul %195, %196, %cst_125 {dimension_numbers = #tpu.dot_dimension_numbers<[1], [0], [0], [1], [0, 0, 1, 1], [], []>} : vector<8x8xbf16>, vector<8x8xbf16>, vector<8x8xf32> -> vector<8x8xf32>
      %198 = arith.addf %194, %197 : vector<8x8xf32>
      %c0_126 = arith.constant 0 : index
      %c0_127 = arith.constant 0 : index
      %199 = vector.load %arg23[%c0_126, %c0_127] : memref<8x32xf32, #tpu.memory_space<vmem>>, vector<8x8xf32>
      tpu.vector_store %arg23[%c0_126, %c0_127], %198 {strides = array<i32>} : memref<8x32xf32, #tpu.memory_space<vmem>>, vector<8x8xf32>,
      %c0_128 = arith.constant 0 : index
      %c0_129 = arith.constant 0 : index
      %c0_130 = arith.constant 0 : index
      %200 = vector.load %arg21[%c0_128, %c0_129, %c0_130] : memref<4x8x1xf32, #tpu.memory_space<vmem>>, vector<1x8x1xf32>
      %201 = vector.shape_cast %200 : vector<1x8x1xf32> to vector<8x1xf32>
      %202 = vector.shape_cast %177 : vector<8x1xf32> to vector<1x8x1xf32>
      tpu.vector_store %arg21[%c0_128, %c0_129, %c0_130], %202 {strides = array<i32>} : memref<4x8x1xf32, #tpu.memory_space<vmem>>, vector<1x8x1xf32>,
      %203 = vector.extract_strided_slice %4 {offsets = [0, 8], sizes = [8, 8], strides = [1, 1]} : vector<8x32xbf16> to vector<8x8xbf16>
      %204 = vector.extract_strided_slice %162 {offsets = [0, 8], sizes = [8, 8], strides = [1, 1]} : vector<8x32xbf16> to vector<8x8xbf16>
      %cst_131 = arith.constant dense<0.000000e+00> : vector<8x8xf32>
      %205 = tpu.matmul %203, %204, %cst_131 {dimension_numbers = #tpu.dot_dimension_numbers<[1], [1], [0], [0], [0, 0, 1, 0], [], []>} : vector<8x8xbf16>, vector<8x8xbf16>, vector<8x8xf32> -> vector<8x8xf32>
      %cst_132 = arith.constant 0.353553385 : f32
      %206 = vector.broadcast %cst_132 : f32 to vector<8x8xf32>
      %207 = arith.mulf %205, %206 : vector<8x8xf32>
      %208 = vector.broadcast %18 : vector<1x8xf32> to vector<8x8xf32>
      %209 = arith.addf %207, %208 : vector<8x8xf32>
      %c1_133 = arith.constant 1 : index
      %c0_134 = arith.constant 0 : index
      %c0_135 = arith.constant 0 : index
      %210 = vector.load %arg21[%c1_133, %c0_134, %c0_135] : memref<4x8x1xf32, #tpu.memory_space<vmem>>, vector<1x8x1xf32>
      %211 = vector.shape_cast %210 : vector<1x8x1xf32> to vector<8x1xf32>
      %cst_136 = arith.constant dense<0xFF800000> : vector<8xf32>
      %212 = vector.multi_reduction <maximumf>, %209, %cst_136 [1] : vector<8x8xf32> to vector<8xf32>
      %213 = vector.shape_cast %212 : vector<8xf32> to vector<8x1xf32>
      %214 = arith.maximumf %211, %213 : vector<8x1xf32>
      %215 = arith.subf %211, %214 : vector<8x1xf32>
      %216 = math.exp %215 : vector<8x1xf32>
      %217 = vector.broadcast %214 : vector<8x1xf32> to vector<8x8xf32>
      %218 = arith.subf %209, %217 : vector<8x8xf32>
      %219 = math.exp %218 : vector<8x8xf32>
      %c1_137 = arith.constant 1 : index
      %c0_138 = arith.constant 0 : index
      %c0_139 = arith.constant 0 : index
      %220 = vector.load %arg22[%c1_137, %c0_138, %c0_139] : memref<4x8x1xf32, #tpu.memory_space<vmem>>, vector<1x8x1xf32>
      %221 = vector.shape_cast %220 : vector<1x8x1xf32> to vector<8x1xf32>
      %222 = arith.mulf %216, %221 : vector<8x1xf32>
      %cst_140 = arith.constant dense<0.000000e+00> : vector<8xf32>
      %223 = vector.multi_reduction <add>, %219, %cst_140 [1] : vector<8x8xf32> to vector<8xf32>
      %224 = vector.shape_cast %223 : vector<8xf32> to vector<8x1xf32>
      %225 = arith.addf %222, %224 : vector<8x1xf32>
      %c1_141 = arith.constant 1 : index
      %c0_142 = arith.constant 0 : index
      %c0_143 = arith.constant 0 : index
      %226 = vector.load %arg22[%c1_141, %c0_142, %c0_143] : memref<4x8x1xf32, #tpu.memory_space<vmem>>, vector<1x8x1xf32>
      %227 = vector.shape_cast %226 : vector<1x8x1xf32> to vector<8x1xf32>
      %228 = vector.shape_cast %225 : vector<8x1xf32> to vector<1x8x1xf32>
      tpu.vector_store %arg22[%c1_141, %c0_142, %c0_143], %228 {strides = array<i32>} : memref<4x8x1xf32, #tpu.memory_space<vmem>>, vector<1x8x1xf32>,
      %c0_144 = arith.constant 0 : index
      %c8_145 = arith.constant 8 : index
      %229 = vector.load %arg23[%c0_144, %c8_145] : memref<8x32xf32, #tpu.memory_space<vmem>>, vector<8x8xf32>
      %230 = vector.broadcast %216 : vector<8x1xf32> to vector<8x8xf32>
      %231 = arith.mulf %230, %229 : vector<8x8xf32>
      %232 = arith.truncf %219 : vector<8x8xf32> to vector<8x8xbf16>
      %233 = vector.extract_strided_slice %165 {offsets = [0, 8], sizes = [8, 8], strides = [1, 1]} : vector<8x32xbf16> to vector<8x8xbf16>
      %cst_146 = arith.constant dense<0.000000e+00> : vector<8x8xf32>
      %234 = tpu.matmul %232, %233, %cst_146 {dimension_numbers = #tpu.dot_dimension_numbers<[1], [0], [0], [1], [0, 0, 1, 1], [], []>} : vector<8x8xbf16>, vector<8x8xbf16>, vector<8x8xf32> -> vector<8x8xf32>
      %235 = arith.addf %231, %234 : vector<8x8xf32>
      %c0_147 = arith.constant 0 : index
      %c8_148 = arith.constant 8 : index
      %236 = vector.load %arg23[%c0_147, %c8_148] : memref<8x32xf32, #tpu.memory_space<vmem>>, vector<8x8xf32>
      tpu.vector_store %arg23[%c0_147, %c8_148], %235 {strides = array<i32>} : memref<8x32xf32, #tpu.memory_space<vmem>>, vector<8x8xf32>,
      %c1_149 = arith.constant 1 : index
      %c0_150 = arith.constant 0 : index
      %c0_151 = arith.constant 0 : index
      %237 = vector.load %arg21[%c1_149, %c0_150, %c0_151] : memref<4x8x1xf32, #tpu.memory_space<vmem>>, vector<1x8x1xf32>
      %238 = vector.shape_cast %237 : vector<1x8x1xf32> to vector<8x1xf32>
      %239 = vector.shape_cast %214 : vector<8x1xf32> to vector<1x8x1xf32>
      tpu.vector_store %arg21[%c1_149, %c0_150, %c0_151], %239 {strides = array<i32>} : memref<4x8x1xf32, #tpu.memory_space<vmem>>, vector<1x8x1xf32>,
      %240 = vector.extract_strided_slice %4 {offsets = [0, 16], sizes = [8, 8], strides = [1, 1]} : vector<8x32xbf16> to vector<8x8xbf16>
      %241 = vector.extract_strided_slice %162 {offsets = [0, 16], sizes = [8, 8], strides = [1, 1]} : vector<8x32xbf16> to vector<8x8xbf16>
      %cst_152 = arith.constant dense<0.000000e+00> : vector<8x8xf32>
      %242 = tpu.matmul %240, %241, %cst_152 {dimension_numbers = #tpu.dot_dimension_numbers<[1], [1], [0], [0], [0, 0, 1, 0], [], []>} : vector<8x8xbf16>, vector<8x8xbf16>, vector<8x8xf32> -> vector<8x8xf32>
      %cst_153 = arith.constant 0.353553385 : f32
      %243 = vector.broadcast %cst_153 : f32 to vector<8x8xf32>
      %244 = arith.mulf %242, %243 : vector<8x8xf32>
      %245 = vector.broadcast %18 : vector<1x8xf32> to vector<8x8xf32>
      %246 = arith.addf %244, %245 : vector<8x8xf32>
      %c2_154 = arith.constant 2 : index
      %c0_155 = arith.constant 0 : index
      %c0_156 = arith.constant 0 : index
      %247 = vector.load %arg21[%c2_154, %c0_155, %c0_156] : memref<4x8x1xf32, #tpu.memory_space<vmem>>, vector<1x8x1xf32>
      %248 = vector.shape_cast %247 : vector<1x8x1xf32> to vector<8x1xf32>
      %cst_157 = arith.constant dense<0xFF800000> : vector<8xf32>
      %249 = vector.multi_reduction <maximumf>, %246, %cst_157 [1] : vector<8x8xf32> to vector<8xf32>
      %250 = vector.shape_cast %249 : vector<8xf32> to vector<8x1xf32>
      %251 = arith.maximumf %248, %250 : vector<8x1xf32>
      %252 = arith.subf %248, %251 : vector<8x1xf32>
      %253 = math.exp %252 : vector<8x1xf32>
      %254 = vector.broadcast %251 : vector<8x1xf32> to vector<8x8xf32>
      %255 = arith.subf %246, %254 : vector<8x8xf32>
      %256 = math.exp %255 : vector<8x8xf32>
      %c2_158 = arith.constant 2 : index
      %c0_159 = arith.constant 0 : index
      %c0_160 = arith.constant 0 : index
      %257 = vector.load %arg22[%c2_158, %c0_159, %c0_160] : memref<4x8x1xf32, #tpu.memory_space<vmem>>, vector<1x8x1xf32>
      %258 = vector.shape_cast %257 : vector<1x8x1xf32> to vector<8x1xf32>
      %259 = arith.mulf %253, %258 : vector<8x1xf32>
      %cst_161 = arith.constant dense<0.000000e+00> : vector<8xf32>
      %260 = vector.multi_reduction <add>, %256, %cst_161 [1] : vector<8x8xf32> to vector<8xf32>
      %261 = vector.shape_cast %260 : vector<8xf32> to vector<8x1xf32>
      %262 = arith.addf %259, %261 : vector<8x1xf32>
      %c2_162 = arith.constant 2 : index
      %c0_163 = arith.constant 0 : index
      %c0_164 = arith.constant 0 : index
      %263 = vector.load %arg22[%c2_162, %c0_163, %c0_164] : memref<4x8x1xf32, #tpu.memory_space<vmem>>, vector<1x8x1xf32>
      %264 = vector.shape_cast %263 : vector<1x8x1xf32> to vector<8x1xf32>
      %265 = vector.shape_cast %262 : vector<8x1xf32> to vector<1x8x1xf32>
      tpu.vector_store %arg22[%c2_162, %c0_163, %c0_164], %265 {strides = array<i32>} : memref<4x8x1xf32, #tpu.memory_space<vmem>>, vector<1x8x1xf32>,
      %c0_165 = arith.constant 0 : index
      %c16_166 = arith.constant 16 : index
      %266 = vector.load %arg23[%c0_165, %c16_166] : memref<8x32xf32, #tpu.memory_space<vmem>>, vector<8x8xf32>
      %267 = vector.broadcast %253 : vector<8x1xf32> to vector<8x8xf32>
      %268 = arith.mulf %267, %266 : vector<8x8xf32>
      %269 = arith.truncf %256 : vector<8x8xf32> to vector<8x8xbf16>
      %270 = vector.extract_strided_slice %165 {offsets = [0, 16], sizes = [8, 8], strides = [1, 1]} : vector<8x32xbf16> to vector<8x8xbf16>
      %cst_167 = arith.constant dense<0.000000e+00> : vector<8x8xf32>
      %271 = tpu.matmul %269, %270, %cst_167 {dimension_numbers = #tpu.dot_dimension_numbers<[1], [0], [0], [1], [0, 0, 1, 1], [], []>} : vector<8x8xbf16>, vector<8x8xbf16>, vector<8x8xf32> -> vector<8x8xf32>
      %272 = arith.addf %268, %271 : vector<8x8xf32>
      %c0_168 = arith.constant 0 : index
      %c16_169 = arith.constant 16 : index
      %273 = vector.load %arg23[%c0_168, %c16_169] : memref<8x32xf32, #tpu.memory_space<vmem>>, vector<8x8xf32>
      tpu.vector_store %arg23[%c0_168, %c16_169], %272 {strides = array<i32>} : memref<8x32xf32, #tpu.memory_space<vmem>>, vector<8x8xf32>,
      %c2_170 = arith.constant 2 : index
      %c0_171 = arith.constant 0 : index
      %c0_172 = arith.constant 0 : index
      %274 = vector.load %arg21[%c2_170, %c0_171, %c0_172] : memref<4x8x1xf32, #tpu.memory_space<vmem>>, vector<1x8x1xf32>
      %275 = vector.shape_cast %274 : vector<1x8x1xf32> to vector<8x1xf32>
      %276 = vector.shape_cast %251 : vector<8x1xf32> to vector<1x8x1xf32>
      tpu.vector_store %arg21[%c2_170, %c0_171, %c0_172], %276 {strides = array<i32>} : memref<4x8x1xf32, #tpu.memory_space<vmem>>, vector<1x8x1xf32>,
      %277 = vector.extract_strided_slice %4 {offsets = [0, 24], sizes = [8, 8], strides = [1, 1]} : vector<8x32xbf16> to vector<8x8xbf16>
      %278 = vector.extract_strided_slice %162 {offsets = [0, 24], sizes = [8, 8], strides = [1, 1]} : vector<8x32xbf16> to vector<8x8xbf16>
      %cst_173 = arith.constant dense<0.000000e+00> : vector<8x8xf32>
      %279 = tpu.matmul %277, %278, %cst_173 {dimension_numbers = #tpu.dot_dimension_numbers<[1], [1], [0], [0], [0, 0, 1, 0], [], []>} : vector<8x8xbf16>, vector<8x8xbf16>, vector<8x8xf32> -> vector<8x8xf32>
      %cst_174 = arith.constant 0.353553385 : f32
      %280 = vector.broadcast %cst_174 : f32 to vector<8x8xf32>
      %281 = arith.mulf %279, %280 : vector<8x8xf32>
      %282 = vector.broadcast %18 : vector<1x8xf32> to vector<8x8xf32>
      %283 = arith.addf %281, %282 : vector<8x8xf32>
      %c3_175 = arith.constant 3 : index
      %c0_176 = arith.constant 0 : index
      %c0_177 = arith.constant 0 : index
      %284 = vector.load %arg21[%c3_175, %c0_176, %c0_177] : memref<4x8x1xf32, #tpu.memory_space<vmem>>, vector<1x8x1xf32>
      %285 = vector.shape_cast %284 : vector<1x8x1xf32> to vector<8x1xf32>
      %cst_178 = arith.constant dense<0xFF800000> : vector<8xf32>
      %286 = vector.multi_reduction <maximumf>, %283, %cst_178 [1] : vector<8x8xf32> to vector<8xf32>
      %287 = vector.shape_cast %286 : vector<8xf32> to vector<8x1xf32>
      %288 = arith.maximumf %285, %287 : vector<8x1xf32>
      %289 = arith.subf %285, %288 : vector<8x1xf32>
      %290 = math.exp %289 : vector<8x1xf32>
      %291 = vector.broadcast %288 : vector<8x1xf32> to vector<8x8xf32>
      %292 = arith.subf %283, %291 : vector<8x8xf32>
      %293 = math.exp %292 : vector<8x8xf32>
      %c3_179 = arith.constant 3 : index
      %c0_180 = arith.constant 0 : index
      %c0_181 = arith.constant 0 : index
      %294 = vector.load %arg22[%c3_179, %c0_180, %c0_181] : memref<4x8x1xf32, #tpu.memory_space<vmem>>, vector<1x8x1xf32>
      %295 = vector.shape_cast %294 : vector<1x8x1xf32> to vector<8x1xf32>
      %296 = arith.mulf %290, %295 : vector<8x1xf32>
      %cst_182 = arith.constant dense<0.000000e+00> : vector<8xf32>
      %297 = vector.multi_reduction <add>, %293, %cst_182 [1] : vector<8x8xf32> to vector<8xf32>
      %298 = vector.shape_cast %297 : vector<8xf32> to vector<8x1xf32>
      %299 = arith.addf %296, %298 : vector<8x1xf32>
      %c3_183 = arith.constant 3 : index
      %c0_184 = arith.constant 0 : index
      %c0_185 = arith.constant 0 : index
      %300 = vector.load %arg22[%c3_183, %c0_184, %c0_185] : memref<4x8x1xf32, #tpu.memory_space<vmem>>, vector<1x8x1xf32>
      %301 = vector.shape_cast %300 : vector<1x8x1xf32> to vector<8x1xf32>
      %302 = vector.shape_cast %299 : vector<8x1xf32> to vector<1x8x1xf32>
      tpu.vector_store %arg22[%c3_183, %c0_184, %c0_185], %302 {strides = array<i32>} : memref<4x8x1xf32, #tpu.memory_space<vmem>>, vector<1x8x1xf32>,
      %c0_186 = arith.constant 0 : index
      %c24_187 = arith.constant 24 : index
      %303 = vector.load %arg23[%c0_186, %c24_187] : memref<8x32xf32, #tpu.memory_space<vmem>>, vector<8x8xf32>
      %304 = vector.broadcast %290 : vector<8x1xf32> to vector<8x8xf32>
      %305 = arith.mulf %304, %303 : vector<8x8xf32>
      %306 = arith.truncf %293 : vector<8x8xf32> to vector<8x8xbf16>
      %307 = vector.extract_strided_slice %165 {offsets = [0, 24], sizes = [8, 8], strides = [1, 1]} : vector<8x32xbf16> to vector<8x8xbf16>
      %cst_188 = arith.constant dense<0.000000e+00> : vector<8x8xf32>
      %308 = tpu.matmul %306, %307, %cst_188 {dimension_numbers = #tpu.dot_dimension_numbers<[1], [0], [0], [1], [0, 0, 1, 1], [], []>} : vector<8x8xbf16>, vector<8x8xbf16>, vector<8x8xf32> -> vector<8x8xf32>
      %309 = arith.addf %305, %308 : vector<8x8xf32>
      %c0_189 = arith.constant 0 : index
      %c24_190 = arith.constant 24 : index
      %310 = vector.load %arg23[%c0_189, %c24_190] : memref<8x32xf32, #tpu.memory_space<vmem>>, vector<8x8xf32>
      tpu.vector_store %arg23[%c0_189, %c24_190], %309 {strides = array<i32>} : memref<8x32xf32, #tpu.memory_space<vmem>>, vector<8x8xf32>,
      %c3_191 = arith.constant 3 : index
      %c0_192 = arith.constant 0 : index
      %c0_193 = arith.constant 0 : index
      %311 = vector.load %arg21[%c3_191, %c0_192, %c0_193] : memref<4x8x1xf32, #tpu.memory_space<vmem>>, vector<1x8x1xf32>
      %312 = vector.shape_cast %311 : vector<1x8x1xf32> to vector<8x1xf32>
      %313 = vector.shape_cast %288 : vector<8x1xf32> to vector<1x8x1xf32>
      tpu.vector_store %arg21[%c3_191, %c0_192, %c0_193], %313 {strides = array<i32>} : memref<4x8x1xf32, #tpu.memory_space<vmem>>, vector<1x8x1xf32>,
    } else {
    }
    %c1_i32_22 = arith.constant 1 : i32
    %c0_23 = arith.constant 0 : index
    %c0_24 = arith.constant 0 : index
    %c0_25 = arith.constant 0 : index
    %26 = vector.load %arg22[%c0_23, %c0_24, %c0_25] : memref<4x8x1xf32, #tpu.memory_space<vmem>>, vector<1x8x1xf32>
    %27 = vector.shape_cast %26 : vector<1x8x1xf32> to vector<8x1xf32>
    %cst_26 = arith.constant 1.000000e-30 : f32
    %28 = vector.broadcast %cst_26 : f32 to vector<8x1xf32>
    %29 = arith.maximumf %27, %28 : vector<8x1xf32>
    %c0_27 = arith.constant 0 : index
    %c0_28 = arith.constant 0 : index
    %30 = vector.load %arg23[%c0_27, %c0_28] : memref<8x32xf32, #tpu.memory_space<vmem>>, vector<8x8xf32>
    %31 = tpu.reciprocal %29 {approx = true} : vector<8x1xf32> -> vector<8x1xf32>
    %32 = vector.broadcast %31 : vector<8x1xf32> to vector<8x8xf32>
    %33 = arith.mulf %30, %32 : vector<8x8xf32>
    %c0_29 = arith.constant 0 : index
    %c0_30 = arith.constant 0 : index
    %34 = vector.load %arg23[%c0_29, %c0_30] : memref<8x32xf32, #tpu.memory_space<vmem>>, vector<8x8xf32>
    tpu.vector_store %arg23[%c0_29, %c0_30], %33 {strides = array<i32>} : memref<8x32xf32, #tpu.memory_space<vmem>>, vector<8x8xf32>,
    %c1 = arith.constant 1 : index
    %c0_31 = arith.constant 0 : index
    %c0_32 = arith.constant 0 : index
    %35 = vector.load %arg22[%c1, %c0_31, %c0_32] : memref<4x8x1xf32, #tpu.memory_space<vmem>>, vector<1x8x1xf32>
    %36 = vector.shape_cast %35 : vector<1x8x1xf32> to vector<8x1xf32>
    %cst_33 = arith.constant 1.000000e-30 : f32
    %37 = vector.broadcast %cst_33 : f32 to vector<8x1xf32>
    %38 = arith.maximumf %36, %37 : vector<8x1xf32>
    %c0_34 = arith.constant 0 : index
    %c8 = arith.constant 8 : index
    %39 = vector.load %arg23[%c0_34, %c8] : memref<8x32xf32, #tpu.memory_space<vmem>>, vector<8x8xf32>
    %40 = tpu.reciprocal %38 {approx = true} : vector<8x1xf32> -> vector<8x1xf32>
    %41 = vector.broadcast %40 : vector<8x1xf32> to vector<8x8xf32>
    %42 = arith.mulf %39, %41 : vector<8x8xf32>
    %c0_35 = arith.constant 0 : index
    %c8_36 = arith.constant 8 : index
    %43 = vector.load %arg23[%c0_35, %c8_36] : memref<8x32xf32, #tpu.memory_space<vmem>>, vector<8x8xf32>
    tpu.vector_store %arg23[%c0_35, %c8_36], %42 {strides = array<i32>} : memref<8x32xf32, #tpu.memory_space<vmem>>, vector<8x8xf32>,
    %c2 = arith.constant 2 : index
    %c0_37 = arith.constant 0 : index
    %c0_38 = arith.constant 0 : index
    %44 = vector.load %arg22[%c2, %c0_37, %c0_38] : memref<4x8x1xf32, #tpu.memory_space<vmem>>, vector<1x8x1xf32>
    %45 = vector.shape_cast %44 : vector<1x8x1xf32> to vector<8x1xf32>
    %cst_39 = arith.constant 1.000000e-30 : f32
    %46 = vector.broadcast %cst_39 : f32 to vector<8x1xf32>
    %47 = arith.maximumf %45, %46 : vector<8x1xf32>
    %c0_40 = arith.constant 0 : index
    %c16 = arith.constant 16 : index
    %48 = vector.load %arg23[%c0_40, %c16] : memref<8x32xf32, #tpu.memory_space<vmem>>, vector<8x8xf32>
    %49 = tpu.reciprocal %47 {approx = true} : vector<8x1xf32> -> vector<8x1xf32>
    %50 = vector.broadcast %49 : vector<8x1xf32> to vector<8x8xf32>
    %51 = arith.mulf %48, %50 : vector<8x8xf32>
    %c0_41 = arith.constant 0 : index
    %c16_42 = arith.constant 16 : index
    %52 = vector.load %arg23[%c0_41, %c16_42] : memref<8x32xf32, #tpu.memory_space<vmem>>, vector<8x8xf32>
    tpu.vector_store %arg23[%c0_41, %c16_42], %51 {strides = array<i32>} : memref<8x32xf32, #tpu.memory_space<vmem>>, vector<8x8xf32>,
    %c3 = arith.constant 3 : index
    %c0_43 = arith.constant 0 : index
    %c0_44 = arith.constant 0 : index
    %53 = vector.load %arg22[%c3, %c0_43, %c0_44] : memref<4x8x1xf32, #tpu.memory_space<vmem>>, vector<1x8x1xf32>
    %54 = vector.shape_cast %53 : vector<1x8x1xf32> to vector<8x1xf32>
    %cst_45 = arith.constant 1.000000e-30 : f32
    %55 = vector.broadcast %cst_45 : f32 to vector<8x1xf32>
    %56 = arith.maximumf %54, %55 : vector<8x1xf32>
    %c0_46 = arith.constant 0 : index
    %c24 = arith.constant 24 : index
    %57 = vector.load %arg23[%c0_46, %c24] : memref<8x32xf32, #tpu.memory_space<vmem>>, vector<8x8xf32>
    %58 = tpu.reciprocal %56 {approx = true} : vector<8x1xf32> -> vector<8x1xf32>
    %59 = vector.broadcast %58 : vector<8x1xf32> to vector<8x8xf32>
    %60 = arith.mulf %57, %59 : vector<8x8xf32>
    %c0_47 = arith.constant 0 : index
    %c24_48 = arith.constant 24 : index
    %61 = vector.load %arg23[%c0_47, %c24_48] : memref<8x32xf32, #tpu.memory_space<vmem>>, vector<8x8xf32>
    tpu.vector_store %arg23[%c0_47, %c24_48], %60 {strides = array<i32>} : memref<8x32xf32, #tpu.memory_space<vmem>>, vector<8x8xf32>,
    %c0_49 = arith.constant 0 : index
    %c0_50 = arith.constant 0 : index
    %62 = vector.load %arg23[%c0_49, %c0_50] : memref<8x32xf32, #tpu.memory_space<vmem>>, vector<8x32xf32>
    %63 = arith.truncf %62 : vector<8x32xf32> to vector<8x32xbf16>
    %c0_51 = arith.constant 0 : index
    %c0_52 = arith.constant 0 : index
    %64 = vector.load %arg8[%c0_51, %c0_52] : memref<32x32xbf16, #tpu.memory_space<vmem>>, vector<32x32xbf16>
    %cst_53 = arith.constant dense<0.000000e+00> : vector<8x32xf32>
    %65 = tpu.matmul %63, %64, %cst_53 {dimension_numbers = #tpu.dot_dimension_numbers<[1], [0], [0], [1], [0, 0, 1, 1], [], []>} : vector<8x32xbf16>, vector<32x32xbf16>, vector<8x32xf32> -> vector<8x32xf32>
    %c0_54 = arith.constant 0 : index
    %c0_55 = arith.constant 0 : index
    %66 = vector.load %arg9[%c0_54, %c0_55] : memref<1x32xf32, #tpu.memory_space<vmem>>, vector<1x32xf32>
    %67 = vector.broadcast %66 : vector<1x32xf32> to vector<8x32xf32>
    %68 = arith.addf %65, %67 : vector<8x32xf32>
    %69 = arith.addf %2, %68 : vector<8x32xf32>
    %c0_56 = arith.constant 0 : index
    %c0_57 = arith.constant 0 : index
    %70 = vector.load %arg10[%c0_56, %c0_57] : memref<1x32xf32, #tpu.memory_space<vmem>>, vector<1x32xf32>
    %c0_58 = arith.constant 0 : index
    %c0_59 = arith.constant 0 : index
    %71 = vector.load %arg11[%c0_58, %c0_59] : memref<1x32xf32, #tpu.memory_space<vmem>>, vector<1x32xf32>
    %cst_60 = arith.constant dense<0.000000e+00> : vector<8xf32>
    %72 = vector.multi_reduction <add>, %69, %cst_60 [1] : vector<8x32xf32> to vector<8xf32>
    %73 = vector.shape_cast %72 : vector<8xf32> to vector<8x1xf32>
    %cst_61 = arith.constant 3.200000e+01 : f32
    %74 = vector.broadcast %cst_61 : f32 to vector<8x1xf32>
    %75 = arith.divf %73, %74 : vector<8x1xf32>
    %76 = vector.broadcast %75 : vector<8x1xf32> to vector<8x32xf32>
    %77 = arith.subf %69, %76 : vector<8x32xf32>
    %78 = arith.mulf %77, %77 : vector<8x32xf32>
    %cst_62 = arith.constant dense<0.000000e+00> : vector<8xf32>
    %79 = vector.multi_reduction <add>, %78, %cst_62 [1] : vector<8x32xf32> to vector<8xf32>
    %80 = vector.shape_cast %79 : vector<8xf32> to vector<8x1xf32>
    %cst_63 = arith.constant 3.200000e+01 : f32
    %81 = vector.broadcast %cst_63 : f32 to vector<8x1xf32>
    %82 = arith.divf %80, %81 : vector<8x1xf32>
    %83 = vector.broadcast %75 : vector<8x1xf32> to vector<8x32xf32>
    %84 = arith.subf %69, %83 : vector<8x32xf32>
    %cst_64 = arith.constant 9.99999974E-6 : f32
    %85 = vector.broadcast %cst_64 : f32 to vector<8x1xf32>
    %86 = arith.addf %82, %85 : vector<8x1xf32>
    %87 = math.rsqrt %86 : vector<8x1xf32>
    %88 = vector.broadcast %87 : vector<8x1xf32> to vector<8x32xf32>
    %89 = arith.mulf %84, %88 : vector<8x32xf32>
    %90 = vector.broadcast %70 : vector<1x32xf32> to vector<8x32xf32>
    %91 = arith.mulf %89, %90 : vector<8x32xf32>
    %92 = vector.broadcast %71 : vector<1x32xf32> to vector<8x32xf32>
    %93 = arith.addf %91, %92 : vector<8x32xf32>
    %94 = arith.truncf %93 : vector<8x32xf32> to vector<8x32xbf16>
    %cst_65 = arith.constant 0.000000e+00 : f32
    %95 = vector.broadcast %cst_65 : f32 to vector<8x32xf32>
    %c0_66 = arith.constant 0 : index
    %c0_67 = arith.constant 0 : index
    %96 = vector.load %arg24[%c0_66, %c0_67] : memref<8x32xf32, #tpu.memory_space<vmem>>, vector<8x32xf32>
    tpu.vector_store %arg24[%c0_66, %c0_67], %95 {strides = array<i32>} : memref<8x32xf32, #tpu.memory_space<vmem>>, vector<8x32xf32>,
    %c0_i32_68 = arith.constant 0 : i32
    %c1_i32_69 = arith.constant 1 : i32
    %97 = arith.muli %c0_i32_68, %c1_i32_69 : i32
    %c0_i32_70 = arith.constant 0 : i32
    %98 = arith.addi %c0_i32_70, %97 : i32
    %c64_i32 = arith.constant 64 : i32
    %99 = arith.muli %98, %c64_i32 : i32
    %100 = tpu.assume_multiple %99, 64 : i32
    %101 = arith.index_cast %100 : i32 to index
    %c0_71 = arith.constant 0 : index
    %102 = vector.load %arg12[%101, %c0_71] : memref<64x32xbf16, #tpu.memory_space<vmem>>, vector<64x32xbf16>
    %cst_72 = arith.constant dense<0.000000e+00> : vector<8x64xf32>
    %103 = tpu.matmul %94, %102, %cst_72 {dimension_numbers = #tpu.dot_dimension_numbers<[1], [1], [0], [0], [0, 0, 1, 0], [], []>} : vector<8x32xbf16>, vector<64x32xbf16>, vector<8x64xf32> -> vector<8x64xf32>
    %104 = arith.index_cast %98 : i32 to index
    %c0_73 = arith.constant 0 : index
    %c0_74 = arith.constant 0 : index
    %105 = vector.load %arg13[%104, %c0_73, %c0_74] : memref<1x1x64xf32, #tpu.memory_space<vmem>>, vector<1x1x64xf32>
    %106 = vector.shape_cast %105 : vector<1x1x64xf32> to vector<1x64xf32>
    %107 = vector.broadcast %106 : vector<1x64xf32> to vector<8x64xf32>
    %108 = arith.addf %103, %107 : vector<8x64xf32>
    %cst_75 = arith.constant 0.000000e+00 : f32
    %109 = vector.broadcast %cst_75 : f32 to vector<8x64xf32>
    %110 = arith.maximumf %108, %109 : vector<8x64xf32>
    %c0_76 = arith.constant 0 : index
    %c0_77 = arith.constant 0 : index
    %111 = vector.load %arg24[%c0_76, %c0_77] : memref<8x32xf32, #tpu.memory_space<vmem>>, vector<8x32xf32>
    %112 = arith.truncf %110 : vector<8x64xf32> to vector<8x64xbf16>
    %113 = arith.index_cast %100 : i32 to index
    %c0_78 = arith.constant 0 : index
    %114 = vector.load %arg14[%113, %c0_78] : memref<64x32xbf16, #tpu.memory_space<vmem>>, vector<64x32xbf16>
    %cst_79 = arith.constant dense<0.000000e+00> : vector<8x32xf32>
    %115 = tpu.matmul %112, %114, %cst_79 {dimension_numbers = #tpu.dot_dimension_numbers<[1], [0], [0], [1], [0, 0, 1, 1], [], []>} : vector<8x64xbf16>, vector<64x32xbf16>, vector<8x32xf32> -> vector<8x32xf32>
    %116 = arith.addf %111, %115 : vector<8x32xf32>
    %c0_80 = arith.constant 0 : index
    %c0_81 = arith.constant 0 : index
    %117 = vector.load %arg24[%c0_80, %c0_81] : memref<8x32xf32, #tpu.memory_space<vmem>>, vector<8x32xf32>
    tpu.vector_store %arg24[%c0_80, %c0_81], %116 {strides = array<i32>} : memref<8x32xf32, #tpu.memory_space<vmem>>, vector<8x32xf32>,
    %c1_i32_82 = arith.constant 1 : i32
    %c0_83 = arith.constant 0 : index
    %c0_84 = arith.constant 0 : index
    %118 = vector.load %arg24[%c0_83, %c0_84] : memref<8x32xf32, #tpu.memory_space<vmem>>, vector<8x32xf32>
    %119 = arith.addf %93, %118 : vector<8x32xf32>
    %c0_85 = arith.constant 0 : index
    %c0_86 = arith.constant 0 : index
    %120 = vector.load %arg15[%c0_85, %c0_86] : memref<1x32xf32, #tpu.memory_space<vmem>>, vector<1x32xf32>
    %121 = vector.broadcast %120 : vector<1x32xf32> to vector<8x32xf32>
    %122 = arith.addf %119, %121 : vector<8x32xf32>
    %c0_87 = arith.constant 0 : index
    %c0_88 = arith.constant 0 : index
    %123 = vector.load %arg16[%c0_87, %c0_88] : memref<1x32xf32, #tpu.memory_space<vmem>>, vector<1x32xf32>
    %c0_89 = arith.constant 0 : index
    %c0_90 = arith.constant 0 : index
    %124 = vector.load %arg17[%c0_89, %c0_90] : memref<1x32xf32, #tpu.memory_space<vmem>>, vector<1x32xf32>
    %cst_91 = arith.constant dense<0.000000e+00> : vector<8xf32>
    %125 = vector.multi_reduction <add>, %122, %cst_91 [1] : vector<8x32xf32> to vector<8xf32>
    %126 = vector.shape_cast %125 : vector<8xf32> to vector<8x1xf32>
    %cst_92 = arith.constant 3.200000e+01 : f32
    %127 = vector.broadcast %cst_92 : f32 to vector<8x1xf32>
    %128 = arith.divf %126, %127 : vector<8x1xf32>
    %129 = vector.broadcast %128 : vector<8x1xf32> to vector<8x32xf32>
    %130 = arith.subf %122, %129 : vector<8x32xf32>
    %131 = arith.mulf %130, %130 : vector<8x32xf32>
    %cst_93 = arith.constant dense<0.000000e+00> : vector<8xf32>
    %132 = vector.multi_reduction <add>, %131, %cst_93 [1] : vector<8x32xf32> to vector<8xf32>
    %133 = vector.shape_cast %132 : vector<8xf32> to vector<8x1xf32>
    %cst_94 = arith.constant 3.200000e+01 : f32
    %134 = vector.broadcast %cst_94 : f32 to vector<8x1xf32>
    %135 = arith.divf %133, %134 : vector<8x1xf32>
    %136 = vector.broadcast %128 : vector<8x1xf32> to vector<8x32xf32>
    %137 = arith.subf %122, %136 : vector<8x32xf32>
    %cst_95 = arith.constant 9.99999974E-6 : f32
    %138 = vector.broadcast %cst_95 : f32 to vector<8x1xf32>
    %139 = arith.addf %135, %138 : vector<8x1xf32>
    %140 = math.rsqrt %139 : vector<8x1xf32>
    %141 = vector.broadcast %140 : vector<8x1xf32> to vector<8x32xf32>
    %142 = arith.mulf %137, %141 : vector<8x32xf32>
    %143 = vector.broadcast %123 : vector<1x32xf32> to vector<8x32xf32>
    %144 = arith.mulf %142, %143 : vector<8x32xf32>
    %145 = vector.broadcast %124 : vector<1x32xf32> to vector<8x32xf32>
    %146 = arith.addf %144, %145 : vector<8x32xf32>
    %147 = arith.truncf %146 : vector<8x32xf32> to vector<8x32xbf16>
    %c0_96 = arith.constant 0 : index
    %c0_97 = arith.constant 0 : index
    %c0_98 = arith.constant 0 : index
    %148 = vector.load %arg19[%c0_96, %c0_97, %c0_98] : memref<1x8x32xbf16, #tpu.memory_space<vmem>>, vector<1x8x32xbf16>
    %149 = vector.shape_cast %148 : vector<1x8x32xbf16> to vector<8x32xbf16>
    %150 = vector.shape_cast %147 : vector<8x32xbf16> to vector<1x8x32xbf16>
    tpu.vector_store %arg19[%c0_96, %c0_97, %c0_98], %150 {strides = array<i32>} : memref<1x8x32xbf16, #tpu.memory_space<vmem>>, vector<1x8x32xbf16>,
    %c0_99 = arith.constant 0 : index
    %c0_100 = arith.constant 0 : index
    %c0_101 = arith.constant 0 : index
    %151 = vector.load %arg18[%c0_99, %c0_100, %c0_101] : memref<1x8x32xf32, #tpu.memory_space<vmem>>, vector<1x8x32xf32>
    %152 = vector.shape_cast %151 : vector<1x8x32xf32> to vector<8x32xf32>
    %c0_102 = arith.constant 0 : index
    %153 = memref.load %arg2[%c0_102] : memref<1xf32, #tpu.memory_space<smem>>
    %154 = vector.broadcast %153 : f32 to vector<8x32xf32>
    %155 = arith.mulf %154, %146 : vector<8x32xf32>
    %156 = arith.addf %152, %155 : vector<8x32xf32>
    %c0_103 = arith.constant 0 : index
    %c0_104 = arith.constant 0 : index
    %c0_105 = arith.constant 0 : index
    %157 = vector.load %arg20[%c0_103, %c0_104, %c0_105] : memref<1x8x32xf32, #tpu.memory_space<vmem>>, vector<1x8x32xf32>
    %158 = vector.shape_cast %157 : vector<1x8x32xf32> to vector<8x32xf32>
    %159 = vector.shape_cast %156 : vector<8x32xf32> to vector<1x8x32xf32>
    tpu.vector_store %arg20[%c0_103, %c0_104, %c0_105], %159 {strides = array<i32>} : memref<1x8x32xf32, #tpu.memory_space<vmem>>, vector<1x8x32xf32>,
    return
  }
  func.func @transform_0(%arg0: i32, %arg1: i32) -> i32 {
    %c0_i32 = arith.constant 0 : i32
    %c0_i32_0 = arith.constant 0 : i32
    return %c0_i32 : i32
  }
  func.func @transform_1(%arg0: i32, %arg1: i32) -> (i32, i32, i32) {
    %c0_i32 = arith.constant 0 : i32
    %c0_i32_0 = arith.constant 0 : i32
    return %arg0, %arg1, %c0_i32 : i32, i32, i32
  }
  func.func @transform_2(%arg0: i32, %arg1: i32) -> (i32, i32, i32) {
    %c0_i32 = arith.constant 0 : i32
    %c0_i32_0 = arith.constant 0 : i32
    return %arg0, %arg1, %c0_i32 : i32, i32, i32
  }
  func.func @transform_3(%arg0: i32, %arg1: i32) -> (i32, i32, i32) {
    %c0_i32 = arith.constant 0 : i32
    %c0_i32_0 = arith.constant 0 : i32
    %c0_i32_1 = arith.constant 0 : i32
    return %arg0, %c0_i32, %c0_i32_0 : i32, i32, i32
  }
  func.func @transform_4(%arg0: i32, %arg1: i32) -> (i32, i32, i32) {
    %c0_i32 = arith.constant 0 : i32
    %c0_i32_0 = arith.constant 0 : i32
    %c0_i32_1 = arith.constant 0 : i32
    return %arg0, %c0_i32, %c0_i32_0 : i32, i32, i32
  }
  func.func @transform_5(%arg0: i32, %arg1: i32) -> (i32, i32, i32, i32) {
    %c0_i32 = arith.constant 0 : i32
    %c0_i32_0 = arith.constant 0 : i32
    %c0_i32_1 = arith.constant 0 : i32
    %c0_i32_2 = arith.constant 0 : i32
    return %c0_i32, %arg0, %c0_i32_0, %c0_i32_1 : i32, i32, i32, i32
  }
  func.func @transform_6(%arg0: i32, %arg1: i32) -> (i32, i32) {
    %c0_i32 = arith.constant 0 : i32
    %c0_i32_0 = arith.constant 0 : i32
    %c0_i32_1 = arith.constant 0 : i32
    return %c0_i32, %c0_i32_0 : i32, i32
  }
  func.func @transform_7(%arg0: i32, %arg1: i32) -> (i32, i32) {
    %c0_i32 = arith.constant 0 : i32
    %c0_i32_0 = arith.constant 0 : i32
    %c0_i32_1 = arith.constant 0 : i32
    return %c0_i32, %c0_i32_0 : i32, i32
  }
  func.func @transform_8(%arg0: i32, %arg1: i32) -> (i32, i32) {
    %c0_i32 = arith.constant 0 : i32
    %c0_i32_0 = arith.constant 0 : i32
    %c0_i32_1 = arith.constant 0 : i32
    return %c0_i32, %c0_i32_0 : i32, i32
  }
  func.func @transform_9(%arg0: i32, %arg1: i32) -> (i32, i32) {
    %c0_i32 = arith.constant 0 : i32
    %c0_i32_0 = arith.constant 0 : i32
    %c0_i32_1 = arith.constant 0 : i32
    return %c0_i32, %c0_i32_0 : i32, i32
  }
  func.func @transform_10(%arg0: i32, %arg1: i32) -> (i32, i32) {
    %c0_i32 = arith.constant 0 : i32
    %c0_i32_0 = arith.constant 0 : i32
    %c0_i32_1 = arith.constant 0 : i32
    return %c0_i32, %c0_i32_0 : i32, i32
  }
  func.func @transform_11(%arg0: i32, %arg1: i32) -> (i32, i32, i32) {
    %c0_i32 = arith.constant 0 : i32
    %c0_i32_0 = arith.constant 0 : i32
    %c0_i32_1 = arith.constant 0 : i32
    %c0_i32_2 = arith.constant 0 : i32
    return %c0_i32, %c0_i32_0, %c0_i32_1 : i32, i32, i32
  }
  func.func @transform_12(%arg0: i32, %arg1: i32) -> (i32, i32) {
    %c0_i32 = arith.constant 0 : i32
    %c0_i32_0 = arith.constant 0 : i32
    %c0_i32_1 = arith.constant 0 : i32
    return %c0_i32, %c0_i32_0 : i32, i32
  }
  func.func @transform_13(%arg0: i32, %arg1: i32) -> (i32, i32) {
    %c0_i32 = arith.constant 0 : i32
    %c0_i32_0 = arith.constant 0 : i32
    %c0_i32_1 = arith.constant 0 : i32
    return %c0_i32, %c0_i32_0 : i32, i32
  }
  func.func @transform_14(%arg0: i32, %arg1: i32) -> (i32, i32) {
    %c0_i32 = arith.constant 0 : i32
    %c0_i32_0 = arith.constant 0 : i32
    %c0_i32_1 = arith.constant 0 : i32
    return %c0_i32, %c0_i32_0 : i32, i32
  }
  func.func @transform_15(%arg0: i32, %arg1: i32) -> (i32, i32) {
    %c0_i32 = arith.constant 0 : i32
    %c0_i32_0 = arith.constant 0 : i32
    %c0_i32_1 = arith.constant 0 : i32
    return %c0_i32, %c0_i32_0 : i32, i32
  }
  func.func @transform_16(%arg0: i32, %arg1: i32) -> (i32, i32, i32) {
    %c0_i32 = arith.constant 0 : i32
    %c0_i32_0 = arith.constant 0 : i32
    return %arg0, %arg1, %c0_i32 : i32, i32, i32
  }
  func.func @transform_17(%arg0: i32, %arg1: i32) -> (i32, i32, i32) {
    %c0_i32 = arith.constant 0 : i32
    %c0_i32_0 = arith.constant 0 : i32
    return %arg0, %arg1, %c0_i32 : i32, i32, i32
  }
  func.func @transform_18(%arg0: i32, %arg1: i32) -> (i32, i32, i32) {
    %c0_i32 = arith.constant 0 : i32
    %c0_i32_0 = arith.constant 0 : i32
    return %arg0, %arg1, %c0_i32 : i32, i32, i32
  }
}

</mosaic_0001>

<bundles_post_ra>
// kernel: encoder_forward.9
= control target key start
LH: loop header
LB: loop body
LE: loop exit
PB: predicated region body
PF: predicated region fallthrough
CT: control target
= control target key end

     0   :  { %6 = vsyncpa [#allocation3], 0  ;;  %s518_s0 = inlined_call_operand.vmem [shape: f32[2,8,32], index: 0, kind: input, shape index: {}]   ;;  %s519_s1 = inlined_call_operand.hbm [shape: f32[2,8,32], index: 1, kind: output, shape index: {}]  }
   0x1   :  { %8 = vsyncpa [#allocation3 + $0x1], 0  ;;  %s418_s6 = smov 0   ;;  %s420_s7 = smov 0  }
   0x2   :  { %s422_s8 = smov 0   ;;  %s424_s9 = smov 0  }
   0x3   :  { %s426_s10 = smov 0   ;;  %s428_s11 = smov 0  }
   0x4 LB: > { %s256_s12 = sadd.s32 4294967295, %s405_s11   ;;  %s257_s13 = sadd.s32 4294967294, %s405_s11   ;;  %s405_s11 = sphi %s428_s11, %s14_s11   ;;  %s401_s10 = sphi %s426_s10, %s526_s10   ;;  %s397_s9 = sphi %s424_s9, %s525_s9   ;;  %s393_s8 = sphi %s422_s8, %s524_s8   ;;  %s389_s7 = sphi %s420_s7, %s523_s7   ;;  %s385_s6 = sphi %s418_s6, %s522_s6  }
   0x5   : > { %s26_s14 = sadd.s32 1, %s401_s10  ;;  %s63_s15 = sadd.s32 1, %s393_s8 }
   0x6   : > { %p28_p0 = scmp.ge.s32.totalorder %s26_s14, 2  ;;  %p73_p1 = scmp.ne.s32.totalorder %s393_s8, %s389_s7 }
   0x7   : > { %p74_p2 = scmp.eq.s32.totalorder %s256_s12, 1  ;;  %p79_p3 = scmp.ne.s32.totalorder %s389_s7, %s385_s6 }
   0x8   : > { %s528_s14 = smov (%p28_p0, %s26_s14), 0  ;;  %p80_p5 = scmp.eq.s32.totalorder %s257_s13, 1 }
   0x9   : > { %p458_p4 = por %p74_p2, %p73_p1  ;;  %s58_s17 = ssub.s32 %s401_s10, %s528_s14 }
   0xa   : > { %p260_p6 = scmp.ge.s32.totalorder %s405_s11, 1  ;;  %p61_p7 = scmp.eq.s32.totalorder %s58_s17, 0 }
   0xb   : > { %p465_p8 = por %p80_p5, %p79_p3  ;;  %p108_p9 = scmp.lt.s32.totalorder %s405_s11, 3 }
   0xc   : > { %s471_s19 = scalar_select %p61_p7, %s393_s8, %s63_s15  }
   0xd   : > { %p109_p10 = pnand %p260_p6, %p108_p9 }
   0xe   : > { %p130_p11 = scmp.lt.s32.totalorder (!%p109_p10), %s397_s9, 1  ;;  %s127_s25 = sand.u32 (!%p109_p10), 1, %s389_s7  }
   0xf   : > { %112 = sbr.rel (%p109_p10) target bundleno = 290 (0x122), region = 24  ;;  %s261_s26 = sshll.u32 (!%p109_p10), %s127_s25, 3 }
  0x10   : > { %s264_s27 = sshll.u32 (!%p109_p10), %s397_s9, 3  ;;  %s129_s2 = scalar_lea.vmem (!%p109_p10), [#allocation2], %s261_s26 }
  0x11   : > { %s180_s30 = scalar_lea.hbm (!%p109_p10), %s519_s1, %s264_s27  ;;  %s182_s3 = sshll.u32 (!%p109_p10), %s129_s2, 4  ;;  %s183_s3 = int_to_ptr.vmem [resolvable:$true] %s182_s3 }
  0x12   : > { %s184_s4 = sshll.u32 (!%p109_p10), %s180_s30, 4  ;;  %s169_s5 = scalar_lea.sflag (!%p109_p10), [#allocation3], %s127_s25  ;;  %s185_s4 = int_to_ptr.hbm [resolvable:$true] %s184_s4 }
  0x13   : > { %s347_s17 = scalar_lea.hbm (!%p109_p10), %s519_s1, 16 }
  0x14   : > { %s131_s20 = scalar_select %p130_p11, %s397_s9, 1  ;;  %vm138_vm0 = vcmask 261120   ;;  %v407_v2 = vmov 32.0  }
  0x15   : > { %323 = vrcp.f32 %v407_v2  ;;  %s341_s9 = sshra.s32 %s185_s4, 4  ;;  %s342_s9 = int_to_ptr.hbm [resolvable:$true] %s341_s9 }
  0x16   : > { %s262_s21 = sshll.u32 %s131_s20, 3  ;;  %s343_s12 = scalar_lea.hbm %s342_s9, 8 }
  0x17   : > { %s136_s24 = scalar_lea.vmem %s518_s0, %s262_s21  ;;  %p344_p12 = scmp.ne.s32.totalorder %s342_s9, %s343_s12 }
  0x18   : > { %v137_v0 = vld [vmem:[%s136_s24] sm:$0xff]  ;;  %p348_p1 = scmp.lt.s32.totalorder %s342_s9, %s519_s1  ;;  %p349_p2 = scmp.lt.s32.totalorder %s347_s17, %s343_s12 }
  0x19   : > { %v139_v1 = vsel %vm138_vm0, %v137_v0, 0.0  ;;  %p345_p13 = pnand %p344_p12, %p458_p4 }
  0x1a   : > { %140 = vadd.xlane.f32.xlu0 %v139_v1  ;;  %p350_p3 = por %p349_p2, %p348_p1 }
  0x1b   : > { %v324_v3 = vpop.eup %323  ;;  %p346_p0 = pneg %p345_p13 }
  0x1c   : > { %v143_v4 = vmul.f32 32.0, %v324_v3  ;;  %vm147_vm1 = vweird.f32 %v324_v3 }
  0x1d   : > { %p351_p5 = pnand %p350_p3, %p346_p0 }
  0x1e   : > { %v144_v5 = vsub.f32 1.0, %v143_v4 }
  0x20   : > { %v145_v6 = vmul.f32 %v324_v3, %v144_v5 }
  0x22   : > { %v146_v7 = vadd.f32 %v324_v3, %v145_v6 }
  0x24   : > { %v148_v8 = vsel %vm147_vm1, %v324_v3, %v146_v7 }
  0x8d   : > { %v141_v9 = vpop.xlane.xlu0 %140 }
  0x8e   : > { %v149_v10 = vmul.f32 %v148_v8, %v141_v9 }
  0x90   : > { %v150_v11 = vsub.f32 %v137_v0, %v149_v10 }
  0x92   : > { %v151_v12 = vmul.f32 %v150_v11, %v150_v11 }
  0x94   : > { %v152_v13 = vsel %vm138_vm0, %v151_v12, 0.0 }
  0x95   : > { %153 = vadd.xlane.f32.xlu0 %v152_v13 }
 0x108   : > { %v154_v14 = vpop.xlane.xlu0 %153 }
 0x109   : > { %v155_v15 = vmul.f32 0.032258064, %v154_v14 }
 0x10b   : > { %325 = vrsqrt.f32 %v155_v15  ;;  %vm162_vm3 = vweird.f32 %v155_v15 }
 0x111   : > { %v326_v16 = vpop.eup %325 }
 0x112   : > { %v157_v17 = vmul.f32 %v326_v16, %v155_v15  ;;  %vm163_vm2 = vweird.f32 %v326_v16 }
 0x113   : > { %vm164_vm4 = vmor %vm162_vm3, %vm163_vm2 }
 0x114   : > { %v158_v18 = vmul.f32 %v326_v16, %v157_v17 }
 0x116   : > { %v159_v19 = vmul.f32 0.5, %v158_v18 }
 0x118   : > { %v160_v20 = vsub.f32 1.5, %v159_v19 }
 0x11a   : > { %v161_v21 = vmul.f32 %v326_v16, %v160_v20 }
 0x11c   : > { %v165_v22 = vsel %vm164_vm4, %v326_v16, %v161_v21 }
 0x11d   : > { %v166_v23 = vmul.f32 %v165_v22, %v150_v11 }
 0x11f   : > { %167 = vst.msk [vmem:[%s129_s2] sm:$0xff] %vm138_vm0, %v166_v23 }
 0x120   : > { %354 = shalt.err (!%p351_p5)
}
 0x121   : > { %267 = dma.vmem_to_hbm [thread:$0]  (%p458_p4), %s183_s3, 128, %s185_s4, %s169_s5  }
 0x122 PF: > { %p273_p6 = scmp.ge.s32.totalorder %s405_s11, 2  ;;  %s196_s22 = sand.u32 1, %s385_s6  }
 0x123   : > { %s197_s23 = scalar_lea.sflag [#allocation3], %s196_s22 }
 0x124   : > { %p270_p7 = pnand %p273_p6, %p465_p8 }
 0x126   : > { %p271_p9 = pneg %p270_p7 }
 0x128   : > { %380 = dma.done.wait (%p271_p9), %s197_s23, 128  }
 0x129   : > { %382 = vsyncadd (%p271_p9), %s197_s23, 4294967168  ;;  %s14_s11 = sadd.s32 1, %s405_s11   ;;  %s522_s6 = smov %s389_s7 }
 0x12a   : > { %p11_p10 = scmp.ge.s32.totalorder %s14_s11, 4   ;;  %s523_s7 = smov %s393_s8 }
 0x12b   : > { %s524_s8 = smov %s471_s19  ;;  %s525_s9 = smov %s401_s10 }
 0x12c   : > { %s526_s10 = smov %s528_s14  ;;  %13 = sbr.rel (!%p11_p10) target bundleno = 4 (0x4), region = 59 }
 0x131   :  { %203 = vsyncpa [#allocation3], 1 }
 0x132   :  { %205 = vsyncpa [#allocation3 + $0x1], 1 }

// kernel: encoder_forward.5
= control target key start
LH: loop header
LB: loop body
LE: loop exit
PB: predicated region body
PF: predicated region fallthrough
CT: control target
= control target key end

     0   :  { %s600_s18 = smov 0   ;;  %s602_s19 = smov 0   ;;  %s648_s0 = inlined_call_operand.vmem [shape: bf16[2,8,32], index: 0, kind: input, shape index: {}]   ;;  %s649_s1 = inlined_call_operand.vmem [shape: bf16[32,96], index: 1, kind: input, shape index: {}]   ;;  %s650_s2 = inlined_call_operand.vmem [shape: f32[1,96], index: 2, kind: input, shape index: {}]   ;;  %s651_s3 = inlined_call_operand.vmem [shape: bf16[2,8,32], index: 3, kind: output, shape index: {0}]   ;;  %s652_s4 = inlined_call_operand.vmem [shape: bf16[2,8,32], index: 4, kind: output, shape index: {1}]   ;;  %s653_s5 = inlined_call_operand.vmem [shape: bf16[2,8,32], index: 5, kind: output, shape index: {2}]  }
   0x1   :  { %s604_s20 = smov 0  }
   0x2 LB: > { %s28_s21 = sadd.s32 1, %s562_s19  ;;  %p499_p0 = scmp.ge.s32.totalorder %s566_s20, 1  ;;  %s566_s20 = sphi %s604_s20, %s16_s20   ;;  %s562_s19 = sphi %s602_s19, %s655_s19   ;;  %s558_s18 = sphi %s600_s18, %s654_s18  }
   0x3   : > { %p30_p1 = scmp.ge.s32.totalorder %s28_s21, 2  ;;  %p214_p2 = scmp.lt.s32.totalorder %s566_s20, 3 }
   0x5   : > { %s657_s21 = smov (%p30_p1, %s28_s21), 0  ;;  %p215_p3 = pnand %p499_p0, %p214_p2 }
   0x6   : > { %p260_p4 = scmp.lt.s32.totalorder (!%p215_p3), %s558_s18, 1  ;;  %s568_s10 = smov (!%p215_p3), 96  }
   0x7   : > { %218 = sbr.rel (%p215_p3) target bundleno = 274 (0x112), region = 32  ;;  %s569_s11 = smov (!%p215_p3), 64  }
   0xc   : > { %v516_v0 = vld [vmem:[%s649_s1 + $0x8] sm:$0xff]  ;;  %v515_v1 = vld [vmem:[%s649_s1] sm:$0xff]  ;;  %s659_s18 = smov (!%p260_p4, %s558_s18), 1  ;;  %vm310_vm0 = vcmask 261120   ;;  %vm328_vm1 = vcmask 257024  }
   0xd   : > { %320 = vmatpush.bf16.msra.mxu0 %v516_v0  ;;  %s500_s26 = sshll.u32 %s659_s18, 2  ;;  %v543_v3 = vld [vmem:[%s650_s2] ss:$0 sm:$0xff] }
   0xe   : > { %s266_s29 = scalar_lea.vmem %s648_s0, %s500_s26  ;;  %s273_s9 = scalar_lea.vmem %s651_s3, %s500_s26 }
   0xf   : > { %v289_v2 = vld [vmem:[%s266_s29] sm:$0xf]  ;;  %s280_s14 = scalar_lea.vmem %s652_s4, %s500_s26  ;;  %s287_s17 = scalar_lea.vmem %s653_s5, %s500_s26 }
  0x11   : > { %321 = vmatpush.bf16.msra.mxu0 %v515_v1 }
  0x14   : > { %512 = vmatmul.msk.bf16.vlgmr.msra.gmra.mxu0 %vm310_vm0, %v289_v2 }
  0x91   : > { %v323_v4 = vpop.f32.mrf.mxu0 }
  0x92   : > { %v324_v5 = vadd.f32 %v543_v3, %v323_v4 }
  0x94   : > { %v327_v6 = vpack.c.bf16 %v324_v5, %v324_v5 }
  0x96   : > { %331 = vrot.lane.b32.xlu0 %v327_v6, %s568_s10  ;;  %329 = vst.msk [vmem:[%s273_s9] sm:$0xf] %vm328_vm1, %v327_v6 }
  0x99   : > { %v325_v7 = vpop.f32.mrf.mxu0 }
  0x9e   : > { %335 = vrot.lane.b32.xlu0 %v327_v6, %s569_s11 }
 0x108   : > { %v332_v8 = vpop.permute.xlu0 %331 }
 0x109   : > { %334 = vst.msk [vmem:[%s280_s14] sm:$0xf] %vm328_vm1, %v332_v8 }
 0x110   : > { %v336_v9 = vpop.permute.xlu0 %335 }
 0x111   : > { %338 = vst.msk [vmem:[%s287_s17] sm:$0xf] %vm328_vm1, %v336_v9 }
 0x112 PF: > { %s16_s20 = sadd.s32 1, %s566_s20   ;;  %s654_s18 = smov %s562_s19 }
 0x113   : > { %p13_p5 = scmp.ge.s32.totalorder %s16_s20, 4   ;;  %s655_s19 = smov %s657_s21 }
 0x115   :  { %15 = sbr.rel (!%p13_p5) target bundleno = 2 (0x2), region = 86 }

// kernel: encoder_forward.6
= control target key start
LH: loop header
LB: loop body
LE: loop exit
PB: predicated region body
PF: predicated region fallthrough
CT: control target
= control target key end

     0   :  { %s1866_s30 = smov 0   ;;  %s1870_s19 = smov 0   ;;  %s2117_s0 = inlined_call_operand.<no memory space> [shape: f32[1], index: 0, kind: input, shape index: {}]   ;;  %s2118_s1 = inlined_call_operand.vmem [shape: bf16[2,8,32], index: 1, kind: input, shape index: {}]   ;;  %s2119_s2 = inlined_call_operand.vmem [shape: bf16[2,8,32], index: 2, kind: input, shape index: {}]   ;;  %s2120_s3 = inlined_call_operand.vmem [shape: bf16[2,8,32], index: 3, kind: input, shape index: {}]   ;;  %s2121_s4 = inlined_call_operand.vmem [shape: bf16[2,8,32], index: 4, kind: input, shape index: {}]   ;;  %s2122_s5 = inlined_call_operand.vmem [shape: f32[1,2,1,8], index: 5, kind: input, shape index: {}]   ;;  %s2123_s6 = inlined_call_operand.vmem [shape: bf16[32,32], index: 6, kind: input, shape index: {}]   ;;  %s2124_s7 = inlined_call_operand.vmem [shape: f32[1,32], index: 7, kind: input, shape index: {}]   ;;  %s2125_s8 = inlined_call_operand.vmem [shape: f32[1,32], index: 8, kind: input, shape index: {}]   ;;  %s2126_s9 = inlined_call_operand.vmem [shape: f32[1,32], index: 9, kind: input, shape index: {}]   ;;  %s2127_s10 = inlined_call_operand.vmem [shape: bf16[64,32], index: 10, kind: input, shape index: {}]   ;;  %s2128_s11 = inlined_call_operand.vmem [shape: f32[1,1,64], index: 11, kind: input, shape index: {}]   ;;  %s2129_s12 = inlined_call_operand.vmem [shape: bf16[64,32], index: 12, kind: input, shape index: {}]   ;;  %s2130_s13 = inlined_call_operand.vmem [shape: f32[1,32], index: 13, kind: input, shape index: {}]   ;;  %s2131_s14 = inlined_call_operand.vmem [shape: f32[1,32], index: 14, kind: input, shape index: {}]   ;;  %s2132_s15 = inlined_call_operand.vmem [shape: f32[1,32], index: 15, kind: input, shape index: {}]   ;;  %s2133_s16 = inlined_call_operand.vmem [shape: f32[2,8,32], index: 16, kind: input, shape index: {}, may-alias: {16,18}]   ;;  %s2134_s17 = inlined_call_operand.vmem [shape: bf16[2,8,32], index: 17, kind: output, shape index: {0}]   ;;  %s2135_s18 = inlined_call_operand.vmem [shape: f32[2,8,32], index: 18, kind: output, shape index: {1}, may-alias: {16,18}]  }
   0x1   :  { %2138 = sst [smem:[#allocation10_spill]] %s2117_s0  ;;  %s1868_s0 = smov 0  }
   0x2   :  { %2139 = sst [smem:[#allocation11_spill]] %s2118_s1 }
   0x3   :  { %2140 = sst [smem:[#allocation12_spill]] %s2119_s2 }
   0x4   :  { %2141 = sst [smem:[#allocation13_spill]] %s2122_s5 }
   0x5   :  { %2142 = sst [smem:[#allocation14_spill]] %s2132_s15 }
   0x6   :  { %s2143_s29 = sld [smem:[#allocation10_spill]] }
   0xc   :  { %24 = sst [smem:[#allocation6]] %s2143_s29 }
   0xd LB: > { %2144 = sst [smem:[#allocation7_spill]] %s1751_s0  ;;  %s42_s1 = sadd.s32 1, %s1751_s0  ;;  %s1755_s19 = sphi %s1870_s19, %s30_s19   ;;  %s1751_s0 = sphi %s1868_s0, %s2153_s0   ;;  %s1747_s30 = sphi %s1866_s30, %s2152_s30  }
   0xe   : > { %2145 = sst [smem:[#allocation8_spill]] %s1755_s19  ;;  %p1583_p0 = scmp.ge.s32.totalorder %s1755_s19, 1 }
   0xf   : > { %p44_p1 = scmp.ge.s32.totalorder %s42_s1, 2  ;;  %p590_p2 = scmp.lt.s32.totalorder %s1755_s19, 3 }
  0x11   : > { %s2155_s1 = smov (%p44_p1, %s42_s1), 0  ;;  %p591_p3 = pnand %p1583_p0, %p590_p2 }
  0x12   : > { %2146 = sst [smem:[#allocation9_spill]] %s2155_s1  ;;  %p680_p4 = scmp.lt.s32.totalorder (!%p591_p3), %s1747_s30, 1 }
  0x13   : > { %594 = sbr.rel (%p591_p3) target bundleno = 2367 (0x93f), region = 88  ;;  %s2147_s5 = sld [smem:[#allocation13_spill]] (!%p591_p3) }
  0x14   : > { %s2148_s25 = sld [smem:[#allocation11_spill]] (!%p591_p3) }
  0x15   : > { %s2149_s29 = sld [smem:[#allocation12_spill]] (!%p591_p3) }
  0x18   : > { %vm730_vm0 = vcmask 7168   ;;  %v1757_v0 = vmov -1e+30   ;;  %s2157_s30 = smov (!%p680_p4, %s1747_s30), 1  ;;  %vm742_vm1 = vcmask 57344   ;;  %v1758_v1 = vmov 0.0  }
  0x19   : > { %731 = vst.msk [vmem:[#allocation2] sm:$0xff] %vm730_vm0, %v1757_v0  ;;  %s1887_s20 = sshll.u32 %s2157_s30, 2  ;;  %s704_s2 = scalar_lea.vmem %s2147_s5, %s2157_s30  ;;  %vm739_vm2 = vcmask 261120  }
  0x1a   : > { %732 = vst.msk [vmem:[#allocation2 + $0x8] sm:$0xff] %vm730_vm0, %v1757_v0  ;;  %s686_s26 = scalar_lea.vmem %s2148_s25, %s1887_s20  ;;  %v741_v2 = vld [vmem:[%s704_s2] sm:$0x1]  ;;  %s697_s5 = scalar_lea.vmem %s2120_s3, %s1887_s20 }
  0x1b   : > { %733 = vst.msk [vmem:[#allocation2 + $0x10] sm:$0xff] %vm730_vm0, %v1757_v0  ;;  %s693_s1 = scalar_lea.vmem %s2149_s29, %s1887_s20  ;;  %s701_s15 = scalar_lea.vmem %s2121_s4, %s1887_s20  ;;  %v1911_v3 = vld [vmem:[%s686_s26] sm:$0xf]  ;;  %v743_v5 = vsel %vm742_vm1, %v741_v2, -inf }
  0x1c   : > { %734 = vst.msk [vmem:[#allocation2 + $0x18] sm:$0xff] %vm730_vm0, %v1757_v0  ;;  %v729_v4 = vld [vmem:[%s693_s1] sm:$0xf]  ;;  %s1588_s23 = sshll.u32 %s2157_s30, 3  ;;  %s718_s2 = scalar_lea.vmem %s2134_s17, %s1887_s20  ;;  %v728_v6 = vunpack.c.l.bf16 %v1911_v3  ;;  %744 = vmax.xlane.f32.xlu0 %v743_v5 }
  0x1d   : > { %735 = vst.msk [vmem:[#allocation3] sm:$0xff] %vm730_vm0, %v1758_v1  ;;  %s1925_s26 = scalar_lea.vmem %s2133_s16, %s1588_s23  ;;  %s1930_s28 = scalar_lea.vmem %s2135_s18, %s1588_s23 }
  0x1e   : > { %736 = vst.msk [vmem:[#allocation3 + $0x8] sm:$0xff] %vm730_vm0, %v1758_v1 }
  0x1f   : > { %737 = vst.msk [vmem:[#allocation3 + $0x10] sm:$0xff] %vm730_vm0, %v1758_v1 }
  0x20   : > { %738 = vst.msk [vmem:[#allocation3 + $0x18] sm:$0xff] %vm730_vm0, %v1758_v1 }
  0x21   : > { %740 = vst.msk [vmem:[#allocation4] sm:$0xff] %vm739_vm2, %v1758_v1 }
  0x8f   : > { %v745_v7 = vpop.xlane.xlu0 %744 }
  0x90   : > { %v746_v8 = vrot.slane %v745_v7, 4 }
  0x92   : > { %v747_v9 = vmax.f32 %v745_v7, %v746_v8 }
  0x94   : > { %v748_v10 = vrot.slane %v747_v9, 2 }
  0x96   : > { %v749_v11 = vmax.f32 %v747_v9, %v748_v10 }
  0x98   : > { %v750_v12 = vrot.slane %v749_v11, 1 }
  0x9a   : > { %v751_v13 = vmax.f32 %v749_v11, %v750_v12 }
  0x9c   : > { %1654 = vpush %v751_v13 }
  0xcd   : > { %s1655_s30 = spop %1654 }
  0xce   : > { %p753_p5 = scmp.gt.f32.partialorder %s1655_s30, -1e+29 }
  0xcf   : > { %v757_v14 = vld [vmem:[%s697_s5] sm:$0xf] (%p753_p5)  ;;  %vm759_vm3 = vcmask (%p753_p5), 64512   ;;  %v1938_v16 = vperm.slane (%p753_p5), %v741_v2, 0  ;;  %s1759_s29 = smov (%p753_p5), 112   ;;  %s1760_s5 = smov (%p753_p5), 120   ;;  %v839_v25 = vunpack.c.l.b16 (%p753_p5), %v729_v4 }
  0xd0   : > { %756 = sbr.rel (!%p753_p5) target bundleno = 1249 (0x4e1), region = 92  ;;  %v764_v15 = vsel (%p753_p5), %vm759_vm3, %v757_v14, 0  ;;  %v844_v21 = vunpack.c.l.b16 (%p753_p5), %v757_v14  ;;  %v1761_v24 = vmov (%p753_p5), 0   ;;  %s1762_s21 = smov (%p753_p5), 104   ;;  %v1946_v27 = vld [vmem:[#allocation2] sm:$0xff] (%p753_p5)  ;;  %vm818_vm4 = vcmask (%p753_p5), 1043456  }
  0xd1   : > { %773 = vmatpush.bf16.xpose.msra.mxu0 (%p753_p5), %v764_v15  ;;  %1691 = vset.pattern.permute.xlu1 (%p753_p5), %v1761_v24  ;;  %v840_v26 = vpack.c.b16 (%p753_p5), %v839_v25, %v839_v25  ;;  %v758_v33 = vld [vmem:[%s701_s15] sm:$0xf] (%p753_p5)  ;;  %v1987_v8 = vld [vmem:[#allocation2 + $0x18] sm:$0xff] (%p753_p5)  ;;  %v960_v12 = vld [vmem:[#allocation2 + $0x10] sm:$0xff] (%p753_p5)  ;;  %s1763_s15 = smov (%p753_p5), 8   ;;  %s1764_s24 = smov (%p753_p5), 16  }
  0xd2   : > { %v845_v23 = vpack.c.b16 (%p753_p5), %v844_v21, %v844_v21  ;;  %1692 = vset.pattern.permute.xlu2 (%p753_p5), %v1761_v24  ;;  %1693 = vset.pattern.permute.xlu0 (%p753_p5), %v1761_v24  ;;  %v820_v34 = vsel (%p753_p5), %vm818_vm4, %v758_v33, 0  ;;  %v903_v63 = vunpack.c.l.b16 (%p753_p5), %v758_v33  ;;  %s1765_s25 = smov (%p753_p5), 24   ;;  %vm931_vm5 = vcmask (%p753_p5), 130112  }
  0xd3   : > { %829 = vmatpush.bf16.msra.mxu1 (%p753_p5), %v820_v34  ;;  %vm1018_vm6 = vcmask (%p753_p5), 195712   ;;  %vm1105_vm7 = vcmask (%p753_p5), 261312  }
  0xd4   : > { %936 = vrot.lane.b32.xlu2 (%p753_p5), %v845_v23, %s1759_s29  ;;  %v904_v2 = vpack.c.b16 (%p753_p5), %v903_v63, %v903_v63 }
  0xd8   : > { %1591 = vmatmul.msk.bf16.vlgmr.msra.gmra.mxu0 %vm759_vm3, %v729_v4  ;;  %v870_v4 = vld [vmem:[#allocation2 + $0x8] sm:$0xff] }
  0xdc   : > { %934 = vrot.lane.b32.xlu2 %v840_v26, %s1759_s29 }
  0xe4   : > { %1021 = vrot.lane.b32.xlu2 %v840_v26, %s1762_s21 }
 0x12e   : > { %v937_v35 = vpop.permute.xlu2 %936 }
 0x12f   : > { %v942_v36 = vsel %vm759_vm3, %v937_v35, 0 }
 0x130   : > { %951 = vmatpush.bf16.xpose.msrb.mxu1 %v942_v36  ;;  %v807_v36 = vld [vmem:[#allocation4] sm:$0xff] }
 0x136   : > { %v935_v43 = vpop.permute.xlu2 %934 }
 0x13e   : > { %v1022_v46 = vpop.permute.xlu2 %1021 }
 0x155   : > { %v775_v17 = vpop.f32.mrf.mxu0 }
 0x156   : > { %v779_v18 = vmul.f32 0.35355338, %v775_v17 }
 0x158   : > { %v783_v19 = vadd.f32 %v1938_v16, %v779_v18 }
 0x15a   : > { %v785_v20 = vsel %vm759_vm3, %v783_v19, -inf }
 0x15b   : > { %786 = vmax.xlane.f32.xlu0 %v785_v20 }
 0x15d   : > { %v777_v22 = vpop.f32.mrf.mxu0 }
 0x16f   : > { %846 = vrot.lane.b32.xlu0 %v845_v23, %s1760_s5 }
 0x1ce   : > { %v787_v28 = vpop.xlane.xlu0 %786 }
 0x1cf   : > { %v1949_v29 = vmax.f32 %v1946_v27, %v787_v28 }
 0x1d1   : > { %v789_v30 = vsub.f32 %v1946_v27, %v1949_v29  ;;  %837 = vst.msk [vmem:[#allocation2] sm:$0xff] %vm730_vm0, %v1949_v29  ;;  %794 = vperm.xlu1 %1691, %v1949_v29  }
 0x1d3   : > { %v790_v14 = vmul.f32 1.442695, %v789_v30 }
 0x1d9   : > { %841 = vrot.lane.b32.xlu1 %v840_v26, %s1760_s5 }
 0x1e1   : > { %1023 = vrot.lane.b32.xlu1 %v845_v23, %s1762_s21  ;;  %v847_v31 = vpop.permute.xlu0 %846 }
 0x1e2   : > { %v852_v32 = vsel %vm759_vm3, %v847_v31, 0 }
 0x1e3   : > { %861 = vmatpush.bf16.xpose.msra.mxu2 %v852_v32 }
 0x243   : > { %v795_v37 = vpop.permute.xlu1 %794 }
 0x244   : > { %v797_v38 = vsub.f32 %v783_v19, %v795_v37 }
 0x246   : > { %v798_v39 = vmul.f32 1.442695, %v797_v38 }
 0x248   : > { %1694 = vpow2.f32 %v798_v39 }
 0x249   : > { %1696 = vpow2.f32 %v790_v14 }
 0x24b   : > { %v842_v40 = vpop.permute.xlu1 %841 }
 0x24c   : > { %1593 = vmatmul.msk.bf16.vlgmr.msra.gmra.mxu2 %vm759_vm3, %v842_v40 }
 0x24e   : > { %v1695_v41 = vpop.eup %1694 }
 0x24f   : > { %v814_v42 = vpack.c.bf16 %v1695_v41, %v1695_v41  ;;  %v1697_v18 = vpop.eup %1696  ;;  %v802_v20 = vsel %vm759_vm3, %v1695_v41, 0.0 }
 0x251   : > { %1592 = vmatmul.msk.bf16.vlgmr.msra.gmra.mxu1 %vm759_vm3, %v814_v42 }
 0x253   : > { %v1024_v44 = vpop.permute.xlu1 %1023 }
 0x254   : > { %v1029_v45 = vsel %vm759_vm3, %v1024_v44, 0 }
 0x255   : > { %1038 = vmatpush.bf16.xpose.msrb.mxu0 %v1029_v45 }
 0x25c   : > { %1597 = vmatmul.msk.bf16.vlgmr.msrb.gmra.mxu0 %vm759_vm3, %v1022_v46 }
 0x261   : > { %1595 = vmatmul.msk.bf16.vlgmr.msrb.gmra.mxu1 %vm759_vm3, %v935_v43 }
 0x2ce   : > { %v1971_v47 = vpop.f32.mrf.mxu1 }
 0x2cf   : > { %v863_v48 = vpop.f32.mrf.mxu2 }
 0x2d0   : > { %v867_v49 = vmul.f32 0.35355338, %v863_v48 }
 0x2d2   : > { %v868_v50 = vadd.f32 %v867_v49, %v1938_v16 }
 0x2d4   : > { %v871_v51 = vsel %vm759_vm3, %v868_v50, -inf }
 0x2d5   : > { %872 = vmax.xlane.f32.xlu1 %v871_v51  ;;  %v800_v51 = vld [vmem:[#allocation3] sm:$0xff] }
 0x2d6   : > { %v833_v52 = vpop.f32.mrf.mxu1 }
 0x2d7   : > { %v865_v53 = vpop.f32.mrf.mxu2  ;;  %v801_v52 = vmul.f32 %v1697_v18, %v800_v51 }
 0x2d9   : > { %v1040_v54 = vpop.f32.mrf.mxu0 }
 0x2da   : > { %v1044_v55 = vmul.f32 0.35355338, %v1040_v54 }
 0x2dc   : > { %v1976_v56 = vadd.f32 %v1044_v55, %v1938_v16  ;;  %v887_v55 = vld [vmem:[#allocation3 + $0x8] sm:$0xff] }
 0x2de   : > { %v953_v57 = vpop.f32.mrf.mxu1  ;;  %v1048_v58 = vsel %vm759_vm3, %v1976_v56, -inf }
 0x2df   : > { %v957_v59 = vmul.f32 0.35355338, %v953_v57  ;;  %1049 = vmax.xlane.f32.xlu0 %v1048_v58 }
 0x2e1   : > { %v1981_v60 = vadd.f32 %v957_v59, %v1938_v16  ;;  %v1042_v61 = vpop.f32.mrf.mxu0 }
 0x2e3   : > { %v961_v62 = vsel %vm759_vm3, %v1981_v60, -inf }
 0x2e4   : > { %962 = vmax.xlane.f32.xlu2 %v961_v62 }
 0x2e6   : > { %v955_v0 = vpop.f32.mrf.mxu1 }
 0x2e7   : > { %v1064_v0 = vld [vmem:[#allocation3 + $0x18] sm:$0xff] }
 0x2ee   : > { %905 = vrot.lane.b32.xlu1 %v904_v2, %s1760_s5 }
 0x348   : > { %v873_v5 = vpop.xlane.xlu1 %872 }
 0x349   : > { %v874_v7 = vmax.f32 %v870_v4, %v873_v5 }
 0x34b   : > { %933 = vst.msk [vmem:[#allocation2 + $0x8] sm:$0xff] %vm730_vm0, %v874_v7  ;;  %880 = vperm.xlu2 %1692, %v874_v7   ;;  %v875_v16 = vsub.f32 %v870_v4, %v874_v7 }
 0x34d   : > { %v876_v17 = vmul.f32 1.442695, %v875_v16 }
 0x34f   : > { %1698 = vpow2.f32 %v876_v17 }
 0x352   : > { %v1050_v9 = vpop.xlane.xlu0 %1049 }
 0x353   : > { %v1990_v10 = vmax.f32 %v1987_v8, %v1050_v9  ;;  %992 = vrot.lane.b32.xlu2 %v904_v2, %s1759_s29 }
 0x355   : > { %v1052_v11 = vsub.f32 %v1987_v8, %v1990_v10  ;;  %1107 = vst.msk [vmem:[#allocation2 + $0x18] sm:$0xff] %vm730_vm0, %v1990_v10  ;;  %1057 = vperm.xlu1 %1691, %v1990_v10   ;;  %v1699_v19 = vpop.eup %1698 }
 0x357   : > { %v963_v13 = vpop.xlane.xlu2 %962 }
 0x358   : > { %v964_v15 = vmax.f32 %v960_v12, %v963_v13 }
 0x35a   : > { %1020 = vst.msk [vmem:[#allocation2 + $0x10] sm:$0xff] %vm730_vm0, %v964_v15  ;;  %970 = vperm.xlu0 %1693, %v964_v15   ;;  %v965_v21 = vsub.f32 %v960_v12, %v964_v15 }
 0x35b   : > { %1079 = vrot.lane.b32.xlu2 %v904_v2, %s1762_s21 }
 0x35c   : > { %v966_v22 = vmul.f32 1.442695, %v965_v21 }
 0x35e   : > { %1700 = vpow2.f32 %v966_v22 }
 0x360   : > { %v906_v23 = vpop.permute.xlu1 %905 }
 0x361   : > { %v911_v24 = vsel %vm818_vm4, %v906_v23, 0 }
 0x362   : > { %920 = vmatpush.bf16.msra.mxu3 %v911_v24 }
 0x363   : > { %810 = vperm.xlu2 %1692, %v1697_v18  }
 0x364   : > { %v2005_v25 = vpop.eup %1700 }
 0x36b   : > { %897 = vperm.xlu2 %1692, %v1699_v19  }
 0x37f   : > { %803 = vadd.xlane.f32.xlu1 %v802_v20 }
 0x398   : > { %987 = vperm.xlu1 %1691, %v2005_v25  }
 0x3a5   : > { %v881_v26 = vpop.permute.xlu2 %880 }
 0x3a6   : > { %v883_v27 = vsub.f32 %v868_v50, %v881_v26 }
 0x3a8   : > { %v884_v28 = vmul.f32 1.442695, %v883_v27 }
 0x3aa   : > { %1702 = vpow2.f32 %v884_v28 }
 0x3ad   : > { %v993_v29 = vpop.permute.xlu2 %992 }
 0x3ae   : > { %v998_v30 = vsel %vm818_vm4, %v993_v29, 0 }
 0x3af   : > { %1007 = vmatpush.bf16.msrb.mxu3 %v998_v30 }
 0x3b0   : > { %v1703_v31 = vpop.eup %1702 }
 0x3b1   : > { %v889_v32 = vsel %vm759_vm3, %v1703_v31, 0.0  ;;  %v901_v33 = vpack.c.bf16 %v1703_v31, %v1703_v31 }
 0x3b2   : > { %890 = vadd.xlane.f32.xlu0 %v889_v32 }
 0x3b3   : > { %1594 = vmatmul.msk.bf16.vlgmr.msra.gmra.mxu3 %vm759_vm3, %v901_v33 }
 0x3b5   : > { %v1080_v34 = vpop.permute.xlu2 %1079 }
 0x3b6   : > { %v1085_v35 = vsel %vm818_vm4, %v1080_v34, 0 }
 0x3b7   : > { %1094 = vmatpush.bf16.msrb.mxu2 %v1085_v35 }
 0x3bd   : > { %v811_v37 = vpop.permute.xlu2 %810 }
 0x3be   : > { %v813_v38 = vmul.f32 %v811_v37, %v807_v36 }
 0x3c0   : > { %v835_v39 = vadd.f32 %v1971_v47, %v813_v38 }
 0x3c2   : > { %836 = vst.msk [vmem:[#allocation4] sm:$0xff] %vm759_vm3, %v835_v39 }
 0x3c5   : > { %v898_v10 = vpop.permute.xlu2 %897 }
 0x3c7   : > { %v1058_v40 = vpop.permute.xlu1 %1057 }
 0x3c8   : > { %v1060_v41 = vsub.f32 %v1976_v56, %v1058_v40  ;;  %v888_v56 = vmul.f32 %v1699_v19, %v887_v55  ;;  %v977_v19 = vld [vmem:[#allocation3 + $0x10] sm:$0xff] }
 0x3c9   : > { %v978_v22 = vmul.f32 %v2005_v25, %v977_v19 }
 0x3ca   : > { %v1061_v42 = vmul.f32 1.442695, %v1060_v41 }
 0x3cc   : > { %1704 = vpow2.f32 %v1061_v42  ;;  %v971_v43 = vpop.permute.xlu0 %970 }
 0x3cd   : > { %v973_v44 = vsub.f32 %v1981_v60, %v971_v43  ;;  %v1053_v60 = vmul.f32 1.442695, %v1052_v11  ;;  %v894_v11 = vld [vmem:[#allocation4] sm:$0xff] }
 0x3ce   : > { %v900_v14 = vmul.f32 %v898_v10, %v894_v11 }
 0x3cf   : > { %v974_v45 = vmul.f32 1.442695, %v973_v44 }
 0x3d1   : > { %1706 = vpow2.f32 %v974_v45 }
 0x3d2   : > { %v1705_v46 = vpop.eup %1704  ;;  %1708 = vpow2.f32 %v1053_v60 }
 0x3d3   : > { %v1066_v48 = vsel %vm759_vm3, %v1705_v46, 0.0  ;;  %v1078_v49 = vpack.c.bf16 %v1705_v46, %v1705_v46 }
 0x3d4   : > { %1067 = vadd.xlane.f32.xlu1 %v1066_v48 }
 0x3d5   : > { %1598 = vmatmul.msk.bf16.vlgmr.msrb.gmra.mxu2 %vm759_vm3, %v1078_v49 }
 0x3d7   : > { %v1707_v47 = vpop.eup %1706 }
 0x3d8   : > { %v991_v50 = vpack.c.bf16 %v1707_v47, %v1707_v47  ;;  %v1709_v63 = vpop.eup %1708  ;;  %v979_v12 = vsel %vm759_vm3, %v1707_v47, 0.0 }
 0x3d9   : > { %v1065_v2 = vmul.f32 %v1709_v63, %v1064_v0 }
 0x3da   : > { %1596 = vmatmul.msk.bf16.vlgmr.msrb.gmra.mxu3 %vm759_vm3, %v991_v50 }
 0x3f2   : > { %v804_v53 = vpop.xlane.xlu1 %803 }
 0x3f3   : > { %v805_v54 = vadd.f32 %v804_v53, %v801_v52 }
 0x3f5   : > { %806 = vst.msk [vmem:[#allocation3] sm:$0xff] %vm730_vm0, %v805_v54 }
 0x40a   : > { %v988_v62 = vpop.permute.xlu1 %987 }
 0x425   : > { %v891_v57 = vpop.xlane.xlu0 %890 }
 0x426   : > { %v892_v58 = vadd.f32 %v891_v57, %v888_v56 }
 0x428   : > { %893 = vst.msk [vmem:[#allocation3 + $0x8] sm:$0xff] %vm730_vm0, %v892_v58 }
 0x436   : > { %v922_v59 = vpop.f32.mrf.mxu3 }
 0x437   : > { %927 = vrot.lane.b32.xlu2 %v922_v59, %s1763_s15 }
 0x43e   : > { %v924_v61 = vpop.f32.mrf.mxu3 }
 0x447   : > { %v1068_v4 = vpop.xlane.xlu1 %1067 }
 0x448   : > { %v1069_v5 = vadd.f32 %v1068_v4, %v1065_v2 }
 0x44a   : > { %1070 = vst.msk [vmem:[#allocation3 + $0x18] sm:$0xff] %vm730_vm0, %v1069_v5 }
 0x458   : > { %v1096_v7 = vpop.f32.mrf.mxu2 }
 0x45d   : > { %v1009_v9 = vpop.f32.mrf.mxu3 }
 0x45e   : > { %1014 = vrot.lane.b32.xlu0 %v1009_v9, %s1764_s24 }
 0x460   : > { %v1098_v13 = vpop.f32.mrf.mxu2  ;;  %980 = vadd.xlane.f32.xlu2 %v979_v12 }
 0x465   : > { %v1011_v8 = vpop.f32.mrf.mxu3 }
 0x466   : > { %1101 = vrot.lane.b32.xlu0 %v1096_v7, %s1765_s25 }
 0x478   : > { %1074 = vperm.xlu2 %1692, %v1709_v63  }
 0x491   : > { %v928_v15 = vpop.permute.xlu2 %927 }
 0x492   : > { %v930_v16 = vadd.f32 %v928_v15, %v900_v14 }
 0x494   : > { %932 = vst.msk [vmem:[#allocation4] sm:$0xff] %vm931_vm5, %v930_v16 }
 0x49b   : > { %v984_v17 = vld [vmem:[#allocation4] sm:$0xff] }
 0x49c   : > { %v990_v18 = vmul.f32 %v988_v62, %v984_v17 }
 0x4d0   : > { %v1015_v20 = vpop.permute.xlu0 %1014 }
 0x4d1   : > { %v1017_v21 = vadd.f32 %v1015_v20, %v990_v18 }
 0x4d3   : > { %1019 = vst.msk [vmem:[#allocation4] sm:$0xff] %vm1018_vm6, %v1017_v21  ;;  %v981_v23 = vpop.xlane.xlu2 %980 }
 0x4d4   : > { %v982_v24 = vadd.f32 %v981_v23, %v978_v22 }
 0x4d6   : > { %983 = vst.msk [vmem:[#allocation3 + $0x10] sm:$0xff] %vm730_vm0, %v982_v24 }
 0x4d8   : > { %v1102_v29 = vpop.permute.xlu0 %1101 }
 0x4da   : > { %v1071_v26 = vld [vmem:[#allocation4] sm:$0xff] }
 0x4db   : > { %v1075_v27 = vpop.permute.xlu2 %1074 }
 0x4dc   : > { %v1077_v28 = vmul.f32 %v1075_v27, %v1071_v26 }
 0x4de   : > { %v1104_v30 = vadd.f32 %v1102_v29, %v1077_v28 }
 0x4e0   : > { %1106 = vst.msk [vmem:[#allocation4] sm:$0xff] %vm1105_vm7, %v1104_v30 }
 0x4e1 PF: > { %v1108_v31 = vld [vmem:[#allocation3] sm:$0xff]  ;;  %v1134_v32 = vld [vmem:[#allocation3 + $0x10] sm:$0xff]  ;;  %1238 = vst.msk [vmem:[#allocation5] sm:$0xff] %vm739_vm2, %v1758_v1  ;;  %v1766_v33 = vmov 0   ;;  %v1121_v35 = vld [vmem:[#allocation3 + $0x8] sm:$0xff]  ;;  %vm1118_vm8 = vcmask 64512  }
 0x4e2   : > { %1710 = vset.pattern.permute.xlu0 %v1766_v33  ;;  %v1109_v25 = vmax.f32 %v1108_v31, 1e-30  ;;  %1711 = vset.pattern.permute.xlu1 %v1766_v33  ;;  %v1135_v34 = vmax.f32 %v1134_v32, 1e-30  ;;  %v1147_v36 = vld [vmem:[#allocation3 + $0x18] sm:$0xff]  ;;  %v1645_v45 = vld [vmem:[%s2123_s6 + $0x8] sm:$0xff] }
 0x4e3   : > { %v1122_v37 = vmax.f32 %v1121_v35, 1e-30  ;;  %v1148_v38 = vmax.f32 %v1147_v36, 1e-30  ;;  %1190 = vmatpush.bf16.msra.mxu0 %v1645_v45  ;;  %v1644_v46 = vld [vmem:[%s2123_s6] sm:$0xff]  ;;  %vm1131_vm9 = vcmask 130112  }
 0x4e4   : > { %1719 = vrcp.f32 %v1109_v25  ;;  %vm1144_vm10 = vcmask 195712   ;;  %vm1157_vm11 = vcmask 261312   ;;  %v1712_v58 = vld [vmem:[%s2124_s7] ss:$0 sm:$0xff]  ;;  %v1767_v0 = vmov 32.0   ;;  %v1649_v2 = vld [vmem:[%s2127_s10 + $0x18] sm:$0xff] }
 0x4e5   : > { %1721 = vrcp.f32 %v1135_v34  ;;  %v1284_v4 = vsel %vm739_vm2, %v1649_v2, 0  ;;  %v1648_v15 = vld [vmem:[%s2127_s10 + $0x10] sm:$0xff]  ;;  %v1647_v17 = vld [vmem:[%s2127_s10 + $0x8] sm:$0xff]  ;;  %v1646_v19 = vld [vmem:[%s2127_s10] sm:$0xff]  ;;  %vm1334_vm0 = vcmask 523264   ;;  %s1396_s30 = sld [smem:[#allocation6]] }
 0x4e6   : > { %1723 = vrcp.f32 %v1122_v37  ;;  %1290 = vmatpush.bf16.xpose.msra.mxu1 %v1284_v4  ;;  %v1281_v16 = vsel %vm739_vm2, %v1648_v15, 0  ;;  %v1278_v18 = vsel %vm739_vm2, %v1647_v17, 0  ;;  %v1275_v20 = vsel %vm739_vm2, %v1646_v19, 0  ;;  %v1653_v21 = vld [vmem:[%s2129_s12 + $0x18] sm:$0xff]  ;;  %v1652_v24 = vld [vmem:[%s2129_s12 + $0x10] sm:$0xff]  ;;  %s2150_s23 = sld [smem:[#allocation14_spill]] }
 0x4e7   : > { %1725 = vrcp.f32 %v1148_v38  ;;  %v1110_v1 = vld [vmem:[#allocation4] sm:$0xff]  ;;  %1191 = vmatpush.bf16.msra.mxu0 %v1644_v46  ;;  %1342 = vmatpush.bf16.msra.mxu2 %v1653_v21  ;;  %vm1393_vm5 = vcmask 257024  }
 0x4e8   : > { %1727 = vrcp.f32 %v1767_v0  ;;  %v1713_v33 = vld [vmem:[%s2125_s8] ss:$0 sm:$0xff]  ;;  %v1300_v46 = vld [vmem:[#allocation5] sm:$0xff] }
 0x4e9   : > { %v1714_v35 = vld [vmem:[%s2126_s9] ss:$0 sm:$0xff] }
 0x4ea   : > { %v1720_v39 = vpop.eup %1719 }
 0x4eb   : > { %1114 = vperm.xlu0 %1710, %v1720_v39   ;;  %v1722_v40 = vpop.eup %1721  ;;  %1343 = vmatpush.bf16.msra.mxu2 %v1652_v24  ;;  %v1651_v39 = vld [vmem:[%s2129_s12 + $0x8] sm:$0xff] }
 0x4ec   : > { %1140 = vperm.xlu1 %1711, %v1722_v40   ;;  %v1724_v41 = vpop.eup %1723  ;;  %v1650_v40 = vld [vmem:[%s2129_s12] sm:$0xff] }
 0x4ed   : > { %v1726_v42 = vpop.eup %1725 }
 0x4ee   : > { %v1728_v5 = vpop.eup %1727  ;;  %1291 = vmatpush.bf16.xpose.msra.mxu1 %v1281_v16 }
 0x4ef   : > { %v1204_v7 = vmul.f32 32.0, %v1728_v5  ;;  %vm1208_vm12 = vweird.f32 %v1728_v5  ;;  %1344 = vmatpush.bf16.msra.mxu2 %v1651_v39 }
 0x4f1   : > { %v1205_v9 = vsub.f32 1.0, %v1204_v7 }
 0x4f3   : > { %1127 = vperm.xlu0 %1710, %v1724_v41   ;;  %v1206_v12 = vmul.f32 %v1728_v5, %v1205_v9  ;;  %1345 = vmatpush.bf16.msra.mxu2 %v1650_v40  ;;  %v1715_v41 = vld [vmem:[%s2128_s11] ss:$0 sm:$0xff] }
 0x4f4   : > { %1153 = vperm.xlu1 %1711, %v1726_v42   ;;  %v1717_v9 = vld [vmem:[%s2131_s14] ss:$0 sm:$0xff] }
 0x4f5   : > { %v1207_v13 = vadd.f32 %v1728_v5, %v1206_v12 }
 0x4f6   : > { %1292 = vmatpush.bf16.xpose.msra.mxu1 %v1278_v18 }
 0x4f7   : > { %v2047_v3 = vsel %vm1208_vm12, %v1728_v5, %v1207_v13  ;;  %v1718_v13 = vld [vmem:[%s2150_s23] ss:$0 sm:$0xff] }
 0x4fe   : > { %1293 = vmatpush.bf16.xpose.msra.mxu1 %v1275_v20 }
 0x55d   : > { %v1115_v43 = vpop.permute.xlu0 %1114 }
 0x55e   : > { %v1117_v44 = vmul.f32 %v1115_v43, %v1110_v1  ;;  %v1141_v50 = vpop.permute.xlu1 %1140 }
 0x560   : > { %1119 = vst.msk [vmem:[#allocation4] sm:$0xff] %vm1118_vm8, %v1117_v44 }
 0x565   : > { %v1128_v49 = vpop.permute.xlu0 %1127 }
 0x566   : > { %v1154_v53 = vpop.permute.xlu1 %1153 }
 0x567   : > { %v1123_v48 = vld [vmem:[#allocation4] sm:$0xff] }
 0x568   : > { %v1130_v47 = vmul.f32 %v1128_v49, %v1123_v48 }
 0x56a   : > { %1132 = vst.msk [vmem:[#allocation4] sm:$0xff] %vm1131_vm9, %v1130_v47 }
 0x571   : > { %v1136_v51 = vld [vmem:[#allocation4] sm:$0xff] }
 0x572   : > { %v1143_v52 = vmul.f32 %v1141_v50, %v1136_v51  ;;  %v1716_v50 = vld [vmem:[%s2130_s13] ss:$0 sm:$0xff] }
 0x574   : > { %1145 = vst.msk [vmem:[#allocation4] sm:$0xff] %vm1144_vm10, %v1143_v52 }
 0x57b   : > { %v1149_v54 = vld [vmem:[#allocation4] sm:$0xff] }
 0x57c   : > { %v1156_v55 = vmul.f32 %v1154_v53, %v1149_v54 }
 0x57e   : > { %1158 = vst.msk [vmem:[#allocation4] sm:$0xff] %vm1157_vm11, %v1156_v55 }
 0x585   : > { %v1159_v56 = vld [vmem:[#allocation4] sm:$0xff] }
 0x586   : > { %v1160_v57 = vpack.c.bf16 %v1159_v56, %v1159_v56 }
 0x588   : > { %1607 = vmatmul.msk.bf16.vlgmr.msra.gmra.mxu0 %vm739_vm2, %v1160_v57 }
 0x605   : > { %v1193_v59 = vpop.f32.mrf.mxu0 }
 0x606   : > { %v1194_v60 = vadd.f32 %v1712_v58, %v1193_v59 }
 0x608   : > { %v1197_v61 = vadd.f32 %v1194_v60, %v728_v6 }
 0x60a   : > { %v1200_v62 = vsel %vm739_vm2, %v1197_v61, 0.0 }
 0x60b   : > { %1201 = vadd.xlane.f32.xlu2 %v1200_v62 }
 0x60d   : > { %v1195_v63 = vpop.f32.mrf.mxu0 }
 0x67e   : > { %v1202_v6 = vpop.xlane.xlu2 %1201 }
 0x67f   : > { %v1210_v8 = vmul.f32 %v2047_v3, %v1202_v6 }
 0x681   : > { %v1211_v10 = vsub.f32 %v1197_v61, %v1210_v8  ;;  %v1397_v8 = vstv %s1396_s30 }
 0x683   : > { %v1212_v11 = vmul.f32 %v1211_v10, %v1211_v10 }
 0x685   : > { %v1213_v14 = vsel %vm739_vm2, %v1212_v11, 0.0  ;;  %v1395_v11 = vld [vmem:[%s1925_s26] sm:$0xff] }
 0x686   : > { %1214 = vadd.xlane.f32.xlu2 %v1213_v14 }
 0x6f9   : > { %v1215_v22 = vpop.xlane.xlu2 %1214 }
 0x6fa   : > { %v1216_v23 = vmul.f32 %v1215_v22, %v2047_v3 }
 0x6fc   : > { %v1217_v26 = vadd.f32 1e-05, %v1216_v23 }
 0x6fe   : > { %1729 = vrsqrt.f32 %v1217_v26  ;;  %vm1224_vm14 = vweird.f32 %v1217_v26 }
 0x704   : > { %v1730_v27 = vpop.eup %1729 }
 0x705   : > { %v1219_v28 = vmul.f32 %v1730_v27, %v1217_v26  ;;  %vm1225_vm13 = vweird.f32 %v1730_v27 }
 0x706   : > { %vm1226_vm15 = vmor %vm1224_vm14, %vm1225_vm13 }
 0x707   : > { %v1220_v29 = vmul.f32 %v1730_v27, %v1219_v28 }
 0x709   : > { %v1221_v30 = vmul.f32 0.5, %v1220_v29 }
 0x70b   : > { %v1222_v31 = vsub.f32 1.5, %v1221_v30 }
 0x70d   : > { %v1223_v32 = vmul.f32 %v1730_v27, %v1222_v31 }
 0x70f   : > { %v1227_v25 = vsel %vm1226_vm15, %v1730_v27, %v1223_v32 }
 0x710   : > { %v1228_v34 = vmul.f32 %v1227_v25, %v1211_v10 }
 0x712   : > { %v1232_v36 = vmul.f32 %v1713_v33, %v1228_v34 }
 0x714   : > { %v1236_v37 = vadd.f32 %v1714_v35, %v1232_v36 }
 0x716   : > { %v1237_v38 = vpack.c.bf16 %v1236_v37, %v1236_v37 }
 0x718   : > { %1624 = vmatmul.msk.bf16.vlgmr.msra.gmra.mxu1 %vm739_vm2, %v1237_v38 }
 0x795   : > { %v1295_v42 = vpop.f32.mrf.mxu1 }
 0x796   : > { %v1296_v1 = vadd.f32 %v1715_v41, %v1295_v42 }
 0x798   : > { %v1299_v43 = vmax.f32 %v1296_v1, 0.0 }
 0x79a   : > { %v1301_v44 = vpack.c.bf16 %v1299_v43, %v1299_v43 }
 0x79c   : > { %1641 = vmatmul.msk.bf16.vlgmr.msra.gmra.mxu2 %vm1334_vm0, %v1301_v44 }
 0x79d   : > { %v1297_v45 = vpop.f32.mrf.mxu1 }
 0x81f   : > { %v1347_v48 = vpop.f32.mrf.mxu2 }
 0x820   : > { %v1351_v49 = vadd.f32 %v1347_v48, %v1300_v46 }
 0x822   : > { %1352 = vst.msk [vmem:[#allocation5] sm:$0xff] %vm739_vm2, %v1351_v49 }
 0x827   : > { %v1349_v47 = vpop.f32.mrf.mxu2 }
 0x829   : > { %v1353_v51 = vld [vmem:[#allocation5] sm:$0xff] }
 0x82a   : > { %v1354_v52 = vadd.f32 %v1353_v51, %v1236_v37 }
 0x82c   : > { %v1359_v53 = vadd.f32 %v1716_v50, %v1354_v52 }
 0x82e   : > { %v1362_v54 = vsel %vm739_vm2, %v1359_v53, 0.0 }
 0x82f   : > { %1363 = vadd.xlane.f32.xlu0 %v1362_v54 }
 0x8a2   : > { %v1364_v55 = vpop.xlane.xlu0 %1363 }
 0x8a3   : > { %v1365_v56 = vmul.f32 %v1364_v55, %v2047_v3 }
 0x8a5   : > { %v1366_v57 = vsub.f32 %v1359_v53, %v1365_v56 }
 0x8a7   : > { %v1367_v58 = vmul.f32 %v1366_v57, %v1366_v57 }
 0x8a9   : > { %v1368_v59 = vsel %vm739_vm2, %v1367_v58, 0.0 }
 0x8aa   : > { %1369 = vadd.xlane.f32.xlu1 %v1368_v59 }
 0x91d   : > { %v1370_v60 = vpop.xlane.xlu1 %1369 }
 0x91e   : > { %v1371_v61 = vmul.f32 %v1370_v60, %v2047_v3 }
 0x920   : > { %v1372_v62 = vadd.f32 1e-05, %v1371_v61 }
 0x922   : > { %1731 = vrsqrt.f32 %v1372_v62  ;;  %vm1379_vm3 = vweird.f32 %v1372_v62 }
 0x928   : > { %v1732_v63 = vpop.eup %1731 }
 0x929   : > { %v1374_v0 = vmul.f32 %v1732_v63, %v1372_v62  ;;  %vm1380_vm1 = vweird.f32 %v1732_v63 }
 0x92a   : > { %vm1381_vm4 = vmor %vm1379_vm3, %vm1380_vm1 }
 0x92b   : > { %v1375_v2 = vmul.f32 %v1732_v63, %v1374_v0 }
 0x92d   : > { %v1376_v4 = vmul.f32 0.5, %v1375_v2 }
 0x92f   : > { %v1377_v5 = vsub.f32 1.5, %v1376_v4 }
 0x931   : > { %v1378_v7 = vmul.f32 %v1732_v63, %v1377_v5 }
 0x933   : > { %v1382_v12 = vsel %vm1381_vm4, %v1732_v63, %v1378_v7 }
 0x934   : > { %v1383_v3 = vmul.f32 %v1382_v12, %v1366_v57 }
 0x936   : > { %v1387_v6 = vmul.f32 %v1717_v9, %v1383_v3 }
 0x938   : > { %v1391_v10 = vadd.f32 %v1718_v13, %v1387_v6 }
 0x93a   : > { %v1392_v14 = vpack.c.bf16 %v1391_v10, %v1391_v10  ;;  %v1398_v15 = vmul.f32 %v1397_v8, %v1391_v10 }
 0x93c   : > { %1394 = vst.msk [vmem:[%s718_s2] sm:$0xf] %vm1393_vm5, %v1392_v14  ;;  %v1399_v16 = vadd.f32 %v1398_v15, %v1395_v11 }
 0x93e   : > { %1400 = vst.msk [vmem:[%s1930_s28] sm:$0xff] %vm739_vm2, %v1399_v16 }
 0x93f PF: > { %s2151_s25 = sld [smem:[#allocation8_spill]] }
 0x940   : > { %s2152_s30 = sld [smem:[#allocation7_spill]] }
 0x941   : > { %s2153_s0 = sld [smem:[#allocation9_spill]] }
 0x945   : > { %s30_s19 = sadd.s32 1, %s2151_s25  }
 0x946   : > { %p27_p6 = scmp.ge.s32.totalorder %s30_s19, 4  }
 0x948   :  { %29 = sbr.rel (!%p27_p6) target bundleno = 13 (0xd), region = 158 }

// kernel: encoder_forward.8
= control target key start
LH: loop header
LB: loop body
LE: loop exit
PB: predicated region body
PF: predicated region fallthrough
CT: control target
= control target key end

     0   :  { %s2283_s0 = inlined_call_operand.<no memory space> [shape: f32[1], index: 0, kind: input, shape index: {}]   ;;  %s2284_s1 = inlined_call_operand.vmem [shape: bf16[2,8,32], index: 1, kind: input, shape index: {}]   ;;  %s2285_s2 = inlined_call_operand.vmem [shape: bf16[2,8,32], index: 2, kind: input, shape index: {}]   ;;  %s2286_s3 = inlined_call_operand.vmem [shape: bf16[2,8,32], index: 3, kind: input, shape index: {}]   ;;  %s2287_s4 = inlined_call_operand.vmem [shape: bf16[2,8,32], index: 4, kind: input, shape index: {}]   ;;  %s2288_s5 = inlined_call_operand.vmem [shape: f32[1,2,1,8], index: 5, kind: input, shape index: {}]   ;;  %s2289_s6 = inlined_call_operand.vmem [shape: bf16[32,32], index: 6, kind: input, shape index: {}]   ;;  %s2290_s7 = inlined_call_operand.vmem [shape: f32[1,32], index: 7, kind: input, shape index: {}]   ;;  %s2291_s8 = inlined_call_operand.vmem [shape: f32[1,32], index: 8, kind: input, shape index: {}]   ;;  %s2292_s9 = inlined_call_operand.vmem [shape: f32[1,32], index: 9, kind: input, shape index: {}]   ;;  %s2293_s10 = inlined_call_operand.vmem [shape: bf16[64,32], index: 10, kind: input, shape index: {}]   ;;  %s2294_s11 = inlined_call_operand.vmem [shape: f32[1,1,64], index: 11, kind: input, shape index: {}]   ;;  %s2295_s12 = inlined_call_operand.vmem [shape: bf16[64,32], index: 12, kind: input, shape index: {}]   ;;  %s2296_s13 = inlined_call_operand.vmem [shape: f32[1,32], index: 13, kind: input, shape index: {}]   ;;  %s2297_s14 = inlined_call_operand.vmem [shape: f32[1,32], index: 14, kind: input, shape index: {}]   ;;  %s2298_s15 = inlined_call_operand.vmem [shape: f32[1,32], index: 15, kind: input, shape index: {}]   ;;  %s2299_s16 = inlined_call_operand.vmem [shape: f32[2,8,32], index: 16, kind: input, shape index: {}, may-alias: {16,18}]   ;;  %s2300_s17 = inlined_call_operand.hbm [shape: bf16[2,8,32], index: 17, kind: output, shape index: {0}]   ;;  %s2301_s18 = inlined_call_operand.vmem [shape: f32[2,8,32], index: 18, kind: output, shape index: {1}, may-alias: {16,18}]  }
   0x1   :  { %2314 = sst [smem:[#allocation19_spill]] %s2283_s0 }
   0x2   :  { %2315 = sst [smem:[#allocation20_spill]] %s2284_s1 }
   0x3   :  { %2316 = sst [smem:[#allocation21_spill]] %s2285_s2 }
   0x4   :  { %2317 = sst [smem:[#allocation22_spill]] %s2286_s3 }
   0x5   :  { %2318 = sst [smem:[#allocation23_spill]] %s2288_s5 }
   0x6   :  { %2319 = sst [smem:[#allocation24_spill]] %s2297_s14 }
   0x7   :  { %2320 = sst [smem:[#allocation25_spill]] %s2298_s15 }
   0x8   :  { %2321 = sst [smem:[#allocation26_spill]] %s2300_s17 }
   0x9   :  { %s2322_s29 = sld [smem:[#allocation19_spill]] }
   0xf   :  { %24 = sst [smem:[#allocation6]] %s2322_s29 }
  0x10   :  { %25 = vsyncpa [#allocation8], 0 }
  0x11   :  { %27 = vsyncpa [#allocation8 + $0x1], 0  ;;  %s1963_s30 = smov 0   ;;  %s1965_s0 = smov 0  }
  0x12   :  { %s1967_s19 = smov 0   ;;  %s1969_s1 = smov 0  }
  0x13   :  { %s1971_s20 = smov 0   ;;  %s1973_s21 = smov 0  }
  0x14 LB: > { %2323 = sst [smem:[#allocation10_spill]] %s1832_s30  ;;  %s1587_s22 = sadd.s32 4294967295, %s1852_s21   ;;  %s1852_s21 = sphi %s1973_s21, %s33_s21   ;;  %s1848_s20 = sphi %s1971_s20, %s2351_s20   ;;  %s1844_s1 = sphi %s1969_s1, %s2350_s1   ;;  %s1840_s19 = sphi %s1967_s19, %s2349_s19   ;;  %s1836_s0 = sphi %s1965_s0, %s2348_s0   ;;  %s1832_s30 = sphi %s1963_s30, %s2347_s30  }
  0x15   : > { %2324 = sst [smem:[#allocation11_spill]] %s1836_s0  ;;  %s1588_s2 = sadd.s32 4294967294, %s1852_s21  }
  0x16   : > { %2325 = sst [smem:[#allocation12_spill]] %s1840_s19  ;;  %s45_s23 = sadd.s32 1, %s1848_s20 }
  0x17   : > { %2326 = sst [smem:[#allocation13_spill]] %s1848_s20  ;;  %s447_s24 = sadd.s32 1, %s1840_s19 }
  0x18   : > { %2327 = sst [smem:[#allocation14_spill]] %s1852_s21  ;;  %p47_p0 = scmp.ge.s32.totalorder %s45_s23, 2 }
  0x19   : > { %p457_p1 = scmp.ne.s32.totalorder %s1840_s19, %s1836_s0  ;;  %p458_p2 = scmp.eq.s32.totalorder %s1587_s22, 1 }
  0x1a   : > { %p463_p3 = scmp.ne.s32.totalorder %s1836_s0, %s1832_s30  ;;  %s2353_s23 = smov (%p47_p0, %s45_s23), 0 }
  0x1b   : > { %2328 = sst [smem:[#allocation15_spill]] %s2353_s23  ;;  %p2003_p4 = por %p458_p2, %p457_p1 }
  0x1c   : > { %p464_p5 = scmp.eq.s32.totalorder %s1588_s2, 1  ;;  %s442_s26 = ssub.s32 %s1848_s20, %s2353_s23 }
  0x1d   : > { %s2329_s25 = scalar_select %p2003_p4, 1, 0 }
  0x1e   : > { %p1591_p6 = scmp.ge.s32.totalorder %s1852_s21, 1  ;;  %p445_p7 = scmp.eq.s32.totalorder %s442_s26, 0 }
  0x1f   : > { %2330 = sst [smem:[#allocation16_spill]] %s2329_s25  ;;  %p2010_p8 = por %p464_p5, %p463_p3 }
  0x20   : > { %p593_p9 = scmp.lt.s32.totalorder %s1852_s21, 3 }
  0x21   : > { %s2331_s27 = scalar_select %p2010_p8, 1, 0 }
  0x22   : > { %s2016_s28 = scalar_select %p445_p7, %s1840_s19, %s447_s24  }
  0x23   : > { %2332 = sst [smem:[#allocation17_spill]] %s2331_s27  ;;  %p594_p10 = pnand %p1591_p6, %p593_p9 }
  0x24   : > { %2333 = sst [smem:[#allocation18_spill]] %s2016_s28  ;;  %s2303_s29 = sand.u32 (!%p594_p10), 1, %s1836_s0  }
  0x25   : > { %597 = sbr.rel (%p594_p10) target bundleno = 2386 (0x952), region = 88  ;;  %p681_p11 = scmp.lt.s32.totalorder (!%p594_p10), %s1844_s1, 1 }
  0x26   : > { %s2022_s22 = sshll.u32 (!%p594_p10), %s2303_s29, 2  ;;  %s2334_s5 = sld [smem:[#allocation23_spill]] (!%p594_p10) }
  0x27   : > { %s2335_s19 = sld [smem:[#allocation20_spill]] (!%p594_p10) }
  0x28   : > { %s2336_s25 = sld [smem:[#allocation21_spill]] (!%p594_p10) }
  0x29   : > { %s2337_s3 = sld [smem:[#allocation22_spill]] (!%p594_p10) }
  0x2a   : > { %vm724_vm0 = vcmask 7168   ;;  %v1854_v0 = vmov -1e+30   ;;  %s682_s2 = scalar_select %p681_p11, %s1844_s1, 1  ;;  %vm736_vm1 = vcmask 57344   ;;  %v1855_v1 = vmov 0.0  }
  0x2b   : > { %725 = vst.msk [vmem:[#allocation2] sm:$0xff] %vm724_vm0, %v1854_v0  ;;  %vm733_vm2 = vcmask 261120  }
  0x2c   : > { %726 = vst.msk [vmem:[#allocation2 + $0x8] sm:$0xff] %vm724_vm0, %v1854_v0  ;;  %s2029_s24 = sshll.u32 %s682_s2, 2  ;;  %s705_s29 = scalar_lea.vmem %s2334_s5, %s682_s2 }
  0x2d   : > { %727 = vst.msk [vmem:[#allocation2 + $0x10] sm:$0xff] %vm724_vm0, %v1854_v0  ;;  %s687_s27 = scalar_lea.vmem %s2335_s19, %s2029_s24  ;;  %v735_v2 = vld [vmem:[%s705_s29] sm:$0x1]  ;;  %s702_s14 = scalar_lea.vmem %s2287_s4, %s2029_s24 }
  0x2e   : > { %728 = vst.msk [vmem:[#allocation2 + $0x18] sm:$0xff] %vm724_vm0, %v1854_v0  ;;  %s694_s17 = scalar_lea.vmem %s2336_s25, %s2029_s24  ;;  %v2054_v3 = vld [vmem:[%s687_s27] sm:$0xf]  ;;  %v737_v5 = vsel %vm736_vm1, %v735_v2, -inf  ;;  %s1597_s30 = sshll.u32 %s682_s2, 3 }
  0x2f   : > { %729 = vst.msk [vmem:[#allocation3] sm:$0xff] %vm724_vm0, %v1855_v1  ;;  %s698_s5 = scalar_lea.vmem %s2337_s3, %s2029_s24  ;;  %v723_v4 = vld [vmem:[%s694_s17] sm:$0xf]  ;;  %v722_v6 = vunpack.c.l.bf16 %v2054_v3  ;;  %738 = vmax.xlane.f32.xlu0 %v737_v5  ;;  %s2064_s15 = scalar_lea.vmem %s2299_s16, %s1597_s30 }
  0x30   : > { %730 = vst.msk [vmem:[#allocation3 + $0x8] sm:$0xff] %vm724_vm0, %v1855_v1  ;;  %s2069_s17 = scalar_lea.vmem %s2301_s18, %s1597_s30  ;;  %s671_s27 = scalar_lea.vmem [#allocation7], %s2022_s22 }
  0x31   : > { %731 = vst.msk [vmem:[#allocation3 + $0x10] sm:$0xff] %vm724_vm0, %v1855_v1 }
  0x32   : > { %732 = vst.msk [vmem:[#allocation3 + $0x18] sm:$0xff] %vm724_vm0, %v1855_v1 }
  0x33   : > { %734 = vst.msk [vmem:[#allocation4] sm:$0xff] %vm733_vm2, %v1855_v1 }
  0xa2   : > { %v739_v7 = vpop.xlane.xlu0 %738 }
  0xa3   : > { %v740_v8 = vrot.slane %v739_v7, 4 }
  0xa5   : > { %v741_v9 = vmax.f32 %v739_v7, %v740_v8 }
  0xa7   : > { %v742_v10 = vrot.slane %v741_v9, 2 }
  0xa9   : > { %v743_v11 = vmax.f32 %v741_v9, %v742_v10 }
  0xab   : > { %v744_v12 = vrot.slane %v743_v11, 1 }
  0xad   : > { %v745_v13 = vmax.f32 %v743_v11, %v744_v12 }
  0xaf   : > { %1664 = vpush %v745_v13 }
  0xe0   : > { %s1665_s25 = spop %1664 }
  0xe1   : > { %p747_p12 = scmp.gt.f32.partialorder %s1665_s25, -1e+29 }
  0xe2   : > { %v751_v14 = vld [vmem:[%s698_s5] sm:$0xf] (%p747_p12)  ;;  %vm753_vm3 = vcmask (%p747_p12), 64512   ;;  %v2076_v16 = vperm.slane (%p747_p12), %v735_v2, 0  ;;  %s1856_s28 = smov (%p747_p12), 112   ;;  %s1857_s5 = smov (%p747_p12), 120   ;;  %v833_v25 = vunpack.c.l.b16 (%p747_p12), %v723_v4 }
  0xe3   : > { %750 = sbr.rel (!%p747_p12) target bundleno = 1268 (0x4f4), region = 92  ;;  %v758_v15 = vsel (%p747_p12), %vm753_vm3, %v751_v14, 0  ;;  %v838_v21 = vunpack.c.l.b16 (%p747_p12), %v751_v14  ;;  %v1858_v24 = vmov (%p747_p12), 0   ;;  %s1859_s29 = smov (%p747_p12), 104   ;;  %v2084_v27 = vld [vmem:[#allocation2] sm:$0xff] (%p747_p12)  ;;  %vm812_vm4 = vcmask (%p747_p12), 1043456  }
  0xe4   : > { %767 = vmatpush.bf16.xpose.msra.mxu0 (%p747_p12), %v758_v15  ;;  %1732 = vset.pattern.permute.xlu1 (%p747_p12), %v1858_v24  ;;  %v834_v26 = vpack.c.b16 (%p747_p12), %v833_v25, %v833_v25  ;;  %v752_v33 = vld [vmem:[%s702_s14] sm:$0xf] (%p747_p12)  ;;  %v2125_v8 = vld [vmem:[#allocation2 + $0x18] sm:$0xff] (%p747_p12)  ;;  %v954_v12 = vld [vmem:[#allocation2 + $0x10] sm:$0xff] (%p747_p12)  ;;  %s1860_s14 = smov (%p747_p12), 8   ;;  %s1861_s24 = smov (%p747_p12), 16  }
  0xe5   : > { %v839_v23 = vpack.c.b16 (%p747_p12), %v838_v21, %v838_v21  ;;  %1733 = vset.pattern.permute.xlu2 (%p747_p12), %v1858_v24  ;;  %1734 = vset.pattern.permute.xlu0 (%p747_p12), %v1858_v24  ;;  %v814_v34 = vsel (%p747_p12), %vm812_vm4, %v752_v33, 0  ;;  %v897_v63 = vunpack.c.l.b16 (%p747_p12), %v752_v33  ;;  %s1862_s26 = smov (%p747_p12), 24   ;;  %vm925_vm5 = vcmask (%p747_p12), 130112  }
  0xe6   : > { %823 = vmatpush.bf16.msra.mxu1 (%p747_p12), %v814_v34  ;;  %vm1012_vm6 = vcmask (%p747_p12), 195712   ;;  %vm1099_vm7 = vcmask (%p747_p12), 261312  }
  0xe7   : > { %930 = vrot.lane.b32.xlu2 (%p747_p12), %v839_v23, %s1856_s28  ;;  %v898_v2 = vpack.c.b16 (%p747_p12), %v897_v63, %v897_v63 }
  0xeb   : > { %1599 = vmatmul.msk.bf16.vlgmr.msra.gmra.mxu0 %vm753_vm3, %v723_v4  ;;  %v864_v4 = vld [vmem:[#allocation2 + $0x8] sm:$0xff] }
  0xef   : > { %928 = vrot.lane.b32.xlu2 %v834_v26, %s1856_s28 }
  0xf7   : > { %1015 = vrot.lane.b32.xlu2 %v834_v26, %s1859_s29 }
 0x141   : > { %v931_v35 = vpop.permute.xlu2 %930 }
 0x142   : > { %v936_v36 = vsel %vm753_vm3, %v931_v35, 0 }
 0x143   : > { %945 = vmatpush.bf16.xpose.msrb.mxu1 %v936_v36  ;;  %v801_v36 = vld [vmem:[#allocation4] sm:$0xff] }
 0x149   : > { %v929_v43 = vpop.permute.xlu2 %928 }
 0x151   : > { %v1016_v46 = vpop.permute.xlu2 %1015 }
 0x168   : > { %v769_v17 = vpop.f32.mrf.mxu0 }
 0x169   : > { %v773_v18 = vmul.f32 0.35355338, %v769_v17 }
 0x16b   : > { %v777_v19 = vadd.f32 %v2076_v16, %v773_v18 }
 0x16d   : > { %v779_v20 = vsel %vm753_vm3, %v777_v19, -inf }
 0x16e   : > { %780 = vmax.xlane.f32.xlu0 %v779_v20 }
 0x170   : > { %v771_v22 = vpop.f32.mrf.mxu0 }
 0x182   : > { %840 = vrot.lane.b32.xlu0 %v839_v23, %s1857_s5 }
 0x1e1   : > { %v781_v28 = vpop.xlane.xlu0 %780 }
 0x1e2   : > { %v2087_v29 = vmax.f32 %v2084_v27, %v781_v28 }
 0x1e4   : > { %v783_v30 = vsub.f32 %v2084_v27, %v2087_v29  ;;  %831 = vst.msk [vmem:[#allocation2] sm:$0xff] %vm724_vm0, %v2087_v29  ;;  %788 = vperm.xlu1 %1732, %v2087_v29  }
 0x1e6   : > { %v784_v14 = vmul.f32 1.442695, %v783_v30 }
 0x1ec   : > { %835 = vrot.lane.b32.xlu1 %v834_v26, %s1857_s5 }
 0x1f4   : > { %1017 = vrot.lane.b32.xlu1 %v839_v23, %s1859_s29  ;;  %v841_v31 = vpop.permute.xlu0 %840 }
 0x1f5   : > { %v846_v32 = vsel %vm753_vm3, %v841_v31, 0 }
 0x1f6   : > { %855 = vmatpush.bf16.xpose.msra.mxu2 %v846_v32 }
 0x256   : > { %v789_v37 = vpop.permute.xlu1 %788 }
 0x257   : > { %v791_v38 = vsub.f32 %v777_v19, %v789_v37 }
 0x259   : > { %v792_v39 = vmul.f32 1.442695, %v791_v38 }
 0x25b   : > { %1735 = vpow2.f32 %v792_v39 }
 0x25c   : > { %1737 = vpow2.f32 %v784_v14 }
 0x25e   : > { %v836_v40 = vpop.permute.xlu1 %835 }
 0x25f   : > { %1601 = vmatmul.msk.bf16.vlgmr.msra.gmra.mxu2 %vm753_vm3, %v836_v40 }
 0x261   : > { %v1736_v41 = vpop.eup %1735 }
 0x262   : > { %v808_v42 = vpack.c.bf16 %v1736_v41, %v1736_v41  ;;  %v1738_v18 = vpop.eup %1737  ;;  %v796_v20 = vsel %vm753_vm3, %v1736_v41, 0.0 }
 0x264   : > { %1600 = vmatmul.msk.bf16.vlgmr.msra.gmra.mxu1 %vm753_vm3, %v808_v42 }
 0x266   : > { %v1018_v44 = vpop.permute.xlu1 %1017 }
 0x267   : > { %v1023_v45 = vsel %vm753_vm3, %v1018_v44, 0 }
 0x268   : > { %1032 = vmatpush.bf16.xpose.msrb.mxu0 %v1023_v45 }
 0x26f   : > { %1605 = vmatmul.msk.bf16.vlgmr.msrb.gmra.mxu0 %vm753_vm3, %v1016_v46 }
 0x274   : > { %1603 = vmatmul.msk.bf16.vlgmr.msrb.gmra.mxu1 %vm753_vm3, %v929_v43 }
 0x2e1   : > { %v2109_v47 = vpop.f32.mrf.mxu1 }
 0x2e2   : > { %v857_v48 = vpop.f32.mrf.mxu2 }
 0x2e3   : > { %v861_v49 = vmul.f32 0.35355338, %v857_v48 }
 0x2e5   : > { %v862_v50 = vadd.f32 %v861_v49, %v2076_v16 }
 0x2e7   : > { %v865_v51 = vsel %vm753_vm3, %v862_v50, -inf }
 0x2e8   : > { %866 = vmax.xlane.f32.xlu1 %v865_v51  ;;  %v794_v51 = vld [vmem:[#allocation3] sm:$0xff] }
 0x2e9   : > { %v827_v52 = vpop.f32.mrf.mxu1 }
 0x2ea   : > { %v859_v53 = vpop.f32.mrf.mxu2  ;;  %v795_v52 = vmul.f32 %v1738_v18, %v794_v51 }
 0x2ec   : > { %v1034_v54 = vpop.f32.mrf.mxu0 }
 0x2ed   : > { %v1038_v55 = vmul.f32 0.35355338, %v1034_v54 }
 0x2ef   : > { %v2114_v56 = vadd.f32 %v1038_v55, %v2076_v16  ;;  %v881_v55 = vld [vmem:[#allocation3 + $0x8] sm:$0xff] }
 0x2f1   : > { %v947_v57 = vpop.f32.mrf.mxu1  ;;  %v1042_v58 = vsel %vm753_vm3, %v2114_v56, -inf }
 0x2f2   : > { %v951_v59 = vmul.f32 0.35355338, %v947_v57  ;;  %1043 = vmax.xlane.f32.xlu0 %v1042_v58 }
 0x2f4   : > { %v2119_v60 = vadd.f32 %v951_v59, %v2076_v16  ;;  %v1036_v61 = vpop.f32.mrf.mxu0 }
 0x2f6   : > { %v955_v62 = vsel %vm753_vm3, %v2119_v60, -inf }
 0x2f7   : > { %956 = vmax.xlane.f32.xlu2 %v955_v62 }
 0x2f9   : > { %v949_v0 = vpop.f32.mrf.mxu1 }
 0x2fa   : > { %v1058_v0 = vld [vmem:[#allocation3 + $0x18] sm:$0xff] }
 0x301   : > { %899 = vrot.lane.b32.xlu1 %v898_v2, %s1857_s5 }
 0x35b   : > { %v867_v5 = vpop.xlane.xlu1 %866 }
 0x35c   : > { %v868_v7 = vmax.f32 %v864_v4, %v867_v5 }
 0x35e   : > { %927 = vst.msk [vmem:[#allocation2 + $0x8] sm:$0xff] %vm724_vm0, %v868_v7  ;;  %874 = vperm.xlu2 %1733, %v868_v7   ;;  %v869_v16 = vsub.f32 %v864_v4, %v868_v7 }
 0x360   : > { %v870_v17 = vmul.f32 1.442695, %v869_v16 }
 0x362   : > { %1739 = vpow2.f32 %v870_v17 }
 0x365   : > { %v1044_v9 = vpop.xlane.xlu0 %1043 }
 0x366   : > { %v2128_v10 = vmax.f32 %v2125_v8, %v1044_v9  ;;  %986 = vrot.lane.b32.xlu2 %v898_v2, %s1856_s28 }
 0x368   : > { %v1046_v11 = vsub.f32 %v2125_v8, %v2128_v10  ;;  %1101 = vst.msk [vmem:[#allocation2 + $0x18] sm:$0xff] %vm724_vm0, %v2128_v10  ;;  %1051 = vperm.xlu1 %1732, %v2128_v10   ;;  %v1740_v19 = vpop.eup %1739 }
 0x36a   : > { %v957_v13 = vpop.xlane.xlu2 %956 }
 0x36b   : > { %v958_v15 = vmax.f32 %v954_v12, %v957_v13 }
 0x36d   : > { %1014 = vst.msk [vmem:[#allocation2 + $0x10] sm:$0xff] %vm724_vm0, %v958_v15  ;;  %964 = vperm.xlu0 %1734, %v958_v15   ;;  %v959_v21 = vsub.f32 %v954_v12, %v958_v15 }
 0x36e   : > { %1073 = vrot.lane.b32.xlu2 %v898_v2, %s1859_s29 }
 0x36f   : > { %v960_v22 = vmul.f32 1.442695, %v959_v21 }
 0x371   : > { %1741 = vpow2.f32 %v960_v22 }
 0x373   : > { %v900_v23 = vpop.permute.xlu1 %899 }
 0x374   : > { %v905_v24 = vsel %vm812_vm4, %v900_v23, 0 }
 0x375   : > { %914 = vmatpush.bf16.msra.mxu3 %v905_v24 }
 0x376   : > { %804 = vperm.xlu2 %1733, %v1738_v18  }
 0x377   : > { %v2143_v25 = vpop.eup %1741 }
 0x37e   : > { %891 = vperm.xlu2 %1733, %v1740_v19  }
 0x392   : > { %797 = vadd.xlane.f32.xlu1 %v796_v20 }
 0x3ab   : > { %981 = vperm.xlu1 %1732, %v2143_v25  }
 0x3b8   : > { %v875_v26 = vpop.permute.xlu2 %874 }
 0x3b9   : > { %v877_v27 = vsub.f32 %v862_v50, %v875_v26 }
 0x3bb   : > { %v878_v28 = vmul.f32 1.442695, %v877_v27 }
 0x3bd   : > { %1743 = vpow2.f32 %v878_v28 }
 0x3c0   : > { %v987_v29 = vpop.permute.xlu2 %986 }
 0x3c1   : > { %v992_v30 = vsel %vm812_vm4, %v987_v29, 0 }
 0x3c2   : > { %1001 = vmatpush.bf16.msrb.mxu3 %v992_v30 }
 0x3c3   : > { %v1744_v31 = vpop.eup %1743 }
 0x3c4   : > { %v883_v32 = vsel %vm753_vm3, %v1744_v31, 0.0  ;;  %v895_v33 = vpack.c.bf16 %v1744_v31, %v1744_v31 }
 0x3c5   : > { %884 = vadd.xlane.f32.xlu0 %v883_v32 }
 0x3c6   : > { %1602 = vmatmul.msk.bf16.vlgmr.msra.gmra.mxu3 %vm753_vm3, %v895_v33 }
 0x3c8   : > { %v1074_v34 = vpop.permute.xlu2 %1073 }
 0x3c9   : > { %v1079_v35 = vsel %vm812_vm4, %v1074_v34, 0 }
 0x3ca   : > { %1088 = vmatpush.bf16.msrb.mxu2 %v1079_v35 }
 0x3d0   : > { %v805_v37 = vpop.permute.xlu2 %804 }
 0x3d1   : > { %v807_v38 = vmul.f32 %v805_v37, %v801_v36 }
 0x3d3   : > { %v829_v39 = vadd.f32 %v2109_v47, %v807_v38 }
 0x3d5   : > { %830 = vst.msk [vmem:[#allocation4] sm:$0xff] %vm753_vm3, %v829_v39 }
 0x3d8   : > { %v892_v10 = vpop.permute.xlu2 %891 }
 0x3da   : > { %v1052_v40 = vpop.permute.xlu1 %1051 }
 0x3db   : > { %v1054_v41 = vsub.f32 %v2114_v56, %v1052_v40  ;;  %v882_v56 = vmul.f32 %v1740_v19, %v881_v55  ;;  %v971_v19 = vld [vmem:[#allocation3 + $0x10] sm:$0xff] }
 0x3dc   : > { %v972_v22 = vmul.f32 %v2143_v25, %v971_v19 }
 0x3dd   : > { %v1055_v42 = vmul.f32 1.442695, %v1054_v41 }
 0x3df   : > { %1745 = vpow2.f32 %v1055_v42  ;;  %v965_v43 = vpop.permute.xlu0 %964 }
 0x3e0   : > { %v967_v44 = vsub.f32 %v2119_v60, %v965_v43  ;;  %v1047_v60 = vmul.f32 1.442695, %v1046_v11  ;;  %v888_v11 = vld [vmem:[#allocation4] sm:$0xff] }
 0x3e1   : > { %v894_v14 = vmul.f32 %v892_v10, %v888_v11 }
 0x3e2   : > { %v968_v45 = vmul.f32 1.442695, %v967_v44 }
 0x3e4   : > { %1747 = vpow2.f32 %v968_v45 }
 0x3e5   : > { %v1746_v46 = vpop.eup %1745  ;;  %1749 = vpow2.f32 %v1047_v60 }
 0x3e6   : > { %v1060_v48 = vsel %vm753_vm3, %v1746_v46, 0.0  ;;  %v1072_v49 = vpack.c.bf16 %v1746_v46, %v1746_v46 }
 0x3e7   : > { %1061 = vadd.xlane.f32.xlu1 %v1060_v48 }
 0x3e8   : > { %1606 = vmatmul.msk.bf16.vlgmr.msrb.gmra.mxu2 %vm753_vm3, %v1072_v49 }
 0x3ea   : > { %v1748_v47 = vpop.eup %1747 }
 0x3eb   : > { %v985_v50 = vpack.c.bf16 %v1748_v47, %v1748_v47  ;;  %v1750_v63 = vpop.eup %1749  ;;  %v973_v12 = vsel %vm753_vm3, %v1748_v47, 0.0 }
 0x3ec   : > { %v1059_v2 = vmul.f32 %v1750_v63, %v1058_v0 }
 0x3ed   : > { %1604 = vmatmul.msk.bf16.vlgmr.msrb.gmra.mxu3 %vm753_vm3, %v985_v50 }
 0x405   : > { %v798_v53 = vpop.xlane.xlu1 %797 }
 0x406   : > { %v799_v54 = vadd.f32 %v798_v53, %v795_v52 }
 0x408   : > { %800 = vst.msk [vmem:[#allocation3] sm:$0xff] %vm724_vm0, %v799_v54 }
 0x41d   : > { %v982_v62 = vpop.permute.xlu1 %981 }
 0x438   : > { %v885_v57 = vpop.xlane.xlu0 %884 }
 0x439   : > { %v886_v58 = vadd.f32 %v885_v57, %v882_v56 }
 0x43b   : > { %887 = vst.msk [vmem:[#allocation3 + $0x8] sm:$0xff] %vm724_vm0, %v886_v58 }
 0x449   : > { %v916_v59 = vpop.f32.mrf.mxu3 }
 0x44a   : > { %921 = vrot.lane.b32.xlu2 %v916_v59, %s1860_s14 }
 0x451   : > { %v918_v61 = vpop.f32.mrf.mxu3 }
 0x45a   : > { %v1062_v4 = vpop.xlane.xlu1 %1061 }
 0x45b   : > { %v1063_v5 = vadd.f32 %v1062_v4, %v1059_v2 }
 0x45d   : > { %1064 = vst.msk [vmem:[#allocation3 + $0x18] sm:$0xff] %vm724_vm0, %v1063_v5 }
 0x46b   : > { %v1090_v7 = vpop.f32.mrf.mxu2 }
 0x470   : > { %v1003_v9 = vpop.f32.mrf.mxu3 }
 0x471   : > { %1008 = vrot.lane.b32.xlu0 %v1003_v9, %s1861_s24 }
 0x473   : > { %v1092_v13 = vpop.f32.mrf.mxu2  ;;  %974 = vadd.xlane.f32.xlu2 %v973_v12 }
 0x478   : > { %v1005_v8 = vpop.f32.mrf.mxu3 }
 0x479   : > { %1095 = vrot.lane.b32.xlu0 %v1090_v7, %s1862_s26 }
 0x48b   : > { %1068 = vperm.xlu2 %1733, %v1750_v63  }
 0x4a4   : > { %v922_v15 = vpop.permute.xlu2 %921 }
 0x4a5   : > { %v924_v16 = vadd.f32 %v922_v15, %v894_v14 }
 0x4a7   : > { %926 = vst.msk [vmem:[#allocation4] sm:$0xff] %vm925_vm5, %v924_v16 }
 0x4ae   : > { %v978_v17 = vld [vmem:[#allocation4] sm:$0xff] }
 0x4af   : > { %v984_v18 = vmul.f32 %v982_v62, %v978_v17 }
 0x4e3   : > { %v1009_v20 = vpop.permute.xlu0 %1008 }
 0x4e4   : > { %v1011_v21 = vadd.f32 %v1009_v20, %v984_v18 }
 0x4e6   : > { %1013 = vst.msk [vmem:[#allocation4] sm:$0xff] %vm1012_vm6, %v1011_v21  ;;  %v975_v23 = vpop.xlane.xlu2 %974 }
 0x4e7   : > { %v976_v24 = vadd.f32 %v975_v23, %v972_v22 }
 0x4e9   : > { %977 = vst.msk [vmem:[#allocation3 + $0x10] sm:$0xff] %vm724_vm0, %v976_v24 }
 0x4eb   : > { %v1096_v29 = vpop.permute.xlu0 %1095 }
 0x4ed   : > { %v1065_v26 = vld [vmem:[#allocation4] sm:$0xff] }
 0x4ee   : > { %v1069_v27 = vpop.permute.xlu2 %1068 }
 0x4ef   : > { %v1071_v28 = vmul.f32 %v1069_v27, %v1065_v26 }
 0x4f1   : > { %v1098_v30 = vadd.f32 %v1096_v29, %v1071_v28 }
 0x4f3   : > { %1100 = vst.msk [vmem:[#allocation4] sm:$0xff] %vm1099_vm7, %v1098_v30 }
 0x4f4 PF: > { %v1102_v31 = vld [vmem:[#allocation3] sm:$0xff]  ;;  %v1128_v32 = vld [vmem:[#allocation3 + $0x10] sm:$0xff]  ;;  %1232 = vst.msk [vmem:[#allocation5] sm:$0xff] %vm733_vm2, %v1855_v1  ;;  %v1863_v33 = vmov 0   ;;  %v1115_v35 = vld [vmem:[#allocation3 + $0x8] sm:$0xff]  ;;  %vm1112_vm8 = vcmask 64512  }
 0x4f5   : > { %1751 = vset.pattern.permute.xlu0 %v1863_v33  ;;  %v1103_v25 = vmax.f32 %v1102_v31, 1e-30  ;;  %1752 = vset.pattern.permute.xlu1 %v1863_v33  ;;  %v1129_v34 = vmax.f32 %v1128_v32, 1e-30  ;;  %v1141_v36 = vld [vmem:[#allocation3 + $0x18] sm:$0xff]  ;;  %v1655_v45 = vld [vmem:[%s2289_s6 + $0x8] sm:$0xff] }
 0x4f6   : > { %v1116_v37 = vmax.f32 %v1115_v35, 1e-30  ;;  %v1142_v38 = vmax.f32 %v1141_v36, 1e-30  ;;  %1184 = vmatpush.bf16.msra.mxu0 %v1655_v45  ;;  %v1654_v46 = vld [vmem:[%s2289_s6] sm:$0xff]  ;;  %vm1125_vm9 = vcmask 130112  }
 0x4f7   : > { %1760 = vrcp.f32 %v1103_v25  ;;  %vm1138_vm10 = vcmask 195712   ;;  %vm1151_vm11 = vcmask 261312   ;;  %v1753_v58 = vld [vmem:[%s2290_s7] ss:$0 sm:$0xff]  ;;  %v1864_v0 = vmov 32.0   ;;  %v1659_v2 = vld [vmem:[%s2293_s10 + $0x18] sm:$0xff] }
 0x4f8   : > { %1762 = vrcp.f32 %v1129_v34  ;;  %v1278_v4 = vsel %vm733_vm2, %v1659_v2, 0  ;;  %v1658_v15 = vld [vmem:[%s2293_s10 + $0x10] sm:$0xff]  ;;  %v1657_v17 = vld [vmem:[%s2293_s10 + $0x8] sm:$0xff]  ;;  %v1656_v19 = vld [vmem:[%s2293_s10] sm:$0xff]  ;;  %vm1328_vm0 = vcmask 523264   ;;  %s1390_s20 = sld [smem:[#allocation6]] }
 0x4f9   : > { %1764 = vrcp.f32 %v1116_v37  ;;  %1284 = vmatpush.bf16.xpose.msra.mxu1 %v1278_v4  ;;  %v1275_v16 = vsel %vm733_vm2, %v1658_v15, 0  ;;  %v1272_v18 = vsel %vm733_vm2, %v1657_v17, 0  ;;  %v1269_v20 = vsel %vm733_vm2, %v1656_v19, 0  ;;  %v1663_v21 = vld [vmem:[%s2295_s12 + $0x18] sm:$0xff]  ;;  %v1662_v24 = vld [vmem:[%s2295_s12 + $0x10] sm:$0xff]  ;;  %s1651_s0 = sshll.u32 %s1844_s1, 2 }
 0x4fa   : > { %1766 = vrcp.f32 %v1142_v38  ;;  %v1104_v1 = vld [vmem:[#allocation4] sm:$0xff]  ;;  %1185 = vmatpush.bf16.msra.mxu0 %v1654_v46  ;;  %1336 = vmatpush.bf16.msra.mxu2 %v1663_v21  ;;  %s2338_s28 = sld [smem:[#allocation24_spill]]  ;;  %s1416_s1 = sshll.u32 %s671_s27, 4  ;;  %vm1387_vm5 = vcmask 257024   ;;  %s1417_s1 = int_to_ptr.vmem [resolvable:$true] %s1416_s1 }
 0x4fb   : > { %1768 = vrcp.f32 %v1864_v0  ;;  %v1754_v33 = vld [vmem:[%s2291_s8] ss:$0 sm:$0xff]  ;;  %v1294_v46 = vld [vmem:[#allocation5] sm:$0xff]  ;;  %s2339_s2 = sld [smem:[#allocation25_spill]] }
 0x4fc   : > { %v1755_v35 = vld [vmem:[%s2292_s9] ss:$0 sm:$0xff]  ;;  %s2340_s23 = sld [smem:[#allocation11_spill]] }
 0x4fd   : > { %v1761_v39 = vpop.eup %1760  ;;  %s2341_s26 = sld [smem:[#allocation26_spill]] }
 0x4fe   : > { %1108 = vperm.xlu0 %1751, %v1761_v39   ;;  %v1763_v40 = vpop.eup %1762  ;;  %1337 = vmatpush.bf16.msra.mxu2 %v1662_v24  ;;  %v1661_v39 = vld [vmem:[%s2295_s12 + $0x8] sm:$0xff] }
 0x4ff   : > { %1134 = vperm.xlu1 %1752, %v1763_v40   ;;  %v1765_v41 = vpop.eup %1764  ;;  %v1660_v40 = vld [vmem:[%s2295_s12] sm:$0xff] }
 0x500   : > { %v1767_v42 = vpop.eup %1766 }
 0x501   : > { %v1769_v5 = vpop.eup %1768  ;;  %1285 = vmatpush.bf16.xpose.msra.mxu1 %v1275_v16 }
 0x502   : > { %v1198_v7 = vmul.f32 32.0, %v1769_v5  ;;  %vm1202_vm12 = vweird.f32 %v1769_v5  ;;  %1338 = vmatpush.bf16.msra.mxu2 %v1661_v39  ;;  %s2343_s21 = sand.u32 1, %s2340_s23  }
 0x503   : > { %s1414_s30 = scalar_lea.hbm %s2341_s26, %s1651_s0  ;;  %s1396_s25 = scalar_lea.sflag [#allocation8], %s2343_s21 }
 0x504   : > { %v1199_v9 = vsub.f32 1.0, %v1198_v7  ;;  %s1418_s3 = sshll.u32 %s1414_s30, 4  ;;  %s1419_s3 = int_to_ptr.hbm [resolvable:$true] %s1418_s3 }
 0x506   : > { %1121 = vperm.xlu0 %1751, %v1765_v41   ;;  %v1200_v12 = vmul.f32 %v1769_v5, %v1199_v9  ;;  %1339 = vmatpush.bf16.msra.mxu2 %v1660_v40  ;;  %v1756_v41 = vld [vmem:[%s2294_s11] ss:$0 sm:$0xff] }
 0x507   : > { %1147 = vperm.xlu1 %1752, %v1767_v42   ;;  %v1758_v9 = vld [vmem:[%s2338_s28] ss:$0 sm:$0xff]  ;;  %s1788_s28 = sshra.s32 %s1419_s3, 4  ;;  %s1789_s28 = int_to_ptr.hbm [resolvable:$true] %s1788_s28 }
 0x508   : > { %v1201_v13 = vadd.f32 %v1769_v5, %v1200_v12  ;;  %s1790_s0 = scalar_lea.hbm %s1789_s28, 4  ;;  %p1795_p2 = scmp.lt.s32.totalorder %s1789_s28, %s2341_s26 }
 0x509   : > { %1286 = vmatpush.bf16.xpose.msra.mxu1 %v1272_v18  ;;  %p1791_p13 = scmp.ne.s32.totalorder %s1789_s28, %s1790_s0 }
 0x50a   : > { %v2185_v3 = vsel %vm1202_vm12, %v1769_v5, %v1201_v13 }
 0x50b   : > { %p1792_p0 = pnand %p1791_p13, %p2003_p4 }
 0x50d   : > { %p1793_p1 = pneg %p1792_p0 }
 0x511   : > { %1287 = vmatpush.bf16.xpose.msra.mxu1 %v1269_v20 }
 0x570   : > { %v1109_v43 = vpop.permute.xlu0 %1108 }
 0x571   : > { %v1111_v44 = vmul.f32 %v1109_v43, %v1104_v1  ;;  %v1135_v50 = vpop.permute.xlu1 %1134 }
 0x573   : > { %1113 = vst.msk [vmem:[#allocation4] sm:$0xff] %vm1112_vm8, %v1111_v44 }
 0x578   : > { %v1122_v49 = vpop.permute.xlu0 %1121 }
 0x579   : > { %v1148_v53 = vpop.permute.xlu1 %1147 }
 0x57a   : > { %v1117_v48 = vld [vmem:[#allocation4] sm:$0xff] }
 0x57b   : > { %v1124_v47 = vmul.f32 %v1122_v49, %v1117_v48 }
 0x57d   : > { %1126 = vst.msk [vmem:[#allocation4] sm:$0xff] %vm1125_vm9, %v1124_v47 }
 0x584   : > { %v1130_v51 = vld [vmem:[#allocation4] sm:$0xff] }
 0x585   : > { %v1137_v52 = vmul.f32 %v1135_v50, %v1130_v51  ;;  %v1757_v50 = vld [vmem:[%s2296_s13] ss:$0 sm:$0xff] }
 0x587   : > { %1139 = vst.msk [vmem:[#allocation4] sm:$0xff] %vm1138_vm10, %v1137_v52 }
 0x58e   : > { %v1143_v54 = vld [vmem:[#allocation4] sm:$0xff] }
 0x58f   : > { %v1150_v55 = vmul.f32 %v1148_v53, %v1143_v54 }
 0x591   : > { %1152 = vst.msk [vmem:[#allocation4] sm:$0xff] %vm1151_vm11, %v1150_v55 }
 0x598   : > { %v1153_v56 = vld [vmem:[#allocation4] sm:$0xff] }
 0x599   : > { %v1154_v57 = vpack.c.bf16 %v1153_v56, %v1153_v56 }
 0x59b   : > { %1615 = vmatmul.msk.bf16.vlgmr.msra.gmra.mxu0 %vm733_vm2, %v1154_v57 }
 0x618   : > { %v1187_v59 = vpop.f32.mrf.mxu0 }
 0x619   : > { %v1188_v60 = vadd.f32 %v1753_v58, %v1187_v59 }
 0x61b   : > { %v1191_v61 = vadd.f32 %v1188_v60, %v722_v6 }
 0x61d   : > { %v1194_v62 = vsel %vm733_vm2, %v1191_v61, 0.0 }
 0x61e   : > { %1195 = vadd.xlane.f32.xlu2 %v1194_v62 }
 0x620   : > { %v1189_v63 = vpop.f32.mrf.mxu0 }
 0x691   : > { %v1196_v6 = vpop.xlane.xlu2 %1195 }
 0x692   : > { %v1204_v8 = vmul.f32 %v2185_v3, %v1196_v6 }
 0x694   : > { %v1205_v10 = vsub.f32 %v1191_v61, %v1204_v8  ;;  %v1391_v8 = vstv %s1390_s20 }
 0x696   : > { %v1206_v11 = vmul.f32 %v1205_v10, %v1205_v10 }
 0x698   : > { %v1207_v14 = vsel %vm733_vm2, %v1206_v11, 0.0  ;;  %v1389_v11 = vld [vmem:[%s2064_s15] sm:$0xff]  ;;  %s1794_s15 = scalar_lea.hbm %s2341_s26, 8 }
 0x699   : > { %1208 = vadd.xlane.f32.xlu2 %v1207_v14  ;;  %p1796_p3 = scmp.lt.s32.totalorder %s1794_s15, %s1790_s0 }
 0x69b   : > { %p1797_p5 = por %p1796_p3, %p1795_p2 }
 0x69d   : > { %p1798_p6 = pnand %p1797_p5, %p1793_p1 }
 0x70c   : > { %v1209_v22 = vpop.xlane.xlu2 %1208 }
 0x70d   : > { %v1210_v23 = vmul.f32 %v1209_v22, %v2185_v3 }
 0x70f   : > { %v1211_v26 = vadd.f32 1e-05, %v1210_v23 }
 0x711   : > { %1770 = vrsqrt.f32 %v1211_v26  ;;  %vm1218_vm14 = vweird.f32 %v1211_v26 }
 0x717   : > { %v1771_v27 = vpop.eup %1770 }
 0x718   : > { %v1213_v28 = vmul.f32 %v1771_v27, %v1211_v26  ;;  %vm1219_vm13 = vweird.f32 %v1771_v27 }
 0x719   : > { %vm1220_vm15 = vmor %vm1218_vm14, %vm1219_vm13 }
 0x71a   : > { %v1214_v29 = vmul.f32 %v1771_v27, %v1213_v28 }
 0x71c   : > { %v1215_v30 = vmul.f32 0.5, %v1214_v29 }
 0x71e   : > { %v1216_v31 = vsub.f32 1.5, %v1215_v30 }
 0x720   : > { %v1217_v32 = vmul.f32 %v1771_v27, %v1216_v31 }
 0x722   : > { %v1221_v25 = vsel %vm1220_vm15, %v1771_v27, %v1217_v32 }
 0x723   : > { %v1222_v34 = vmul.f32 %v1221_v25, %v1205_v10 }
 0x725   : > { %v1226_v36 = vmul.f32 %v1754_v33, %v1222_v34 }
 0x727   : > { %v1230_v37 = vadd.f32 %v1755_v35, %v1226_v36 }
 0x729   : > { %v1231_v38 = vpack.c.bf16 %v1230_v37, %v1230_v37 }
 0x72b   : > { %1632 = vmatmul.msk.bf16.vlgmr.msra.gmra.mxu1 %vm733_vm2, %v1231_v38 }
 0x7a8   : > { %v1289_v42 = vpop.f32.mrf.mxu1 }
 0x7a9   : > { %v1290_v1 = vadd.f32 %v1756_v41, %v1289_v42 }
 0x7ab   : > { %v1293_v43 = vmax.f32 %v1290_v1, 0.0 }
 0x7ad   : > { %v1295_v44 = vpack.c.bf16 %v1293_v43, %v1293_v43 }
 0x7af   : > { %1649 = vmatmul.msk.bf16.vlgmr.msra.gmra.mxu2 %vm1328_vm0, %v1295_v44 }
 0x7b0   : > { %v1291_v45 = vpop.f32.mrf.mxu1 }
 0x832   : > { %v1341_v48 = vpop.f32.mrf.mxu2 }
 0x833   : > { %v1345_v49 = vadd.f32 %v1341_v48, %v1294_v46 }
 0x835   : > { %1346 = vst.msk [vmem:[#allocation5] sm:$0xff] %vm733_vm2, %v1345_v49 }
 0x83a   : > { %v1343_v47 = vpop.f32.mrf.mxu2 }
 0x83c   : > { %v1347_v51 = vld [vmem:[#allocation5] sm:$0xff] }
 0x83d   : > { %v1348_v52 = vadd.f32 %v1347_v51, %v1230_v37 }
 0x83f   : > { %v1353_v53 = vadd.f32 %v1757_v50, %v1348_v52 }
 0x841   : > { %v1356_v54 = vsel %vm733_vm2, %v1353_v53, 0.0 }
 0x842   : > { %1357 = vadd.xlane.f32.xlu0 %v1356_v54 }
 0x8b5   : > { %v1358_v55 = vpop.xlane.xlu0 %1357 }
 0x8b6   : > { %v1359_v56 = vmul.f32 %v1358_v55, %v2185_v3 }
 0x8b8   : > { %v1360_v57 = vsub.f32 %v1353_v53, %v1359_v56 }
 0x8ba   : > { %v1361_v58 = vmul.f32 %v1360_v57, %v1360_v57 }
 0x8bc   : > { %v1362_v59 = vsel %vm733_vm2, %v1361_v58, 0.0 }
 0x8bd   : > { %1363 = vadd.xlane.f32.xlu1 %v1362_v59 }
 0x930   : > { %v1364_v60 = vpop.xlane.xlu1 %1363 }
 0x931   : > { %v1365_v61 = vmul.f32 %v1364_v60, %v2185_v3  ;;  %v1759_v3 = vld [vmem:[%s2339_s2] ss:$0 sm:$0xff] }
 0x933   : > { %v1366_v62 = vadd.f32 1e-05, %v1365_v61 }
 0x935   : > { %1772 = vrsqrt.f32 %v1366_v62  ;;  %vm1373_vm3 = vweird.f32 %v1366_v62 }
 0x93b   : > { %v1773_v63 = vpop.eup %1772 }
 0x93c   : > { %v1368_v0 = vmul.f32 %v1773_v63, %v1366_v62  ;;  %vm1374_vm1 = vweird.f32 %v1773_v63 }
 0x93d   : > { %vm1375_vm4 = vmor %vm1373_vm3, %vm1374_vm1 }
 0x93e   : > { %v1369_v2 = vmul.f32 %v1773_v63, %v1368_v0 }
 0x940   : > { %v1370_v4 = vmul.f32 0.5, %v1369_v2 }
 0x942   : > { %v1371_v5 = vsub.f32 1.5, %v1370_v4 }
 0x944   : > { %v1372_v7 = vmul.f32 %v1773_v63, %v1371_v5 }
 0x946   : > { %v1376_v12 = vsel %vm1375_vm4, %v1773_v63, %v1372_v7 }
 0x947   : > { %v1377_v13 = vmul.f32 %v1376_v12, %v1360_v57 }
 0x949   : > { %v1381_v6 = vmul.f32 %v1758_v9, %v1377_v13 }
 0x94b   : > { %v1385_v10 = vadd.f32 %v1759_v3, %v1381_v6 }
 0x94d   : > { %v1386_v14 = vpack.c.bf16 %v1385_v10, %v1385_v10  ;;  %v1392_v15 = vmul.f32 %v1391_v8, %v1385_v10 }
 0x94f   : > { %1388 = vst.msk [vmem:[%s671_s27] sm:$0xf] %vm1387_vm5, %v1386_v14  ;;  %v1393_v16 = vadd.f32 %v1392_v15, %v1389_v11 }
 0x950   : > { %1801 = shalt.err (!%p1798_p6)
}
 0x951   : > { %1666 = dma.vmem_to_hbm [thread:$0]  (%p2003_p4), %s1417_s1, 64, %s1419_s3, %s1396_s25   ;;  %1394 = vst.msk [vmem:[%s2069_s17] sm:$0xff] %vm733_vm2, %v1393_v16 }
 0x952 PF: > { %s2344_s22 = sld [smem:[#allocation14_spill]] }
 0x953   : > { %s2345_s27 = sld [smem:[#allocation10_spill]] }
 0x958   : > { %p1672_p7 = scmp.ge.s32.totalorder %s2344_s22, 2 }
 0x959   : > { %s1433_s14 = sand.u32 1, %s2345_s27  }
 0x95a   : > { %p1669_p9 = pnand %p1672_p7, %p2010_p8  ;;  %s1434_s24 = scalar_lea.sflag [#allocation8], %s1433_s14 }
 0x95c   : > { %p1670_p10 = pneg %p1669_p9 }
 0x95e   : > { %1827 = dma.done.wait (%p1670_p10), %s1434_s24, 64  }
 0x95f   : > { %1829 = vsyncadd (%p1670_p10), %s1434_s24, 4294967232  ;;  %s33_s21 = sadd.s32 1, %s2344_s22   ;;  %s2347_s30 = sld [smem:[#allocation11_spill]] }
 0x960   : > { %p30_p11 = scmp.ge.s32.totalorder %s33_s21, 4   ;;  %s2348_s0 = sld [smem:[#allocation12_spill]] }
 0x961   : > { %s2349_s19 = sld [smem:[#allocation18_spill]] }
 0x962   : > { %s2350_s1 = sld [smem:[#allocation13_spill]]  ;;  %32 = sbr.rel (!%p30_p11) target bundleno = 20 (0x14), region = 163 }
 0x963   : > { %s2351_s20 = sld [smem:[#allocation15_spill]] }
 0x967   :  { %1450 = vsyncpa [#allocation8], 1 }
 0x968   :  { %1452 = vsyncpa [#allocation8 + $0x1], 1 }

</bundles_post_ra>
